<compile_context>
chip_gen: v7x
topology: tpu7x:2x2x1
jax: 0.10.0
libtpu: 0.0.40
codegen_flags: <defaults>
</compile_context>

<pallas_src>
import functools

import jax
import jax.numpy as jnp
import numpy as np
from jax.experimental import pallas as pl
from jax.experimental.pallas import tpu as pltpu  # noqa: F401  (TPU backend assumed)

# ---- hyperparameters (the module's implicit globals, kept small) ----
VOCAB_NUM = 64
EMBED_DIM = 32
POS_NUM = 8          # max sequence length
HEAD_NUM = 4
BLOCK_NUM = 2
MULTI = 4
HEAD_DIM = EMBED_DIM // HEAD_NUM
LN_EPS = 1e-5
LEAKY_SLOPE = 0.01   # nn.LeakyReLU default

# row order of the packed per-block (1, E) vectors inside `vec` (L*6, 1, E)
_LN1_G, _LN1_B, _BP, _LN2_G, _LN2_B, _B2 = range(6)


def _layer_norm(x, gamma, beta):
    mean = jnp.mean(x, axis=-1, keepdims=True)
    var = jnp.mean((x - mean) ** 2, axis=-1, keepdims=True)
    return (x - mean) * jax.lax.rsqrt(var + LN_EPS) * gamma + beta


# -------------------- the single fused Pallas kernel --------------------

def gpt2_fwd_kernel(x_ref, mask_ref, wqkv_ref, bqkv_ref, wp_ref, vec_ref,
                    w1_ref, b1_ref, w2_ref, w_out_ref, o_ref):
    """Whole GPT-2 forward (all blocks + output projection) in one invocation.

    Operand shapes (all whole-array VMEM residents):
      x_ref     (B*S, E)                       activations, batch folded into rows
      mask_ref  (S, S)                         causal mask (tril of ones)
      wqkv_ref  (BLOCK_NUM*3*HEAD_NUM, E, d)   per (block, q/k/v, head) projection
      bqkv_ref  (BLOCK_NUM*3*HEAD_NUM, 1, d)
      wp_ref    (BLOCK_NUM*HEAD_NUM, d, E)     c_proj rows belonging to head h
      vec_ref   (BLOCK_NUM*6, 1, E)            ln1_g, ln1_b, bp, ln2_g, ln2_b, b2
      w1_ref    (BLOCK_NUM, E, MULTI*E)
      b1_ref    (BLOCK_NUM, 1, MULTI*E)
      w2_ref    (BLOCK_NUM, MULTI*E, E)
      w_out_ref (E, VOCAB_NUM)
      o_ref     (B*S, VOCAB_NUM)
    """
    n = x_ref.shape[0]            # B*S (static)
    seq = mask_ref.shape[0]       # S
    bsz = n // seq                # B
    d = HEAD_DIM

    x = x_ref[...]                               # (B*S, E)
    mask = mask_ref[...]                         # (S, S)
    neg_bias = (1.0 - mask) * 100000.0           # hoisted once, shared everywhere

    for l in range(BLOCK_NUM):                   # static unroll (2 blocks)
        ln1_g = vec_ref[6 * l + _LN1_G]          # (1, E)
        ln1_b = vec_ref[6 * l + _LN1_B]
        bp    = vec_ref[6 * l + _BP]
        ln2_g = vec_ref[6 * l + _LN2_G]
        ln2_b = vec_ref[6 * l + _LN2_B]
        b2    = vec_ref[6 * l + _B2]

        ln1 = _layer_norm(x, ln1_g, ln1_b)       # (B*S, E)

        # ---- attention (no 1/sqrt(dk); softmax over the HEAD axis) ----
        # Heads are indexed on the leading (non-lane) axis of the stacked
        # weights, so there is no lane-dim slicing and no head concatenation.
        scores, values = [], []
        for h in range(HEAD_NUM):
            iq = (3 * l + 0) * HEAD_NUM + h
            ik = (3 * l + 1) * HEAD_NUM + h
            iv = (3 * l + 2) * HEAD_NUM + h
            qh = (jnp.dot(ln1, wqkv_ref[iq], preferred_element_type=jnp.float32)
                  + bqkv_ref[iq]).reshape(bsz, seq, d)
            kh = (jnp.dot(ln1, wqkv_ref[ik], preferred_element_type=jnp.float32)
                  + bqkv_ref[ik]).reshape(bsz, seq, d)
            vh = (jnp.dot(ln1, wqkv_ref[iv], preferred_element_type=jnp.float32)
                  + bqkv_ref[iv]).reshape(bsz, seq, d)
            # batched over B, contraction folds k-transpose into the dot
            wh = jnp.einsum('bqd,bkd->bqk', qh, kh,
                            preferred_element_type=jnp.float32)   # (B, S, S)
            scores.append(wh * mask + neg_bias)
            values.append(vh)

        # softmax over the HEAD axis (torch.softmax(w, dim=1) in the reference)
        m = functools.reduce(jnp.maximum, scores)
        exps = [jnp.exp(s - m) for s in scores]
        denom = functools.reduce(jnp.add, exps)
        inv_denom = 1.0 / denom   # lowers to EUP reciprocal + mul; kept exact
                                  # (portable under interpret mode as well)

        # attention output folded straight into c_proj (no lane-dim concat):
        #   a_concat @ Wp == sum_h (p_h @ v_h) @ Wp[h*d:(h+1)*d, :]
        attn = jnp.zeros((n, EMBED_DIM), jnp.float32)
        for h in range(HEAD_NUM):
            ph = exps[h] * inv_denom                               # (B, S, S)
            ah = jnp.einsum('bqk,bkd->bqd', ph, values[h],
                            preferred_element_type=jnp.float32)    # (B, S, d)
            attn = attn + jnp.dot(ah.reshape(n, d),
                                  wp_ref[HEAD_NUM * l + h],
                                  preferred_element_type=jnp.float32)
        attn = attn + bp

        # Residual adds the LN1 output (reference quirk).
        atten = attn + ln1
        ln2 = _layer_norm(atten, ln2_g, ln2_b)

        # MLP: Linear -> LeakyReLU -> Linear (no final residual in reference).
        h1 = jnp.dot(ln2, w1_ref[l], preferred_element_type=jnp.float32) + b1_ref[l]
        h1 = jnp.where(h1 >= 0.0, h1, LEAKY_SLOPE * h1)
        x = jnp.dot(h1, w2_ref[l], preferred_element_type=jnp.float32) + b2
        # TODO(synk): dropout layers are identity (eval mode); no RNG in-kernel.

    # Output projection fused into the same kernel (no HBM round-trip of h).
    o_ref[...] = jnp.dot(x, w_out_ref[...], preferred_element_type=jnp.float32)


# -------------------- host-side weight packing & wrapper --------------------

def pack_params(params):
    """Repack reference-layout params into the stacked kernel operands."""
    d = HEAD_DIM
    wqkv, bqkv, wp, vec, w1, b1, w2 = [], [], [], [], [], [], []
    for blk in params['blocks']:
        wa = blk['wa']                               # (E, 3E): per-head [q|k|v] columns
        ba = blk['ba'].reshape(3 * EMBED_DIM)
        for t in range(3):                           # 0=q, 1=k, 2=v
            for h in range(HEAD_NUM):
                c0 = h * 3 * d + t * d               # matches reshape/transpose/chunk
                wqkv.append(wa[:, c0:c0 + d])        # (E, d)
                bqkv.append(ba[c0:c0 + d].reshape(1, d))
        for h in range(HEAD_NUM):
            wp.append(blk['wp'][h * d:(h + 1) * d, :])   # (d, E)
        vec += [blk['ln1_g'], blk['ln1_b'], blk['bp'],
                blk['ln2_g'], blk['ln2_b'], blk['b2']]
        w1.append(blk['w1'])
        b1.append(blk['b1'])
        w2.append(blk['w2'])
    return dict(
        wqkv=jnp.stack(wqkv),      # (L*3*H, E, d)
        bqkv=jnp.stack(bqkv),      # (L*3*H, 1, d)
        wp=jnp.stack(wp),          # (L*H, d, E)
        vec=jnp.stack(vec),        # (L*6, 1, E)
        w1=jnp.stack(w1),          # (L, E, 4E)
        b1=jnp.stack(b1),          # (L, 1, 4E)
        w2=jnp.stack(w2),          # (L, 4E, E)
        w_out=params['w_out'],     # (E, V)
    )


def gpt2_forward(word, pos, params):
    B, S = word.shape
    packed = pack_params(params)

    # Embedding gathers done in plain JAX (glue; data-dependent gather).
    word_embd = jnp.take(params['word_embd'], word, axis=0)        # (B, S, E)
    _pos_embd = jnp.take(params['pos_embd'], pos, axis=0)          # unused (reference bug)
    del _pos_embd
    # Reference adds the *scalar* pos_num; dropout = identity (eval).
    x0 = (word_embd + jnp.float32(POS_NUM)).reshape(B * S, EMBED_DIM)
    mask = jnp.tril(jnp.ones((S, S), jnp.float32))

    # Single fused pallas_call: no grid, every operand is a whole-array VMEM block.
    out = pl.pallas_call(
        gpt2_fwd_kernel,
        out_shape=jax.ShapeDtypeStruct((B * S, VOCAB_NUM), jnp.float32),
    )(x0, mask, packed['wqkv'], packed['bqkv'], packed['wp'], packed['vec'],
      packed['w1'], packed['b1'], packed['w2'], packed['w_out'])
    return out.reshape(B, S, VOCAB_NUM)


# -------------------- pure-JAX reference (for correctness check) --------------------

def _ref_block(x, mask, p):
    ln1 = _layer_norm(x, p['ln1_g'], p['ln1_b'])
    qkv = ln1 @ p['wa'] + p['ba']                        # (B, S, 3E)
    B, S, _ = qkv.shape
    x4 = qkv.reshape(B, S, HEAD_NUM, 3 * HEAD_DIM)
    x4 = jnp.swapaxes(x4, 1, 2)                          # (B, H, S, 3d)
    q, k, v = jnp.split(x4, 3, axis=-1)
    w = jnp.einsum('bhqd,bhkd->bhqk', q, k, precision=jax.lax.Precision.HIGHEST)
    w = w * mask + (1.0 - mask) * 100000.0
    w = jax.nn.softmax(w, axis=1)                        # over heads (reference quirk)
    a = jnp.einsum('bhqk,bhkd->bhqd', w, v, precision=jax.lax.Precision.HIGHEST)
    a = jnp.swapaxes(a, 1, 2).reshape(B, S, EMBED_DIM)
    attn = a @ p['wp'] + p['bp']
    atten = attn + ln1
    ln2 = _layer_norm(atten, p['ln2_g'], p['ln2_b'])
    h1 = ln2 @ p['w1'] + p['b1']
    h1 = jnp.where(h1 >= 0.0, h1, LEAKY_SLOPE * h1)
    return h1 @ p['w2'] + p['b2']


def gpt2_reference(word, pos, params):
    word_embd = jnp.take(params['word_embd'], word, axis=0)
    h = word_embd + jnp.float32(POS_NUM)
    S = word.shape[1]
    mask = jnp.tril(jnp.ones((S, S), jnp.float32))
    for blk in params['blocks']:
        h = _ref_block(h, mask, blk)
    return h @ params['w_out']


# -------------------- deterministic parameter init --------------------

def init_params(key):
    scale = 0.1
    counter = [0]

    def nrm(shape):
        # fold_in with a running counter: no fixed key budget -> no StopIteration.
        counter[0] += 1
        k = jax.random.fold_in(key, counter[0])
        return scale * jax.random.normal(k, shape, jnp.float32)

    params = {
        'word_embd': nrm((VOCAB_NUM, EMBED_DIM)),
        'pos_embd': nrm((POS_NUM, EMBED_DIM)),
        'w_out': nrm((EMBED_DIM, VOCAB_NUM)),   # Linear(E, V, bias=False), transposed
        'blocks': [],
    }
    for _ in range(BLOCK_NUM):
        params['blocks'].append({
            'ln1_g': jnp.ones((1, EMBED_DIM), jnp.float32),
            'ln1_b': jnp.zeros((1, EMBED_DIM), jnp.float32),
            'wa': nrm((EMBED_DIM, 3 * EMBED_DIM)),
            'ba': nrm((1, 3 * EMBED_DIM)),
            'wp': nrm((EMBED_DIM, EMBED_DIM)),
            'bp': nrm((1, EMBED_DIM)),
            'ln2_g': jnp.ones((1, EMBED_DIM), jnp.float32),
            'ln2_b': jnp.zeros((1, EMBED_DIM), jnp.float32),
            'w1': nrm((EMBED_DIM, MULTI * EMBED_DIM)),
            'b1': nrm((1, MULTI * EMBED_DIM)),
            'w2': nrm((MULTI * EMBED_DIM, EMBED_DIM)),
            'b2': nrm((1, EMBED_DIM)),
        })
    return params


if __name__ == "__main__":
    key = jax.random.PRNGKey(0)
    params = init_params(key)

    B, S = 2, POS_NUM
    word = jax.random.randint(jax.random.fold_in(key, 10_000), (B, S), 0,
                              VOCAB_NUM, dtype=jnp.int32)
    pos = jnp.tile(jnp.arange(S, dtype=jnp.int32)[None, :], (B, 1))

    fwd = jax.jit(gpt2_forward)
    out = jax.block_until_ready(fwd(word, pos, params))
    assert out.shape == (B, S, VOCAB_NUM)

    ref = gpt2_reference(word, pos, params)
    np.testing.assert_allclose(np.asarray(out), np.asarray(ref),
                               rtol=2e-2, atol=2e-3)
    print("KERNEL_OK")
</pallas_src>

<mosaic_0001>
module attributes {stable_mosaic.version = 11 : i64} {
  func.func @gpt2_fwd_kernel(%arg0: memref<16x32xf32, #tpu.memory_space<vmem>>, %arg1: memref<8x8xf32, #tpu.memory_space<vmem>>, %arg2: memref<24x32x8xf32, #tpu.memory_space<vmem>>, %arg3: memref<24x1x8xf32, #tpu.memory_space<vmem>>, %arg4: memref<8x8x32xf32, #tpu.memory_space<vmem>>, %arg5: memref<12x1x32xf32, #tpu.memory_space<vmem>>, %arg6: memref<2x32x128xf32, #tpu.memory_space<vmem>>, %arg7: memref<2x1x128xf32, #tpu.memory_space<vmem>>, %arg8: memref<2x128x32xf32, #tpu.memory_space<vmem>>, %arg9: memref<32x64xf32, #tpu.memory_space<vmem>>, %arg10: memref<16x64xf32, #tpu.memory_space<vmem>>) attributes {dimension_semantics = [], scalar_prefetch = 0 : i64, scratch_operands = 0 : i64, tpu.core_type = #tpu.core_type<tc>} {
    %c0 = arith.constant 0 : index
    %c0_0 = arith.constant 0 : index
    %0 = vector.load %arg0[%c0, %c0_0] : memref<16x32xf32, #tpu.memory_space<vmem>>, vector<16x32xf32>
    %c0_1 = arith.constant 0 : index
    %c0_2 = arith.constant 0 : index
    %1 = vector.load %arg1[%c0_1, %c0_2] : memref<8x8xf32, #tpu.memory_space<vmem>>, vector<8x8xf32>
    %cst = arith.constant 1.000000e+00 : f32
    %2 = vector.broadcast %cst : f32 to vector<8x8xf32>
    %3 = arith.subf %2, %1 : vector<8x8xf32>
    %cst_3 = arith.constant 1.000000e+05 : f32
    %4 = vector.broadcast %cst_3 : f32 to vector<8x8xf32>
    %5 = arith.mulf %3, %4 : vector<8x8xf32>
    %c0_4 = arith.constant 0 : index
    %c0_5 = arith.constant 0 : index
    %c0_6 = arith.constant 0 : index
    %6 = vector.load %arg5[%c0_4, %c0_5, %c0_6] : memref<12x1x32xf32, #tpu.memory_space<vmem>>, vector<1x1x32xf32>
    %7 = vector.shape_cast %6 : vector<1x1x32xf32> to vector<1x32xf32>
    %c1 = arith.constant 1 : index
    %c0_7 = arith.constant 0 : index
    %c0_8 = arith.constant 0 : index
    %8 = vector.load %arg5[%c1, %c0_7, %c0_8] : memref<12x1x32xf32, #tpu.memory_space<vmem>>, vector<1x1x32xf32>
    %9 = vector.shape_cast %8 : vector<1x1x32xf32> to vector<1x32xf32>
    %c2 = arith.constant 2 : index
    %c0_9 = arith.constant 0 : index
    %c0_10 = arith.constant 0 : index
    %10 = vector.load %arg5[%c2, %c0_9, %c0_10] : memref<12x1x32xf32, #tpu.memory_space<vmem>>, vector<1x1x32xf32>
    %11 = vector.shape_cast %10 : vector<1x1x32xf32> to vector<1x32xf32>
    %c3 = arith.constant 3 : index
    %c0_11 = arith.constant 0 : index
    %c0_12 = arith.constant 0 : index
    %12 = vector.load %arg5[%c3, %c0_11, %c0_12] : memref<12x1x32xf32, #tpu.memory_space<vmem>>, vector<1x1x32xf32>
    %13 = vector.shape_cast %12 : vector<1x1x32xf32> to vector<1x32xf32>
    %c4 = arith.constant 4 : index
    %c0_13 = arith.constant 0 : index
    %c0_14 = arith.constant 0 : index
    %14 = vector.load %arg5[%c4, %c0_13, %c0_14] : memref<12x1x32xf32, #tpu.memory_space<vmem>>, vector<1x1x32xf32>
    %15 = vector.shape_cast %14 : vector<1x1x32xf32> to vector<1x32xf32>
    %c5 = arith.constant 5 : index
    %c0_15 = arith.constant 0 : index
    %c0_16 = arith.constant 0 : index
    %16 = vector.load %arg5[%c5, %c0_15, %c0_16] : memref<12x1x32xf32, #tpu.memory_space<vmem>>, vector<1x1x32xf32>
    %17 = vector.shape_cast %16 : vector<1x1x32xf32> to vector<1x32xf32>
    %cst_17 = arith.constant dense<0.000000e+00> : vector<16xf32>
    %18 = vector.multi_reduction <add>, %0, %cst_17 [1] : vector<16x32xf32> to vector<16xf32>
    %19 = vector.shape_cast %18 : vector<16xf32> to vector<16x1xf32>
    %cst_18 = arith.constant 3.200000e+01 : f32
    %20 = vector.broadcast %cst_18 : f32 to vector<16x1xf32>
    %21 = arith.divf %19, %20 : vector<16x1xf32>
    %22 = vector.broadcast %21 : vector<16x1xf32> to vector<16x32xf32>
    %23 = arith.subf %0, %22 : vector<16x32xf32>
    %24 = arith.mulf %23, %23 : vector<16x32xf32>
    %cst_19 = arith.constant dense<0.000000e+00> : vector<16xf32>
    %25 = vector.multi_reduction <add>, %24, %cst_19 [1] : vector<16x32xf32> to vector<16xf32>
    %26 = vector.shape_cast %25 : vector<16xf32> to vector<16x1xf32>
    %cst_20 = arith.constant 3.200000e+01 : f32
    %27 = vector.broadcast %cst_20 : f32 to vector<16x1xf32>
    %28 = arith.divf %26, %27 : vector<16x1xf32>
    %29 = vector.broadcast %21 : vector<16x1xf32> to vector<16x32xf32>
    %30 = arith.subf %0, %29 : vector<16x32xf32>
    %cst_21 = arith.constant 9.99999974E-6 : f32
    %31 = vector.broadcast %cst_21 : f32 to vector<16x1xf32>
    %32 = arith.addf %28, %31 : vector<16x1xf32>
    %33 = math.rsqrt %32 : vector<16x1xf32>
    %34 = vector.broadcast %33 : vector<16x1xf32> to vector<16x32xf32>
    %35 = arith.mulf %30, %34 : vector<16x32xf32>
    %36 = vector.broadcast %7 : vector<1x32xf32> to vector<16x32xf32>
    %37 = arith.mulf %35, %36 : vector<16x32xf32>
    %38 = vector.broadcast %9 : vector<1x32xf32> to vector<16x32xf32>
    %39 = arith.addf %37, %38 : vector<16x32xf32>
    %c0_22 = arith.constant 0 : index
    %c0_23 = arith.constant 0 : index
    %c0_24 = arith.constant 0 : index
    %40 = vector.load %arg2[%c0_22, %c0_23, %c0_24] : memref<24x32x8xf32, #tpu.memory_space<vmem>>, vector<1x32x8xf32>
    %41 = vector.shape_cast %40 : vector<1x32x8xf32> to vector<32x8xf32>
    %cst_25 = arith.constant dense<0.000000e+00> : vector<16x8xf32>
    %42 = tpu.matmul %39, %41, %cst_25 {dimension_numbers = #tpu.dot_dimension_numbers<[1], [0], [0], [1], [0, 0, 1, 1], [], []>} : vector<16x32xf32>, vector<32x8xf32>, vector<16x8xf32> -> vector<16x8xf32>
    %c0_26 = arith.constant 0 : index
    %c0_27 = arith.constant 0 : index
    %c0_28 = arith.constant 0 : index
    %43 = vector.load %arg3[%c0_26, %c0_27, %c0_28] : memref<24x1x8xf32, #tpu.memory_space<vmem>>, vector<1x1x8xf32>
    %44 = vector.shape_cast %43 : vector<1x1x8xf32> to vector<1x8xf32>
    %45 = vector.broadcast %44 : vector<1x8xf32> to vector<16x8xf32>
    %46 = arith.addf %42, %45 : vector<16x8xf32>
    %47 = vector.shape_cast %46 : vector<16x8xf32> to vector<2x8x8xf32>
    %c4_29 = arith.constant 4 : index
    %c0_30 = arith.constant 0 : index
    %c0_31 = arith.constant 0 : index
    %48 = vector.load %arg2[%c4_29, %c0_30, %c0_31] : memref<24x32x8xf32, #tpu.memory_space<vmem>>, vector<1x32x8xf32>
    %49 = vector.shape_cast %48 : vector<1x32x8xf32> to vector<32x8xf32>
    %cst_32 = arith.constant dense<0.000000e+00> : vector<16x8xf32>
    %50 = tpu.matmul %39, %49, %cst_32 {dimension_numbers = #tpu.dot_dimension_numbers<[1], [0], [0], [1], [0, 0, 1, 1], [], []>} : vector<16x32xf32>, vector<32x8xf32>, vector<16x8xf32> -> vector<16x8xf32>
    %c4_33 = arith.constant 4 : index
    %c0_34 = arith.constant 0 : index
    %c0_35 = arith.constant 0 : index
    %51 = vector.load %arg3[%c4_33, %c0_34, %c0_35] : memref<24x1x8xf32, #tpu.memory_space<vmem>>, vector<1x1x8xf32>
    %52 = vector.shape_cast %51 : vector<1x1x8xf32> to vector<1x8xf32>
    %53 = vector.broadcast %52 : vector<1x8xf32> to vector<16x8xf32>
    %54 = arith.addf %50, %53 : vector<16x8xf32>
    %55 = vector.shape_cast %54 : vector<16x8xf32> to vector<2x8x8xf32>
    %c8 = arith.constant 8 : index
    %c0_36 = arith.constant 0 : index
    %c0_37 = arith.constant 0 : index
    %56 = vector.load %arg2[%c8, %c0_36, %c0_37] : memref<24x32x8xf32, #tpu.memory_space<vmem>>, vector<1x32x8xf32>
    %57 = vector.shape_cast %56 : vector<1x32x8xf32> to vector<32x8xf32>
    %cst_38 = arith.constant dense<0.000000e+00> : vector<16x8xf32>
    %58 = tpu.matmul %39, %57, %cst_38 {dimension_numbers = #tpu.dot_dimension_numbers<[1], [0], [0], [1], [0, 0, 1, 1], [], []>} : vector<16x32xf32>, vector<32x8xf32>, vector<16x8xf32> -> vector<16x8xf32>
    %c8_39 = arith.constant 8 : index
    %c0_40 = arith.constant 0 : index
    %c0_41 = arith.constant 0 : index
    %59 = vector.load %arg3[%c8_39, %c0_40, %c0_41] : memref<24x1x8xf32, #tpu.memory_space<vmem>>, vector<1x1x8xf32>
    %60 = vector.shape_cast %59 : vector<1x1x8xf32> to vector<1x8xf32>
    %61 = vector.broadcast %60 : vector<1x8xf32> to vector<16x8xf32>
    %62 = arith.addf %58, %61 : vector<16x8xf32>
    %63 = vector.shape_cast %62 : vector<16x8xf32> to vector<2x8x8xf32>
    "tpu.trace_start"() <{level = 10 : i32, message = "bqd,bkd->bqk"}> : () -> ()
    %cst_42 = arith.constant dense<0.000000e+00> : vector<2x8x8xf32>
    %64 = tpu.matmul %47, %55, %cst_42 {dimension_numbers = #tpu.dot_dimension_numbers<[2], [2], [1], [1], [0, 0, 0, 1, 1, 1], [0], [0]>} : vector<2x8x8xf32>, vector<2x8x8xf32>, vector<2x8x8xf32> -> vector<2x8x8xf32>
    "tpu.trace_stop"() : () -> ()
    %65 = vector.shape_cast %1 : vector<8x8xf32> to vector<1x8x8xf32>
    %66 = vector.broadcast %65 : vector<1x8x8xf32> to vector<2x8x8xf32>
    %67 = arith.mulf %64, %66 : vector<2x8x8xf32>
    %68 = vector.shape_cast %5 : vector<8x8xf32> to vector<1x8x8xf32>
    %69 = vector.broadcast %68 : vector<1x8x8xf32> to vector<2x8x8xf32>
    %70 = arith.addf %67, %69 : vector<2x8x8xf32>
    %c1_43 = arith.constant 1 : index
    %c0_44 = arith.constant 0 : index
    %c0_45 = arith.constant 0 : index
    %71 = vector.load %arg2[%c1_43, %c0_44, %c0_45] : memref<24x32x8xf32, #tpu.memory_space<vmem>>, vector<1x32x8xf32>
    %72 = vector.shape_cast %71 : vector<1x32x8xf32> to vector<32x8xf32>
    %cst_46 = arith.constant dense<0.000000e+00> : vector<16x8xf32>
    %73 = tpu.matmul %39, %72, %cst_46 {dimension_numbers = #tpu.dot_dimension_numbers<[1], [0], [0], [1], [0, 0, 1, 1], [], []>} : vector<16x32xf32>, vector<32x8xf32>, vector<16x8xf32> -> vector<16x8xf32>
    %c1_47 = arith.constant 1 : index
    %c0_48 = arith.constant 0 : index
    %c0_49 = arith.constant 0 : index
    %74 = vector.load %arg3[%c1_47, %c0_48, %c0_49] : memref<24x1x8xf32, #tpu.memory_space<vmem>>, vector<1x1x8xf32>
    %75 = vector.shape_cast %74 : vector<1x1x8xf32> to vector<1x8xf32>
    %76 = vector.broadcast %75 : vector<1x8xf32> to vector<16x8xf32>
    %77 = arith.addf %73, %76 : vector<16x8xf32>
    %78 = vector.shape_cast %77 : vector<16x8xf32> to vector<2x8x8xf32>
    %c5_50 = arith.constant 5 : index
    %c0_51 = arith.constant 0 : index
    %c0_52 = arith.constant 0 : index
    %79 = vector.load %arg2[%c5_50, %c0_51, %c0_52] : memref<24x32x8xf32, #tpu.memory_space<vmem>>, vector<1x32x8xf32>
    %80 = vector.shape_cast %79 : vector<1x32x8xf32> to vector<32x8xf32>
    %cst_53 = arith.constant dense<0.000000e+00> : vector<16x8xf32>
    %81 = tpu.matmul %39, %80, %cst_53 {dimension_numbers = #tpu.dot_dimension_numbers<[1], [0], [0], [1], [0, 0, 1, 1], [], []>} : vector<16x32xf32>, vector<32x8xf32>, vector<16x8xf32> -> vector<16x8xf32>
    %c5_54 = arith.constant 5 : index
    %c0_55 = arith.constant 0 : index
    %c0_56 = arith.constant 0 : index
    %82 = vector.load %arg3[%c5_54, %c0_55, %c0_56] : memref<24x1x8xf32, #tpu.memory_space<vmem>>, vector<1x1x8xf32>
    %83 = vector.shape_cast %82 : vector<1x1x8xf32> to vector<1x8xf32>
    %84 = vector.broadcast %83 : vector<1x8xf32> to vector<16x8xf32>
    %85 = arith.addf %81, %84 : vector<16x8xf32>
    %86 = vector.shape_cast %85 : vector<16x8xf32> to vector<2x8x8xf32>
    %c9 = arith.constant 9 : index
    %c0_57 = arith.constant 0 : index
    %c0_58 = arith.constant 0 : index
    %87 = vector.load %arg2[%c9, %c0_57, %c0_58] : memref<24x32x8xf32, #tpu.memory_space<vmem>>, vector<1x32x8xf32>
    %88 = vector.shape_cast %87 : vector<1x32x8xf32> to vector<32x8xf32>
    %cst_59 = arith.constant dense<0.000000e+00> : vector<16x8xf32>
    %89 = tpu.matmul %39, %88, %cst_59 {dimension_numbers = #tpu.dot_dimension_numbers<[1], [0], [0], [1], [0, 0, 1, 1], [], []>} : vector<16x32xf32>, vector<32x8xf32>, vector<16x8xf32> -> vector<16x8xf32>
    %c9_60 = arith.constant 9 : index
    %c0_61 = arith.constant 0 : index
    %c0_62 = arith.constant 0 : index
    %90 = vector.load %arg3[%c9_60, %c0_61, %c0_62] : memref<24x1x8xf32, #tpu.memory_space<vmem>>, vector<1x1x8xf32>
    %91 = vector.shape_cast %90 : vector<1x1x8xf32> to vector<1x8xf32>
    %92 = vector.broadcast %91 : vector<1x8xf32> to vector<16x8xf32>
    %93 = arith.addf %89, %92 : vector<16x8xf32>
    %94 = vector.shape_cast %93 : vector<16x8xf32> to vector<2x8x8xf32>
    "tpu.trace_start"() <{level = 10 : i32, message = "bqd,bkd->bqk"}> : () -> ()
    %cst_63 = arith.constant dense<0.000000e+00> : vector<2x8x8xf32>
    %95 = tpu.matmul %78, %86, %cst_63 {dimension_numbers = #tpu.dot_dimension_numbers<[2], [2], [1], [1], [0, 0, 0, 1, 1, 1], [0], [0]>} : vector<2x8x8xf32>, vector<2x8x8xf32>, vector<2x8x8xf32> -> vector<2x8x8xf32>
    "tpu.trace_stop"() : () -> ()
    %96 = vector.shape_cast %1 : vector<8x8xf32> to vector<1x8x8xf32>
    %97 = vector.broadcast %96 : vector<1x8x8xf32> to vector<2x8x8xf32>
    %98 = arith.mulf %95, %97 : vector<2x8x8xf32>
    %99 = vector.shape_cast %5 : vector<8x8xf32> to vector<1x8x8xf32>
    %100 = vector.broadcast %99 : vector<1x8x8xf32> to vector<2x8x8xf32>
    %101 = arith.addf %98, %100 : vector<2x8x8xf32>
    %c2_64 = arith.constant 2 : index
    %c0_65 = arith.constant 0 : index
    %c0_66 = arith.constant 0 : index
    %102 = vector.load %arg2[%c2_64, %c0_65, %c0_66] : memref<24x32x8xf32, #tpu.memory_space<vmem>>, vector<1x32x8xf32>
    %103 = vector.shape_cast %102 : vector<1x32x8xf32> to vector<32x8xf32>
    %cst_67 = arith.constant dense<0.000000e+00> : vector<16x8xf32>
    %104 = tpu.matmul %39, %103, %cst_67 {dimension_numbers = #tpu.dot_dimension_numbers<[1], [0], [0], [1], [0, 0, 1, 1], [], []>} : vector<16x32xf32>, vector<32x8xf32>, vector<16x8xf32> -> vector<16x8xf32>
    %c2_68 = arith.constant 2 : index
    %c0_69 = arith.constant 0 : index
    %c0_70 = arith.constant 0 : index
    %105 = vector.load %arg3[%c2_68, %c0_69, %c0_70] : memref<24x1x8xf32, #tpu.memory_space<vmem>>, vector<1x1x8xf32>
    %106 = vector.shape_cast %105 : vector<1x1x8xf32> to vector<1x8xf32>
    %107 = vector.broadcast %106 : vector<1x8xf32> to vector<16x8xf32>
    %108 = arith.addf %104, %107 : vector<16x8xf32>
    %109 = vector.shape_cast %108 : vector<16x8xf32> to vector<2x8x8xf32>
    %c6 = arith.constant 6 : index
    %c0_71 = arith.constant 0 : index
    %c0_72 = arith.constant 0 : index
    %110 = vector.load %arg2[%c6, %c0_71, %c0_72] : memref<24x32x8xf32, #tpu.memory_space<vmem>>, vector<1x32x8xf32>
    %111 = vector.shape_cast %110 : vector<1x32x8xf32> to vector<32x8xf32>
    %cst_73 = arith.constant dense<0.000000e+00> : vector<16x8xf32>
    %112 = tpu.matmul %39, %111, %cst_73 {dimension_numbers = #tpu.dot_dimension_numbers<[1], [0], [0], [1], [0, 0, 1, 1], [], []>} : vector<16x32xf32>, vector<32x8xf32>, vector<16x8xf32> -> vector<16x8xf32>
    %c6_74 = arith.constant 6 : index
    %c0_75 = arith.constant 0 : index
    %c0_76 = arith.constant 0 : index
    %113 = vector.load %arg3[%c6_74, %c0_75, %c0_76] : memref<24x1x8xf32, #tpu.memory_space<vmem>>, vector<1x1x8xf32>
    %114 = vector.shape_cast %113 : vector<1x1x8xf32> to vector<1x8xf32>
    %115 = vector.broadcast %114 : vector<1x8xf32> to vector<16x8xf32>
    %116 = arith.addf %112, %115 : vector<16x8xf32>
    %117 = vector.shape_cast %116 : vector<16x8xf32> to vector<2x8x8xf32>
    %c10 = arith.constant 10 : index
    %c0_77 = arith.constant 0 : index
    %c0_78 = arith.constant 0 : index
    %118 = vector.load %arg2[%c10, %c0_77, %c0_78] : memref<24x32x8xf32, #tpu.memory_space<vmem>>, vector<1x32x8xf32>
    %119 = vector.shape_cast %118 : vector<1x32x8xf32> to vector<32x8xf32>
    %cst_79 = arith.constant dense<0.000000e+00> : vector<16x8xf32>
    %120 = tpu.matmul %39, %119, %cst_79 {dimension_numbers = #tpu.dot_dimension_numbers<[1], [0], [0], [1], [0, 0, 1, 1], [], []>} : vector<16x32xf32>, vector<32x8xf32>, vector<16x8xf32> -> vector<16x8xf32>
    %c10_80 = arith.constant 10 : index
    %c0_81 = arith.constant 0 : index
    %c0_82 = arith.constant 0 : index
    %121 = vector.load %arg3[%c10_80, %c0_81, %c0_82] : memref<24x1x8xf32, #tpu.memory_space<vmem>>, vector<1x1x8xf32>
    %122 = vector.shape_cast %121 : vector<1x1x8xf32> to vector<1x8xf32>
    %123 = vector.broadcast %122 : vector<1x8xf32> to vector<16x8xf32>
    %124 = arith.addf %120, %123 : vector<16x8xf32>
    %125 = vector.shape_cast %124 : vector<16x8xf32> to vector<2x8x8xf32>
    "tpu.trace_start"() <{level = 10 : i32, message = "bqd,bkd->bqk"}> : () -> ()
    %cst_83 = arith.constant dense<0.000000e+00> : vector<2x8x8xf32>
    %126 = tpu.matmul %109, %117, %cst_83 {dimension_numbers = #tpu.dot_dimension_numbers<[2], [2], [1], [1], [0, 0, 0, 1, 1, 1], [0], [0]>} : vector<2x8x8xf32>, vector<2x8x8xf32>, vector<2x8x8xf32> -> vector<2x8x8xf32>
    "tpu.trace_stop"() : () -> ()
    %127 = vector.shape_cast %1 : vector<8x8xf32> to vector<1x8x8xf32>
    %128 = vector.broadcast %127 : vector<1x8x8xf32> to vector<2x8x8xf32>
    %129 = arith.mulf %126, %128 : vector<2x8x8xf32>
    %130 = vector.shape_cast %5 : vector<8x8xf32> to vector<1x8x8xf32>
    %131 = vector.broadcast %130 : vector<1x8x8xf32> to vector<2x8x8xf32>
    %132 = arith.addf %129, %131 : vector<2x8x8xf32>
    %c3_84 = arith.constant 3 : index
    %c0_85 = arith.constant 0 : index
    %c0_86 = arith.constant 0 : index
    %133 = vector.load %arg2[%c3_84, %c0_85, %c0_86] : memref<24x32x8xf32, #tpu.memory_space<vmem>>, vector<1x32x8xf32>
    %134 = vector.shape_cast %133 : vector<1x32x8xf32> to vector<32x8xf32>
    %cst_87 = arith.constant dense<0.000000e+00> : vector<16x8xf32>
    %135 = tpu.matmul %39, %134, %cst_87 {dimension_numbers = #tpu.dot_dimension_numbers<[1], [0], [0], [1], [0, 0, 1, 1], [], []>} : vector<16x32xf32>, vector<32x8xf32>, vector<16x8xf32> -> vector<16x8xf32>
    %c3_88 = arith.constant 3 : index
    %c0_89 = arith.constant 0 : index
    %c0_90 = arith.constant 0 : index
    %136 = vector.load %arg3[%c3_88, %c0_89, %c0_90] : memref<24x1x8xf32, #tpu.memory_space<vmem>>, vector<1x1x8xf32>
    %137 = vector.shape_cast %136 : vector<1x1x8xf32> to vector<1x8xf32>
    %138 = vector.broadcast %137 : vector<1x8xf32> to vector<16x8xf32>
    %139 = arith.addf %135, %138 : vector<16x8xf32>
    %140 = vector.shape_cast %139 : vector<16x8xf32> to vector<2x8x8xf32>
    %c7 = arith.constant 7 : index
    %c0_91 = arith.constant 0 : index
    %c0_92 = arith.constant 0 : index
    %141 = vector.load %arg2[%c7, %c0_91, %c0_92] : memref<24x32x8xf32, #tpu.memory_space<vmem>>, vector<1x32x8xf32>
    %142 = vector.shape_cast %141 : vector<1x32x8xf32> to vector<32x8xf32>
    %cst_93 = arith.constant dense<0.000000e+00> : vector<16x8xf32>
    %143 = tpu.matmul %39, %142, %cst_93 {dimension_numbers = #tpu.dot_dimension_numbers<[1], [0], [0], [1], [0, 0, 1, 1], [], []>} : vector<16x32xf32>, vector<32x8xf32>, vector<16x8xf32> -> vector<16x8xf32>
    %c7_94 = arith.constant 7 : index
    %c0_95 = arith.constant 0 : index
    %c0_96 = arith.constant 0 : index
    %144 = vector.load %arg3[%c7_94, %c0_95, %c0_96] : memref<24x1x8xf32, #tpu.memory_space<vmem>>, vector<1x1x8xf32>
    %145 = vector.shape_cast %144 : vector<1x1x8xf32> to vector<1x8xf32>
    %146 = vector.broadcast %145 : vector<1x8xf32> to vector<16x8xf32>
    %147 = arith.addf %143, %146 : vector<16x8xf32>
    %148 = vector.shape_cast %147 : vector<16x8xf32> to vector<2x8x8xf32>
    %c11 = arith.constant 11 : index
    %c0_97 = arith.constant 0 : index
    %c0_98 = arith.constant 0 : index
    %149 = vector.load %arg2[%c11, %c0_97, %c0_98] : memref<24x32x8xf32, #tpu.memory_space<vmem>>, vector<1x32x8xf32>
    %150 = vector.shape_cast %149 : vector<1x32x8xf32> to vector<32x8xf32>
    %cst_99 = arith.constant dense<0.000000e+00> : vector<16x8xf32>
    %151 = tpu.matmul %39, %150, %cst_99 {dimension_numbers = #tpu.dot_dimension_numbers<[1], [0], [0], [1], [0, 0, 1, 1], [], []>} : vector<16x32xf32>, vector<32x8xf32>, vector<16x8xf32> -> vector<16x8xf32>
    %c11_100 = arith.constant 11 : index
    %c0_101 = arith.constant 0 : index
    %c0_102 = arith.constant 0 : index
    %152 = vector.load %arg3[%c11_100, %c0_101, %c0_102] : memref<24x1x8xf32, #tpu.memory_space<vmem>>, vector<1x1x8xf32>
    %153 = vector.shape_cast %152 : vector<1x1x8xf32> to vector<1x8xf32>
    %154 = vector.broadcast %153 : vector<1x8xf32> to vector<16x8xf32>
    %155 = arith.addf %151, %154 : vector<16x8xf32>
    %156 = vector.shape_cast %155 : vector<16x8xf32> to vector<2x8x8xf32>
    "tpu.trace_start"() <{level = 10 : i32, message = "bqd,bkd->bqk"}> : () -> ()
    %cst_103 = arith.constant dense<0.000000e+00> : vector<2x8x8xf32>
    %157 = tpu.matmul %140, %148, %cst_103 {dimension_numbers = #tpu.dot_dimension_numbers<[2], [2], [1], [1], [0, 0, 0, 1, 1, 1], [0], [0]>} : vector<2x8x8xf32>, vector<2x8x8xf32>, vector<2x8x8xf32> -> vector<2x8x8xf32>
    "tpu.trace_stop"() : () -> ()
    %158 = vector.shape_cast %1 : vector<8x8xf32> to vector<1x8x8xf32>
    %159 = vector.broadcast %158 : vector<1x8x8xf32> to vector<2x8x8xf32>
    %160 = arith.mulf %157, %159 : vector<2x8x8xf32>
    %161 = vector.shape_cast %5 : vector<8x8xf32> to vector<1x8x8xf32>
    %162 = vector.broadcast %161 : vector<1x8x8xf32> to vector<2x8x8xf32>
    %163 = arith.addf %160, %162 : vector<2x8x8xf32>
    %164 = arith.maximumf %70, %101 : vector<2x8x8xf32>
    %165 = arith.maximumf %164, %132 : vector<2x8x8xf32>
    %166 = arith.maximumf %165, %163 : vector<2x8x8xf32>
    %167 = arith.subf %70, %166 : vector<2x8x8xf32>
    %168 = math.exp %167 : vector<2x8x8xf32>
    %169 = arith.subf %101, %166 : vector<2x8x8xf32>
    %170 = math.exp %169 : vector<2x8x8xf32>
    %171 = arith.subf %132, %166 : vector<2x8x8xf32>
    %172 = math.exp %171 : vector<2x8x8xf32>
    %173 = arith.subf %163, %166 : vector<2x8x8xf32>
    %174 = math.exp %173 : vector<2x8x8xf32>
    %175 = arith.addf %168, %170 : vector<2x8x8xf32>
    %176 = arith.addf %175, %172 : vector<2x8x8xf32>
    %177 = arith.addf %176, %174 : vector<2x8x8xf32>
    %cst_104 = arith.constant 1.000000e+00 : f32
    %178 = vector.broadcast %cst_104 : f32 to vector<2x8x8xf32>
    %179 = arith.divf %178, %177 : vector<2x8x8xf32>
    %cst_105 = arith.constant 0.000000e+00 : f32
    %180 = vector.broadcast %cst_105 : f32 to vector<16x32xf32>
    %181 = arith.mulf %168, %179 : vector<2x8x8xf32>
    "tpu.trace_start"() <{level = 10 : i32, message = "bqk,bkd->bqd"}> : () -> ()
    %cst_106 = arith.constant dense<0.000000e+00> : vector<2x8x8xf32>
    %182 = tpu.matmul %181, %63, %cst_106 {dimension_numbers = #tpu.dot_dimension_numbers<[2], [1], [1], [2], [0, 0, 0, 1, 1, 2], [0], [0]>} : vector<2x8x8xf32>, vector<2x8x8xf32>, vector<2x8x8xf32> -> vector<2x8x8xf32>
    "tpu.trace_stop"() : () -> ()
    %183 = vector.shape_cast %182 : vector<2x8x8xf32> to vector<16x8xf32>
    %c0_107 = arith.constant 0 : index
    %c0_108 = arith.constant 0 : index
    %c0_109 = arith.constant 0 : index
    %184 = vector.load %arg4[%c0_107, %c0_108, %c0_109] : memref<8x8x32xf32, #tpu.memory_space<vmem>>, vector<1x8x32xf32>
    %185 = vector.shape_cast %184 : vector<1x8x32xf32> to vector<8x32xf32>
    %cst_110 = arith.constant dense<0.000000e+00> : vector<16x32xf32>
    %186 = tpu.matmul %183, %185, %cst_110 {dimension_numbers = #tpu.dot_dimension_numbers<[1], [0], [0], [1], [0, 0, 1, 1], [], []>} : vector<16x8xf32>, vector<8x32xf32>, vector<16x32xf32> -> vector<16x32xf32>
    %187 = arith.addf %180, %186 : vector<16x32xf32>
    %188 = arith.mulf %170, %179 : vector<2x8x8xf32>
    "tpu.trace_start"() <{level = 10 : i32, message = "bqk,bkd->bqd"}> : () -> ()
    %cst_111 = arith.constant dense<0.000000e+00> : vector<2x8x8xf32>
    %189 = tpu.matmul %188, %94, %cst_111 {dimension_numbers = #tpu.dot_dimension_numbers<[2], [1], [1], [2], [0, 0, 0, 1, 1, 2], [0], [0]>} : vector<2x8x8xf32>, vector<2x8x8xf32>, vector<2x8x8xf32> -> vector<2x8x8xf32>
    "tpu.trace_stop"() : () -> ()
    %190 = vector.shape_cast %189 : vector<2x8x8xf32> to vector<16x8xf32>
    %c1_112 = arith.constant 1 : index
    %c0_113 = arith.constant 0 : index
    %c0_114 = arith.constant 0 : index
    %191 = vector.load %arg4[%c1_112, %c0_113, %c0_114] : memref<8x8x32xf32, #tpu.memory_space<vmem>>, vector<1x8x32xf32>
    %192 = vector.shape_cast %191 : vector<1x8x32xf32> to vector<8x32xf32>
    %cst_115 = arith.constant dense<0.000000e+00> : vector<16x32xf32>
    %193 = tpu.matmul %190, %192, %cst_115 {dimension_numbers = #tpu.dot_dimension_numbers<[1], [0], [0], [1], [0, 0, 1, 1], [], []>} : vector<16x8xf32>, vector<8x32xf32>, vector<16x32xf32> -> vector<16x32xf32>
    %194 = arith.addf %187, %193 : vector<16x32xf32>
    %195 = arith.mulf %172, %179 : vector<2x8x8xf32>
    "tpu.trace_start"() <{level = 10 : i32, message = "bqk,bkd->bqd"}> : () -> ()
    %cst_116 = arith.constant dense<0.000000e+00> : vector<2x8x8xf32>
    %196 = tpu.matmul %195, %125, %cst_116 {dimension_numbers = #tpu.dot_dimension_numbers<[2], [1], [1], [2], [0, 0, 0, 1, 1, 2], [0], [0]>} : vector<2x8x8xf32>, vector<2x8x8xf32>, vector<2x8x8xf32> -> vector<2x8x8xf32>
    "tpu.trace_stop"() : () -> ()
    %197 = vector.shape_cast %196 : vector<2x8x8xf32> to vector<16x8xf32>
    %c2_117 = arith.constant 2 : index
    %c0_118 = arith.constant 0 : index
    %c0_119 = arith.constant 0 : index
    %198 = vector.load %arg4[%c2_117, %c0_118, %c0_119] : memref<8x8x32xf32, #tpu.memory_space<vmem>>, vector<1x8x32xf32>
    %199 = vector.shape_cast %198 : vector<1x8x32xf32> to vector<8x32xf32>
    %cst_120 = arith.constant dense<0.000000e+00> : vector<16x32xf32>
    %200 = tpu.matmul %197, %199, %cst_120 {dimension_numbers = #tpu.dot_dimension_numbers<[1], [0], [0], [1], [0, 0, 1, 1], [], []>} : vector<16x8xf32>, vector<8x32xf32>, vector<16x32xf32> -> vector<16x32xf32>
    %201 = arith.addf %194, %200 : vector<16x32xf32>
    %202 = arith.mulf %174, %179 : vector<2x8x8xf32>
    "tpu.trace_start"() <{level = 10 : i32, message = "bqk,bkd->bqd"}> : () -> ()
    %cst_121 = arith.constant dense<0.000000e+00> : vector<2x8x8xf32>
    %203 = tpu.matmul %202, %156, %cst_121 {dimension_numbers = #tpu.dot_dimension_numbers<[2], [1], [1], [2], [0, 0, 0, 1, 1, 2], [0], [0]>} : vector<2x8x8xf32>, vector<2x8x8xf32>, vector<2x8x8xf32> -> vector<2x8x8xf32>
    "tpu.trace_stop"() : () -> ()
    %204 = vector.shape_cast %203 : vector<2x8x8xf32> to vector<16x8xf32>
    %c3_122 = arith.constant 3 : index
    %c0_123 = arith.constant 0 : index
    %c0_124 = arith.constant 0 : index
    %205 = vector.load %arg4[%c3_122, %c0_123, %c0_124] : memref<8x8x32xf32, #tpu.memory_space<vmem>>, vector<1x8x32xf32>
    %206 = vector.shape_cast %205 : vector<1x8x32xf32> to vector<8x32xf32>
    %cst_125 = arith.constant dense<0.000000e+00> : vector<16x32xf32>
    %207 = tpu.matmul %204, %206, %cst_125 {dimension_numbers = #tpu.dot_dimension_numbers<[1], [0], [0], [1], [0, 0, 1, 1], [], []>} : vector<16x8xf32>, vector<8x32xf32>, vector<16x32xf32> -> vector<16x32xf32>
    %208 = arith.addf %201, %207 : vector<16x32xf32>
    %209 = vector.broadcast %11 : vector<1x32xf32> to vector<16x32xf32>
    %210 = arith.addf %208, %209 : vector<16x32xf32>
    %211 = arith.addf %210, %39 : vector<16x32xf32>
    %cst_126 = arith.constant dense<0.000000e+00> : vector<16xf32>
    %212 = vector.multi_reduction <add>, %211, %cst_126 [1] : vector<16x32xf32> to vector<16xf32>
    %213 = vector.shape_cast %212 : vector<16xf32> to vector<16x1xf32>
    %cst_127 = arith.constant 3.200000e+01 : f32
    %214 = vector.broadcast %cst_127 : f32 to vector<16x1xf32>
    %215 = arith.divf %213, %214 : vector<16x1xf32>
    %216 = vector.broadcast %215 : vector<16x1xf32> to vector<16x32xf32>
    %217 = arith.subf %211, %216 : vector<16x32xf32>
    %218 = arith.mulf %217, %217 : vector<16x32xf32>
    %cst_128 = arith.constant dense<0.000000e+00> : vector<16xf32>
    %219 = vector.multi_reduction <add>, %218, %cst_128 [1] : vector<16x32xf32> to vector<16xf32>
    %220 = vector.shape_cast %219 : vector<16xf32> to vector<16x1xf32>
    %cst_129 = arith.constant 3.200000e+01 : f32
    %221 = vector.broadcast %cst_129 : f32 to vector<16x1xf32>
    %222 = arith.divf %220, %221 : vector<16x1xf32>
    %223 = vector.broadcast %215 : vector<16x1xf32> to vector<16x32xf32>
    %224 = arith.subf %211, %223 : vector<16x32xf32>
    %cst_130 = arith.constant 9.99999974E-6 : f32
    %225 = vector.broadcast %cst_130 : f32 to vector<16x1xf32>
    %226 = arith.addf %222, %225 : vector<16x1xf32>
    %227 = math.rsqrt %226 : vector<16x1xf32>
    %228 = vector.broadcast %227 : vector<16x1xf32> to vector<16x32xf32>
    %229 = arith.mulf %224, %228 : vector<16x32xf32>
    %230 = vector.broadcast %13 : vector<1x32xf32> to vector<16x32xf32>
    %231 = arith.mulf %229, %230 : vector<16x32xf32>
    %232 = vector.broadcast %15 : vector<1x32xf32> to vector<16x32xf32>
    %233 = arith.addf %231, %232 : vector<16x32xf32>
    %c0_131 = arith.constant 0 : index
    %c0_132 = arith.constant 0 : index
    %c0_133 = arith.constant 0 : index
    %234 = vector.load %arg6[%c0_131, %c0_132, %c0_133] : memref<2x32x128xf32, #tpu.memory_space<vmem>>, vector<1x32x128xf32>
    %235 = vector.shape_cast %234 : vector<1x32x128xf32> to vector<32x128xf32>
    %cst_134 = arith.constant dense<0.000000e+00> : vector<16x128xf32>
    %236 = tpu.matmul %233, %235, %cst_134 {dimension_numbers = #tpu.dot_dimension_numbers<[1], [0], [0], [1], [0, 0, 1, 1], [], []>} : vector<16x32xf32>, vector<32x128xf32>, vector<16x128xf32> -> vector<16x128xf32>
    %c0_135 = arith.constant 0 : index
    %c0_136 = arith.constant 0 : index
    %c0_137 = arith.constant 0 : index
    %237 = vector.load %arg7[%c0_135, %c0_136, %c0_137] : memref<2x1x128xf32, #tpu.memory_space<vmem>>, vector<1x1x128xf32>
    %238 = vector.shape_cast %237 : vector<1x1x128xf32> to vector<1x128xf32>
    %239 = vector.broadcast %238 : vector<1x128xf32> to vector<16x128xf32>
    %240 = arith.addf %236, %239 : vector<16x128xf32>
    %cst_138 = arith.constant 0.000000e+00 : f32
    %241 = vector.broadcast %cst_138 : f32 to vector<16x128xf32>
    %242 = arith.cmpf oge, %240, %241 : vector<16x128xf32>
    %cst_139 = arith.constant 0.00999999977 : f32
    %243 = vector.broadcast %cst_139 : f32 to vector<16x128xf32>
    %244 = arith.mulf %243, %240 : vector<16x128xf32>
    %245 = arith.select %242, %240, %244 : vector<16x128xi1>, vector<16x128xf32>
    %c0_140 = arith.constant 0 : index
    %c0_141 = arith.constant 0 : index
    %c0_142 = arith.constant 0 : index
    %246 = vector.load %arg8[%c0_140, %c0_141, %c0_142] : memref<2x128x32xf32, #tpu.memory_space<vmem>>, vector<1x128x32xf32>
    %247 = vector.shape_cast %246 : vector<1x128x32xf32> to vector<128x32xf32>
    %cst_143 = arith.constant dense<0.000000e+00> : vector<16x32xf32>
    %248 = tpu.matmul %245, %247, %cst_143 {dimension_numbers = #tpu.dot_dimension_numbers<[1], [0], [0], [1], [0, 0, 1, 1], [], []>} : vector<16x128xf32>, vector<128x32xf32>, vector<16x32xf32> -> vector<16x32xf32>
    %249 = vector.broadcast %17 : vector<1x32xf32> to vector<16x32xf32>
    %250 = arith.addf %248, %249 : vector<16x32xf32>
    %c6_144 = arith.constant 6 : index
    %c0_145 = arith.constant 0 : index
    %c0_146 = arith.constant 0 : index
    %251 = vector.load %arg5[%c6_144, %c0_145, %c0_146] : memref<12x1x32xf32, #tpu.memory_space<vmem>>, vector<1x1x32xf32>
    %252 = vector.shape_cast %251 : vector<1x1x32xf32> to vector<1x32xf32>
    %c7_147 = arith.constant 7 : index
    %c0_148 = arith.constant 0 : index
    %c0_149 = arith.constant 0 : index
    %253 = vector.load %arg5[%c7_147, %c0_148, %c0_149] : memref<12x1x32xf32, #tpu.memory_space<vmem>>, vector<1x1x32xf32>
    %254 = vector.shape_cast %253 : vector<1x1x32xf32> to vector<1x32xf32>
    %c8_150 = arith.constant 8 : index
    %c0_151 = arith.constant 0 : index
    %c0_152 = arith.constant 0 : index
    %255 = vector.load %arg5[%c8_150, %c0_151, %c0_152] : memref<12x1x32xf32, #tpu.memory_space<vmem>>, vector<1x1x32xf32>
    %256 = vector.shape_cast %255 : vector<1x1x32xf32> to vector<1x32xf32>
    %c9_153 = arith.constant 9 : index
    %c0_154 = arith.constant 0 : index
    %c0_155 = arith.constant 0 : index
    %257 = vector.load %arg5[%c9_153, %c0_154, %c0_155] : memref<12x1x32xf32, #tpu.memory_space<vmem>>, vector<1x1x32xf32>
    %258 = vector.shape_cast %257 : vector<1x1x32xf32> to vector<1x32xf32>
    %c10_156 = arith.constant 10 : index
    %c0_157 = arith.constant 0 : index
    %c0_158 = arith.constant 0 : index
    %259 = vector.load %arg5[%c10_156, %c0_157, %c0_158] : memref<12x1x32xf32, #tpu.memory_space<vmem>>, vector<1x1x32xf32>
    %260 = vector.shape_cast %259 : vector<1x1x32xf32> to vector<1x32xf32>
    %c11_159 = arith.constant 11 : index
    %c0_160 = arith.constant 0 : index
    %c0_161 = arith.constant 0 : index
    %261 = vector.load %arg5[%c11_159, %c0_160, %c0_161] : memref<12x1x32xf32, #tpu.memory_space<vmem>>, vector<1x1x32xf32>
    %262 = vector.shape_cast %261 : vector<1x1x32xf32> to vector<1x32xf32>
    %cst_162 = arith.constant dense<0.000000e+00> : vector<16xf32>
    %263 = vector.multi_reduction <add>, %250, %cst_162 [1] : vector<16x32xf32> to vector<16xf32>
    %264 = vector.shape_cast %263 : vector<16xf32> to vector<16x1xf32>
    %cst_163 = arith.constant 3.200000e+01 : f32
    %265 = vector.broadcast %cst_163 : f32 to vector<16x1xf32>
    %266 = arith.divf %264, %265 : vector<16x1xf32>
    %267 = vector.broadcast %266 : vector<16x1xf32> to vector<16x32xf32>
    %268 = arith.subf %250, %267 : vector<16x32xf32>
    %269 = arith.mulf %268, %268 : vector<16x32xf32>
    %cst_164 = arith.constant dense<0.000000e+00> : vector<16xf32>
    %270 = vector.multi_reduction <add>, %269, %cst_164 [1] : vector<16x32xf32> to vector<16xf32>
    %271 = vector.shape_cast %270 : vector<16xf32> to vector<16x1xf32>
    %cst_165 = arith.constant 3.200000e+01 : f32
    %272 = vector.broadcast %cst_165 : f32 to vector<16x1xf32>
    %273 = arith.divf %271, %272 : vector<16x1xf32>
    %274 = vector.broadcast %266 : vector<16x1xf32> to vector<16x32xf32>
    %275 = arith.subf %250, %274 : vector<16x32xf32>
    %cst_166 = arith.constant 9.99999974E-6 : f32
    %276 = vector.broadcast %cst_166 : f32 to vector<16x1xf32>
    %277 = arith.addf %273, %276 : vector<16x1xf32>
    %278 = math.rsqrt %277 : vector<16x1xf32>
    %279 = vector.broadcast %278 : vector<16x1xf32> to vector<16x32xf32>
    %280 = arith.mulf %275, %279 : vector<16x32xf32>
    %281 = vector.broadcast %252 : vector<1x32xf32> to vector<16x32xf32>
    %282 = arith.mulf %280, %281 : vector<16x32xf32>
    %283 = vector.broadcast %254 : vector<1x32xf32> to vector<16x32xf32>
    %284 = arith.addf %282, %283 : vector<16x32xf32>
    %c12 = arith.constant 12 : index
    %c0_167 = arith.constant 0 : index
    %c0_168 = arith.constant 0 : index
    %285 = vector.load %arg2[%c12, %c0_167, %c0_168] : memref<24x32x8xf32, #tpu.memory_space<vmem>>, vector<1x32x8xf32>
    %286 = vector.shape_cast %285 : vector<1x32x8xf32> to vector<32x8xf32>
    %cst_169 = arith.constant dense<0.000000e+00> : vector<16x8xf32>
    %287 = tpu.matmul %284, %286, %cst_169 {dimension_numbers = #tpu.dot_dimension_numbers<[1], [0], [0], [1], [0, 0, 1, 1], [], []>} : vector<16x32xf32>, vector<32x8xf32>, vector<16x8xf32> -> vector<16x8xf32>
    %c12_170 = arith.constant 12 : index
    %c0_171 = arith.constant 0 : index
    %c0_172 = arith.constant 0 : index
    %288 = vector.load %arg3[%c12_170, %c0_171, %c0_172] : memref<24x1x8xf32, #tpu.memory_space<vmem>>, vector<1x1x8xf32>
    %289 = vector.shape_cast %288 : vector<1x1x8xf32> to vector<1x8xf32>
    %290 = vector.broadcast %289 : vector<1x8xf32> to vector<16x8xf32>
    %291 = arith.addf %287, %290 : vector<16x8xf32>
    %292 = vector.shape_cast %291 : vector<16x8xf32> to vector<2x8x8xf32>
    %c16 = arith.constant 16 : index
    %c0_173 = arith.constant 0 : index
    %c0_174 = arith.constant 0 : index
    %293 = vector.load %arg2[%c16, %c0_173, %c0_174] : memref<24x32x8xf32, #tpu.memory_space<vmem>>, vector<1x32x8xf32>
    %294 = vector.shape_cast %293 : vector<1x32x8xf32> to vector<32x8xf32>
    %cst_175 = arith.constant dense<0.000000e+00> : vector<16x8xf32>
    %295 = tpu.matmul %284, %294, %cst_175 {dimension_numbers = #tpu.dot_dimension_numbers<[1], [0], [0], [1], [0, 0, 1, 1], [], []>} : vector<16x32xf32>, vector<32x8xf32>, vector<16x8xf32> -> vector<16x8xf32>
    %c16_176 = arith.constant 16 : index
    %c0_177 = arith.constant 0 : index
    %c0_178 = arith.constant 0 : index
    %296 = vector.load %arg3[%c16_176, %c0_177, %c0_178] : memref<24x1x8xf32, #tpu.memory_space<vmem>>, vector<1x1x8xf32>
    %297 = vector.shape_cast %296 : vector<1x1x8xf32> to vector<1x8xf32>
    %298 = vector.broadcast %297 : vector<1x8xf32> to vector<16x8xf32>
    %299 = arith.addf %295, %298 : vector<16x8xf32>
    %300 = vector.shape_cast %299 : vector<16x8xf32> to vector<2x8x8xf32>
    %c20 = arith.constant 20 : index
    %c0_179 = arith.constant 0 : index
    %c0_180 = arith.constant 0 : index
    %301 = vector.load %arg2[%c20, %c0_179, %c0_180] : memref<24x32x8xf32, #tpu.memory_space<vmem>>, vector<1x32x8xf32>
    %302 = vector.shape_cast %301 : vector<1x32x8xf32> to vector<32x8xf32>
    %cst_181 = arith.constant dense<0.000000e+00> : vector<16x8xf32>
    %303 = tpu.matmul %284, %302, %cst_181 {dimension_numbers = #tpu.dot_dimension_numbers<[1], [0], [0], [1], [0, 0, 1, 1], [], []>} : vector<16x32xf32>, vector<32x8xf32>, vector<16x8xf32> -> vector<16x8xf32>
    %c20_182 = arith.constant 20 : index
    %c0_183 = arith.constant 0 : index
    %c0_184 = arith.constant 0 : index
    %304 = vector.load %arg3[%c20_182, %c0_183, %c0_184] : memref<24x1x8xf32, #tpu.memory_space<vmem>>, vector<1x1x8xf32>
    %305 = vector.shape_cast %304 : vector<1x1x8xf32> to vector<1x8xf32>
    %306 = vector.broadcast %305 : vector<1x8xf32> to vector<16x8xf32>
    %307 = arith.addf %303, %306 : vector<16x8xf32>
    %308 = vector.shape_cast %307 : vector<16x8xf32> to vector<2x8x8xf32>
    "tpu.trace_start"() <{level = 10 : i32, message = "bqd,bkd->bqk"}> : () -> ()
    %cst_185 = arith.constant dense<0.000000e+00> : vector<2x8x8xf32>
    %309 = tpu.matmul %292, %300, %cst_185 {dimension_numbers = #tpu.dot_dimension_numbers<[2], [2], [1], [1], [0, 0, 0, 1, 1, 1], [0], [0]>} : vector<2x8x8xf32>, vector<2x8x8xf32>, vector<2x8x8xf32> -> vector<2x8x8xf32>
    "tpu.trace_stop"() : () -> ()
    %310 = vector.shape_cast %1 : vector<8x8xf32> to vector<1x8x8xf32>
    %311 = vector.broadcast %310 : vector<1x8x8xf32> to vector<2x8x8xf32>
    %312 = arith.mulf %309, %311 : vector<2x8x8xf32>
    %313 = vector.shape_cast %5 : vector<8x8xf32> to vector<1x8x8xf32>
    %314 = vector.broadcast %313 : vector<1x8x8xf32> to vector<2x8x8xf32>
    %315 = arith.addf %312, %314 : vector<2x8x8xf32>
    %c13 = arith.constant 13 : index
    %c0_186 = arith.constant 0 : index
    %c0_187 = arith.constant 0 : index
    %316 = vector.load %arg2[%c13, %c0_186, %c0_187] : memref<24x32x8xf32, #tpu.memory_space<vmem>>, vector<1x32x8xf32>
    %317 = vector.shape_cast %316 : vector<1x32x8xf32> to vector<32x8xf32>
    %cst_188 = arith.constant dense<0.000000e+00> : vector<16x8xf32>
    %318 = tpu.matmul %284, %317, %cst_188 {dimension_numbers = #tpu.dot_dimension_numbers<[1], [0], [0], [1], [0, 0, 1, 1], [], []>} : vector<16x32xf32>, vector<32x8xf32>, vector<16x8xf32> -> vector<16x8xf32>
    %c13_189 = arith.constant 13 : index
    %c0_190 = arith.constant 0 : index
    %c0_191 = arith.constant 0 : index
    %319 = vector.load %arg3[%c13_189, %c0_190, %c0_191] : memref<24x1x8xf32, #tpu.memory_space<vmem>>, vector<1x1x8xf32>
    %320 = vector.shape_cast %319 : vector<1x1x8xf32> to vector<1x8xf32>
    %321 = vector.broadcast %320 : vector<1x8xf32> to vector<16x8xf32>
    %322 = arith.addf %318, %321 : vector<16x8xf32>
    %323 = vector.shape_cast %322 : vector<16x8xf32> to vector<2x8x8xf32>
    %c17 = arith.constant 17 : index
    %c0_192 = arith.constant 0 : index
    %c0_193 = arith.constant 0 : index
    %324 = vector.load %arg2[%c17, %c0_192, %c0_193] : memref<24x32x8xf32, #tpu.memory_space<vmem>>, vector<1x32x8xf32>
    %325 = vector.shape_cast %324 : vector<1x32x8xf32> to vector<32x8xf32>
    %cst_194 = arith.constant dense<0.000000e+00> : vector<16x8xf32>
    %326 = tpu.matmul %284, %325, %cst_194 {dimension_numbers = #tpu.dot_dimension_numbers<[1], [0], [0], [1], [0, 0, 1, 1], [], []>} : vector<16x32xf32>, vector<32x8xf32>, vector<16x8xf32> -> vector<16x8xf32>
    %c17_195 = arith.constant 17 : index
    %c0_196 = arith.constant 0 : index
    %c0_197 = arith.constant 0 : index
    %327 = vector.load %arg3[%c17_195, %c0_196, %c0_197] : memref<24x1x8xf32, #tpu.memory_space<vmem>>, vector<1x1x8xf32>
    %328 = vector.shape_cast %327 : vector<1x1x8xf32> to vector<1x8xf32>
    %329 = vector.broadcast %328 : vector<1x8xf32> to vector<16x8xf32>
    %330 = arith.addf %326, %329 : vector<16x8xf32>
    %331 = vector.shape_cast %330 : vector<16x8xf32> to vector<2x8x8xf32>
    %c21 = arith.constant 21 : index
    %c0_198 = arith.constant 0 : index
    %c0_199 = arith.constant 0 : index
    %332 = vector.load %arg2[%c21, %c0_198, %c0_199] : memref<24x32x8xf32, #tpu.memory_space<vmem>>, vector<1x32x8xf32>
    %333 = vector.shape_cast %332 : vector<1x32x8xf32> to vector<32x8xf32>
    %cst_200 = arith.constant dense<0.000000e+00> : vector<16x8xf32>
    %334 = tpu.matmul %284, %333, %cst_200 {dimension_numbers = #tpu.dot_dimension_numbers<[1], [0], [0], [1], [0, 0, 1, 1], [], []>} : vector<16x32xf32>, vector<32x8xf32>, vector<16x8xf32> -> vector<16x8xf32>
    %c21_201 = arith.constant 21 : index
    %c0_202 = arith.constant 0 : index
    %c0_203 = arith.constant 0 : index
    %335 = vector.load %arg3[%c21_201, %c0_202, %c0_203] : memref<24x1x8xf32, #tpu.memory_space<vmem>>, vector<1x1x8xf32>
    %336 = vector.shape_cast %335 : vector<1x1x8xf32> to vector<1x8xf32>
    %337 = vector.broadcast %336 : vector<1x8xf32> to vector<16x8xf32>
    %338 = arith.addf %334, %337 : vector<16x8xf32>
    %339 = vector.shape_cast %338 : vector<16x8xf32> to vector<2x8x8xf32>
    "tpu.trace_start"() <{level = 10 : i32, message = "bqd,bkd->bqk"}> : () -> ()
    %cst_204 = arith.constant dense<0.000000e+00> : vector<2x8x8xf32>
    %340 = tpu.matmul %323, %331, %cst_204 {dimension_numbers = #tpu.dot_dimension_numbers<[2], [2], [1], [1], [0, 0, 0, 1, 1, 1], [0], [0]>} : vector<2x8x8xf32>, vector<2x8x8xf32>, vector<2x8x8xf32> -> vector<2x8x8xf32>
    "tpu.trace_stop"() : () -> ()
    %341 = vector.shape_cast %1 : vector<8x8xf32> to vector<1x8x8xf32>
    %342 = vector.broadcast %341 : vector<1x8x8xf32> to vector<2x8x8xf32>
    %343 = arith.mulf %340, %342 : vector<2x8x8xf32>
    %344 = vector.shape_cast %5 : vector<8x8xf32> to vector<1x8x8xf32>
    %345 = vector.broadcast %344 : vector<1x8x8xf32> to vector<2x8x8xf32>
    %346 = arith.addf %343, %345 : vector<2x8x8xf32>
    %c14 = arith.constant 14 : index
    %c0_205 = arith.constant 0 : index
    %c0_206 = arith.constant 0 : index
    %347 = vector.load %arg2[%c14, %c0_205, %c0_206] : memref<24x32x8xf32, #tpu.memory_space<vmem>>, vector<1x32x8xf32>
    %348 = vector.shape_cast %347 : vector<1x32x8xf32> to vector<32x8xf32>
    %cst_207 = arith.constant dense<0.000000e+00> : vector<16x8xf32>
    %349 = tpu.matmul %284, %348, %cst_207 {dimension_numbers = #tpu.dot_dimension_numbers<[1], [0], [0], [1], [0, 0, 1, 1], [], []>} : vector<16x32xf32>, vector<32x8xf32>, vector<16x8xf32> -> vector<16x8xf32>
    %c14_208 = arith.constant 14 : index
    %c0_209 = arith.constant 0 : index
    %c0_210 = arith.constant 0 : index
    %350 = vector.load %arg3[%c14_208, %c0_209, %c0_210] : memref<24x1x8xf32, #tpu.memory_space<vmem>>, vector<1x1x8xf32>
    %351 = vector.shape_cast %350 : vector<1x1x8xf32> to vector<1x8xf32>
    %352 = vector.broadcast %351 : vector<1x8xf32> to vector<16x8xf32>
    %353 = arith.addf %349, %352 : vector<16x8xf32>
    %354 = vector.shape_cast %353 : vector<16x8xf32> to vector<2x8x8xf32>
    %c18 = arith.constant 18 : index
    %c0_211 = arith.constant 0 : index
    %c0_212 = arith.constant 0 : index
    %355 = vector.load %arg2[%c18, %c0_211, %c0_212] : memref<24x32x8xf32, #tpu.memory_space<vmem>>, vector<1x32x8xf32>
    %356 = vector.shape_cast %355 : vector<1x32x8xf32> to vector<32x8xf32>
    %cst_213 = arith.constant dense<0.000000e+00> : vector<16x8xf32>
    %357 = tpu.matmul %284, %356, %cst_213 {dimension_numbers = #tpu.dot_dimension_numbers<[1], [0], [0], [1], [0, 0, 1, 1], [], []>} : vector<16x32xf32>, vector<32x8xf32>, vector<16x8xf32> -> vector<16x8xf32>
    %c18_214 = arith.constant 18 : index
    %c0_215 = arith.constant 0 : index
    %c0_216 = arith.constant 0 : index
    %358 = vector.load %arg3[%c18_214, %c0_215, %c0_216] : memref<24x1x8xf32, #tpu.memory_space<vmem>>, vector<1x1x8xf32>
    %359 = vector.shape_cast %358 : vector<1x1x8xf32> to vector<1x8xf32>
    %360 = vector.broadcast %359 : vector<1x8xf32> to vector<16x8xf32>
    %361 = arith.addf %357, %360 : vector<16x8xf32>
    %362 = vector.shape_cast %361 : vector<16x8xf32> to vector<2x8x8xf32>
    %c22 = arith.constant 22 : index
    %c0_217 = arith.constant 0 : index
    %c0_218 = arith.constant 0 : index
    %363 = vector.load %arg2[%c22, %c0_217, %c0_218] : memref<24x32x8xf32, #tpu.memory_space<vmem>>, vector<1x32x8xf32>
    %364 = vector.shape_cast %363 : vector<1x32x8xf32> to vector<32x8xf32>
    %cst_219 = arith.constant dense<0.000000e+00> : vector<16x8xf32>
    %365 = tpu.matmul %284, %364, %cst_219 {dimension_numbers = #tpu.dot_dimension_numbers<[1], [0], [0], [1], [0, 0, 1, 1], [], []>} : vector<16x32xf32>, vector<32x8xf32>, vector<16x8xf32> -> vector<16x8xf32>
    %c22_220 = arith.constant 22 : index
    %c0_221 = arith.constant 0 : index
    %c0_222 = arith.constant 0 : index
    %366 = vector.load %arg3[%c22_220, %c0_221, %c0_222] : memref<24x1x8xf32, #tpu.memory_space<vmem>>, vector<1x1x8xf32>
    %367 = vector.shape_cast %366 : vector<1x1x8xf32> to vector<1x8xf32>
    %368 = vector.broadcast %367 : vector<1x8xf32> to vector<16x8xf32>
    %369 = arith.addf %365, %368 : vector<16x8xf32>
    %370 = vector.shape_cast %369 : vector<16x8xf32> to vector<2x8x8xf32>
    "tpu.trace_start"() <{level = 10 : i32, message = "bqd,bkd->bqk"}> : () -> ()
    %cst_223 = arith.constant dense<0.000000e+00> : vector<2x8x8xf32>
    %371 = tpu.matmul %354, %362, %cst_223 {dimension_numbers = #tpu.dot_dimension_numbers<[2], [2], [1], [1], [0, 0, 0, 1, 1, 1], [0], [0]>} : vector<2x8x8xf32>, vector<2x8x8xf32>, vector<2x8x8xf32> -> vector<2x8x8xf32>
    "tpu.trace_stop"() : () -> ()
    %372 = vector.shape_cast %1 : vector<8x8xf32> to vector<1x8x8xf32>
    %373 = vector.broadcast %372 : vector<1x8x8xf32> to vector<2x8x8xf32>
    %374 = arith.mulf %371, %373 : vector<2x8x8xf32>
    %375 = vector.shape_cast %5 : vector<8x8xf32> to vector<1x8x8xf32>
    %376 = vector.broadcast %375 : vector<1x8x8xf32> to vector<2x8x8xf32>
    %377 = arith.addf %374, %376 : vector<2x8x8xf32>
    %c15 = arith.constant 15 : index
    %c0_224 = arith.constant 0 : index
    %c0_225 = arith.constant 0 : index
    %378 = vector.load %arg2[%c15, %c0_224, %c0_225] : memref<24x32x8xf32, #tpu.memory_space<vmem>>, vector<1x32x8xf32>
    %379 = vector.shape_cast %378 : vector<1x32x8xf32> to vector<32x8xf32>
    %cst_226 = arith.constant dense<0.000000e+00> : vector<16x8xf32>
    %380 = tpu.matmul %284, %379, %cst_226 {dimension_numbers = #tpu.dot_dimension_numbers<[1], [0], [0], [1], [0, 0, 1, 1], [], []>} : vector<16x32xf32>, vector<32x8xf32>, vector<16x8xf32> -> vector<16x8xf32>
    %c15_227 = arith.constant 15 : index
    %c0_228 = arith.constant 0 : index
    %c0_229 = arith.constant 0 : index
    %381 = vector.load %arg3[%c15_227, %c0_228, %c0_229] : memref<24x1x8xf32, #tpu.memory_space<vmem>>, vector<1x1x8xf32>
    %382 = vector.shape_cast %381 : vector<1x1x8xf32> to vector<1x8xf32>
    %383 = vector.broadcast %382 : vector<1x8xf32> to vector<16x8xf32>
    %384 = arith.addf %380, %383 : vector<16x8xf32>
    %385 = vector.shape_cast %384 : vector<16x8xf32> to vector<2x8x8xf32>
    %c19 = arith.constant 19 : index
    %c0_230 = arith.constant 0 : index
    %c0_231 = arith.constant 0 : index
    %386 = vector.load %arg2[%c19, %c0_230, %c0_231] : memref<24x32x8xf32, #tpu.memory_space<vmem>>, vector<1x32x8xf32>
    %387 = vector.shape_cast %386 : vector<1x32x8xf32> to vector<32x8xf32>
    %cst_232 = arith.constant dense<0.000000e+00> : vector<16x8xf32>
    %388 = tpu.matmul %284, %387, %cst_232 {dimension_numbers = #tpu.dot_dimension_numbers<[1], [0], [0], [1], [0, 0, 1, 1], [], []>} : vector<16x32xf32>, vector<32x8xf32>, vector<16x8xf32> -> vector<16x8xf32>
    %c19_233 = arith.constant 19 : index
    %c0_234 = arith.constant 0 : index
    %c0_235 = arith.constant 0 : index
    %389 = vector.load %arg3[%c19_233, %c0_234, %c0_235] : memref<24x1x8xf32, #tpu.memory_space<vmem>>, vector<1x1x8xf32>
    %390 = vector.shape_cast %389 : vector<1x1x8xf32> to vector<1x8xf32>
    %391 = vector.broadcast %390 : vector<1x8xf32> to vector<16x8xf32>
    %392 = arith.addf %388, %391 : vector<16x8xf32>
    %393 = vector.shape_cast %392 : vector<16x8xf32> to vector<2x8x8xf32>
    %c23 = arith.constant 23 : index
    %c0_236 = arith.constant 0 : index
    %c0_237 = arith.constant 0 : index
    %394 = vector.load %arg2[%c23, %c0_236, %c0_237] : memref<24x32x8xf32, #tpu.memory_space<vmem>>, vector<1x32x8xf32>
    %395 = vector.shape_cast %394 : vector<1x32x8xf32> to vector<32x8xf32>
    %cst_238 = arith.constant dense<0.000000e+00> : vector<16x8xf32>
    %396 = tpu.matmul %284, %395, %cst_238 {dimension_numbers = #tpu.dot_dimension_numbers<[1], [0], [0], [1], [0, 0, 1, 1], [], []>} : vector<16x32xf32>, vector<32x8xf32>, vector<16x8xf32> -> vector<16x8xf32>
    %c23_239 = arith.constant 23 : index
    %c0_240 = arith.constant 0 : index
    %c0_241 = arith.constant 0 : index
    %397 = vector.load %arg3[%c23_239, %c0_240, %c0_241] : memref<24x1x8xf32, #tpu.memory_space<vmem>>, vector<1x1x8xf32>
    %398 = vector.shape_cast %397 : vector<1x1x8xf32> to vector<1x8xf32>
    %399 = vector.broadcast %398 : vector<1x8xf32> to vector<16x8xf32>
    %400 = arith.addf %396, %399 : vector<16x8xf32>
    %401 = vector.shape_cast %400 : vector<16x8xf32> to vector<2x8x8xf32>
    "tpu.trace_start"() <{level = 10 : i32, message = "bqd,bkd->bqk"}> : () -> ()
    %cst_242 = arith.constant dense<0.000000e+00> : vector<2x8x8xf32>
    %402 = tpu.matmul %385, %393, %cst_242 {dimension_numbers = #tpu.dot_dimension_numbers<[2], [2], [1], [1], [0, 0, 0, 1, 1, 1], [0], [0]>} : vector<2x8x8xf32>, vector<2x8x8xf32>, vector<2x8x8xf32> -> vector<2x8x8xf32>
    "tpu.trace_stop"() : () -> ()
    %403 = vector.shape_cast %1 : vector<8x8xf32> to vector<1x8x8xf32>
    %404 = vector.broadcast %403 : vector<1x8x8xf32> to vector<2x8x8xf32>
    %405 = arith.mulf %402, %404 : vector<2x8x8xf32>
    %406 = vector.shape_cast %5 : vector<8x8xf32> to vector<1x8x8xf32>
    %407 = vector.broadcast %406 : vector<1x8x8xf32> to vector<2x8x8xf32>
    %408 = arith.addf %405, %407 : vector<2x8x8xf32>
    %409 = arith.maximumf %315, %346 : vector<2x8x8xf32>
    %410 = arith.maximumf %409, %377 : vector<2x8x8xf32>
    %411 = arith.maximumf %410, %408 : vector<2x8x8xf32>
    %412 = arith.subf %315, %411 : vector<2x8x8xf32>
    %413 = math.exp %412 : vector<2x8x8xf32>
    %414 = arith.subf %346, %411 : vector<2x8x8xf32>
    %415 = math.exp %414 : vector<2x8x8xf32>
    %416 = arith.subf %377, %411 : vector<2x8x8xf32>
    %417 = math.exp %416 : vector<2x8x8xf32>
    %418 = arith.subf %408, %411 : vector<2x8x8xf32>
    %419 = math.exp %418 : vector<2x8x8xf32>
    %420 = arith.addf %413, %415 : vector<2x8x8xf32>
    %421 = arith.addf %420, %417 : vector<2x8x8xf32>
    %422 = arith.addf %421, %419 : vector<2x8x8xf32>
    %cst_243 = arith.constant 1.000000e+00 : f32
    %423 = vector.broadcast %cst_243 : f32 to vector<2x8x8xf32>
    %424 = arith.divf %423, %422 : vector<2x8x8xf32>
    %cst_244 = arith.constant 0.000000e+00 : f32
    %425 = vector.broadcast %cst_244 : f32 to vector<16x32xf32>
    %426 = arith.mulf %413, %424 : vector<2x8x8xf32>
    "tpu.trace_start"() <{level = 10 : i32, message = "bqk,bkd->bqd"}> : () -> ()
    %cst_245 = arith.constant dense<0.000000e+00> : vector<2x8x8xf32>
    %427 = tpu.matmul %426, %308, %cst_245 {dimension_numbers = #tpu.dot_dimension_numbers<[2], [1], [1], [2], [0, 0, 0, 1, 1, 2], [0], [0]>} : vector<2x8x8xf32>, vector<2x8x8xf32>, vector<2x8x8xf32> -> vector<2x8x8xf32>
    "tpu.trace_stop"() : () -> ()
    %428 = vector.shape_cast %427 : vector<2x8x8xf32> to vector<16x8xf32>
    %c4_246 = arith.constant 4 : index
    %c0_247 = arith.constant 0 : index
    %c0_248 = arith.constant 0 : index
    %429 = vector.load %arg4[%c4_246, %c0_247, %c0_248] : memref<8x8x32xf32, #tpu.memory_space<vmem>>, vector<1x8x32xf32>
    %430 = vector.shape_cast %429 : vector<1x8x32xf32> to vector<8x32xf32>
    %cst_249 = arith.constant dense<0.000000e+00> : vector<16x32xf32>
    %431 = tpu.matmul %428, %430, %cst_249 {dimension_numbers = #tpu.dot_dimension_numbers<[1], [0], [0], [1], [0, 0, 1, 1], [], []>} : vector<16x8xf32>, vector<8x32xf32>, vector<16x32xf32> -> vector<16x32xf32>
    %432 = arith.addf %425, %431 : vector<16x32xf32>
    %433 = arith.mulf %415, %424 : vector<2x8x8xf32>
    "tpu.trace_start"() <{level = 10 : i32, message = "bqk,bkd->bqd"}> : () -> ()
    %cst_250 = arith.constant dense<0.000000e+00> : vector<2x8x8xf32>
    %434 = tpu.matmul %433, %339, %cst_250 {dimension_numbers = #tpu.dot_dimension_numbers<[2], [1], [1], [2], [0, 0, 0, 1, 1, 2], [0], [0]>} : vector<2x8x8xf32>, vector<2x8x8xf32>, vector<2x8x8xf32> -> vector<2x8x8xf32>
    "tpu.trace_stop"() : () -> ()
    %435 = vector.shape_cast %434 : vector<2x8x8xf32> to vector<16x8xf32>
    %c5_251 = arith.constant 5 : index
    %c0_252 = arith.constant 0 : index
    %c0_253 = arith.constant 0 : index
    %436 = vector.load %arg4[%c5_251, %c0_252, %c0_253] : memref<8x8x32xf32, #tpu.memory_space<vmem>>, vector<1x8x32xf32>
    %437 = vector.shape_cast %436 : vector<1x8x32xf32> to vector<8x32xf32>
    %cst_254 = arith.constant dense<0.000000e+00> : vector<16x32xf32>
    %438 = tpu.matmul %435, %437, %cst_254 {dimension_numbers = #tpu.dot_dimension_numbers<[1], [0], [0], [1], [0, 0, 1, 1], [], []>} : vector<16x8xf32>, vector<8x32xf32>, vector<16x32xf32> -> vector<16x32xf32>
    %439 = arith.addf %432, %438 : vector<16x32xf32>
    %440 = arith.mulf %417, %424 : vector<2x8x8xf32>
    "tpu.trace_start"() <{level = 10 : i32, message = "bqk,bkd->bqd"}> : () -> ()
    %cst_255 = arith.constant dense<0.000000e+00> : vector<2x8x8xf32>
    %441 = tpu.matmul %440, %370, %cst_255 {dimension_numbers = #tpu.dot_dimension_numbers<[2], [1], [1], [2], [0, 0, 0, 1, 1, 2], [0], [0]>} : vector<2x8x8xf32>, vector<2x8x8xf32>, vector<2x8x8xf32> -> vector<2x8x8xf32>
    "tpu.trace_stop"() : () -> ()
    %442 = vector.shape_cast %441 : vector<2x8x8xf32> to vector<16x8xf32>
    %c6_256 = arith.constant 6 : index
    %c0_257 = arith.constant 0 : index
    %c0_258 = arith.constant 0 : index
    %443 = vector.load %arg4[%c6_256, %c0_257, %c0_258] : memref<8x8x32xf32, #tpu.memory_space<vmem>>, vector<1x8x32xf32>
    %444 = vector.shape_cast %443 : vector<1x8x32xf32> to vector<8x32xf32>
    %cst_259 = arith.constant dense<0.000000e+00> : vector<16x32xf32>
    %445 = tpu.matmul %442, %444, %cst_259 {dimension_numbers = #tpu.dot_dimension_numbers<[1], [0], [0], [1], [0, 0, 1, 1], [], []>} : vector<16x8xf32>, vector<8x32xf32>, vector<16x32xf32> -> vector<16x32xf32>
    %446 = arith.addf %439, %445 : vector<16x32xf32>
    %447 = arith.mulf %419, %424 : vector<2x8x8xf32>
    "tpu.trace_start"() <{level = 10 : i32, message = "bqk,bkd->bqd"}> : () -> ()
    %cst_260 = arith.constant dense<0.000000e+00> : vector<2x8x8xf32>
    %448 = tpu.matmul %447, %401, %cst_260 {dimension_numbers = #tpu.dot_dimension_numbers<[2], [1], [1], [2], [0, 0, 0, 1, 1, 2], [0], [0]>} : vector<2x8x8xf32>, vector<2x8x8xf32>, vector<2x8x8xf32> -> vector<2x8x8xf32>
    "tpu.trace_stop"() : () -> ()
    %449 = vector.shape_cast %448 : vector<2x8x8xf32> to vector<16x8xf32>
    %c7_261 = arith.constant 7 : index
    %c0_262 = arith.constant 0 : index
    %c0_263 = arith.constant 0 : index
    %450 = vector.load %arg4[%c7_261, %c0_262, %c0_263] : memref<8x8x32xf32, #tpu.memory_space<vmem>>, vector<1x8x32xf32>
    %451 = vector.shape_cast %450 : vector<1x8x32xf32> to vector<8x32xf32>
    %cst_264 = arith.constant dense<0.000000e+00> : vector<16x32xf32>
    %452 = tpu.matmul %449, %451, %cst_264 {dimension_numbers = #tpu.dot_dimension_numbers<[1], [0], [0], [1], [0, 0, 1, 1], [], []>} : vector<16x8xf32>, vector<8x32xf32>, vector<16x32xf32> -> vector<16x32xf32>
    %453 = arith.addf %446, %452 : vector<16x32xf32>
    %454 = vector.broadcast %256 : vector<1x32xf32> to vector<16x32xf32>
    %455 = arith.addf %453, %454 : vector<16x32xf32>
    %456 = arith.addf %455, %284 : vector<16x32xf32>
    %cst_265 = arith.constant dense<0.000000e+00> : vector<16xf32>
    %457 = vector.multi_reduction <add>, %456, %cst_265 [1] : vector<16x32xf32> to vector<16xf32>
    %458 = vector.shape_cast %457 : vector<16xf32> to vector<16x1xf32>
    %cst_266 = arith.constant 3.200000e+01 : f32
    %459 = vector.broadcast %cst_266 : f32 to vector<16x1xf32>
    %460 = arith.divf %458, %459 : vector<16x1xf32>
    %461 = vector.broadcast %460 : vector<16x1xf32> to vector<16x32xf32>
    %462 = arith.subf %456, %461 : vector<16x32xf32>
    %463 = arith.mulf %462, %462 : vector<16x32xf32>
    %cst_267 = arith.constant dense<0.000000e+00> : vector<16xf32>
    %464 = vector.multi_reduction <add>, %463, %cst_267 [1] : vector<16x32xf32> to vector<16xf32>
    %465 = vector.shape_cast %464 : vector<16xf32> to vector<16x1xf32>
    %cst_268 = arith.constant 3.200000e+01 : f32
    %466 = vector.broadcast %cst_268 : f32 to vector<16x1xf32>
    %467 = arith.divf %465, %466 : vector<16x1xf32>
    %468 = vector.broadcast %460 : vector<16x1xf32> to vector<16x32xf32>
    %469 = arith.subf %456, %468 : vector<16x32xf32>
    %cst_269 = arith.constant 9.99999974E-6 : f32
    %470 = vector.broadcast %cst_269 : f32 to vector<16x1xf32>
    %471 = arith.addf %467, %470 : vector<16x1xf32>
    %472 = math.rsqrt %471 : vector<16x1xf32>
    %473 = vector.broadcast %472 : vector<16x1xf32> to vector<16x32xf32>
    %474 = arith.mulf %469, %473 : vector<16x32xf32>
    %475 = vector.broadcast %258 : vector<1x32xf32> to vector<16x32xf32>
    %476 = arith.mulf %474, %475 : vector<16x32xf32>
    %477 = vector.broadcast %260 : vector<1x32xf32> to vector<16x32xf32>
    %478 = arith.addf %476, %477 : vector<16x32xf32>
    %c1_270 = arith.constant 1 : index
    %c0_271 = arith.constant 0 : index
    %c0_272 = arith.constant 0 : index
    %479 = vector.load %arg6[%c1_270, %c0_271, %c0_272] : memref<2x32x128xf32, #tpu.memory_space<vmem>>, vector<1x32x128xf32>
    %480 = vector.shape_cast %479 : vector<1x32x128xf32> to vector<32x128xf32>
    %cst_273 = arith.constant dense<0.000000e+00> : vector<16x128xf32>
    %481 = tpu.matmul %478, %480, %cst_273 {dimension_numbers = #tpu.dot_dimension_numbers<[1], [0], [0], [1], [0, 0, 1, 1], [], []>} : vector<16x32xf32>, vector<32x128xf32>, vector<16x128xf32> -> vector<16x128xf32>
    %c1_274 = arith.constant 1 : index
    %c0_275 = arith.constant 0 : index
    %c0_276 = arith.constant 0 : index
    %482 = vector.load %arg7[%c1_274, %c0_275, %c0_276] : memref<2x1x128xf32, #tpu.memory_space<vmem>>, vector<1x1x128xf32>
    %483 = vector.shape_cast %482 : vector<1x1x128xf32> to vector<1x128xf32>
    %484 = vector.broadcast %483 : vector<1x128xf32> to vector<16x128xf32>
    %485 = arith.addf %481, %484 : vector<16x128xf32>
    %cst_277 = arith.constant 0.000000e+00 : f32
    %486 = vector.broadcast %cst_277 : f32 to vector<16x128xf32>
    %487 = arith.cmpf oge, %485, %486 : vector<16x128xf32>
    %cst_278 = arith.constant 0.00999999977 : f32
    %488 = vector.broadcast %cst_278 : f32 to vector<16x128xf32>
    %489 = arith.mulf %488, %485 : vector<16x128xf32>
    %490 = arith.select %487, %485, %489 : vector<16x128xi1>, vector<16x128xf32>
    %c1_279 = arith.constant 1 : index
    %c0_280 = arith.constant 0 : index
    %c0_281 = arith.constant 0 : index
    %491 = vector.load %arg8[%c1_279, %c0_280, %c0_281] : memref<2x128x32xf32, #tpu.memory_space<vmem>>, vector<1x128x32xf32>
    %492 = vector.shape_cast %491 : vector<1x128x32xf32> to vector<128x32xf32>
    %cst_282 = arith.constant dense<0.000000e+00> : vector<16x32xf32>
    %493 = tpu.matmul %490, %492, %cst_282 {dimension_numbers = #tpu.dot_dimension_numbers<[1], [0], [0], [1], [0, 0, 1, 1], [], []>} : vector<16x128xf32>, vector<128x32xf32>, vector<16x32xf32> -> vector<16x32xf32>
    %494 = vector.broadcast %262 : vector<1x32xf32> to vector<16x32xf32>
    %495 = arith.addf %493, %494 : vector<16x32xf32>
    %c0_283 = arith.constant 0 : index
    %c0_284 = arith.constant 0 : index
    %496 = vector.load %arg9[%c0_283, %c0_284] : memref<32x64xf32, #tpu.memory_space<vmem>>, vector<32x64xf32>
    %cst_285 = arith.constant dense<0.000000e+00> : vector<16x64xf32>
    %497 = tpu.matmul %495, %496, %cst_285 {dimension_numbers = #tpu.dot_dimension_numbers<[1], [0], [0], [1], [0, 0, 1, 1], [], []>} : vector<16x32xf32>, vector<32x64xf32>, vector<16x64xf32> -> vector<16x64xf32>
    %c0_286 = arith.constant 0 : index
    %c0_287 = arith.constant 0 : index
    %498 = vector.load %arg10[%c0_286, %c0_287] : memref<16x64xf32, #tpu.memory_space<vmem>>, vector<16x64xf32>
    tpu.vector_store %arg10[%c0_286, %c0_287], %497 {strides = array<i32>} : memref<16x64xf32, #tpu.memory_space<vmem>>, vector<16x64xf32>,
    return
  }
}

</mosaic_0001>

<bundles_post_ra>
// kernel: gpt2_forward.1
= control target key start
LH: loop header
LB: loop body
LE: loop exit
PB: predicated region body
PF: predicated region fallthrough
CT: control target
= control target key end

     0   :  { %vm52_vm0 = vcmask 261120   ;;  %s8685_s0 = inlined_call_operand.vmem [shape: f32[16,32], index: 0, kind: input, shape index: {}]   ;;  %s8686_s1 = inlined_call_operand.vmem [shape: f32[8,8], index: 1, kind: input, shape index: {}]   ;;  %s8687_s2 = inlined_call_operand.vmem [shape: f32[24,32,8], index: 2, kind: input, shape index: {}]   ;;  %s8688_s3 = inlined_call_operand.vmem [shape: f32[24,1,8], index: 3, kind: input, shape index: {}]   ;;  %s8689_s4 = inlined_call_operand.vmem [shape: f32[8,8,32], index: 4, kind: input, shape index: {}]   ;;  %s8690_s5 = inlined_call_operand.vmem [shape: f32[12,1,32], index: 5, kind: input, shape index: {}]   ;;  %s8691_s6 = inlined_call_operand.vmem [shape: f32[2,32,128], index: 6, kind: input, shape index: {}]   ;;  %s8692_s7 = inlined_call_operand.vmem [shape: f32[2,1,128], index: 7, kind: input, shape index: {}]   ;;  %s8693_s8 = inlined_call_operand.vmem [shape: f32[2,128,32], index: 8, kind: input, shape index: {}]   ;;  %s8694_s9 = inlined_call_operand.vmem [shape: f32[32,64], index: 9, kind: input, shape index: {}]   ;;  %s8695_s10 = inlined_call_operand.hbm [shape: f32[16,64], index: 10, kind: output, shape index: {}]  }
   0x1   :  { %v36_v0 = vld [vmem:[%s8685_s0] sm:$0xff]  ;;  %v37_v1 = vld [vmem:[%s8685_s0 + $0x8] sm:$0xff] }
   0x2   :  { %15 = vsyncpa [#allocation3], 0  ;;  %v53_v2 = vsel %vm52_vm0, %v36_v0, 0.0  ;;  %v56_v3 = vsel %vm52_vm0, %v37_v1, 0.0  ;;  %v96_v14 = vld [vmem:[%s8687_s2] sm:$0xff]  ;;  %v97_v15 = vld [vmem:[%s8687_s2 + $0x8] sm:$0xff] }
   0x3   :  { %54 = vadd.xlane.f32.xlu0 %v53_v2  ;;  %v6075_v16 = vld [vmem:[%s8687_s2 + $0x100] sm:$0xff]  ;;  %v7220_v17 = vpack.c.bf16 %v97_v15, %v96_v14  ;;  %v6076_v18 = vld [vmem:[%s8687_s2 + $0x108] sm:$0xff]  ;;  %v98_v20 = vld [vmem:[%s8687_s2 + $0x10] sm:$0xff]  ;;  %vm7599_vm1 = vmmov 0   ;;  %vm364_vm2 = vcmask 64512   ;;  %s7600_s18 = smov [#allocation2]  }
   0x4   :  { %v7236_v19 = vpack.c.bf16 %v6076_v18, %v6075_v16  ;;  %v99_v21 = vld [vmem:[%s8687_s2 + $0x18] sm:$0xff]  ;;  %v6077_v22 = vld [vmem:[%s8687_s2 + $0x110] sm:$0xff]  ;;  %v6067_v26 = vld [vmem:[%s8687_s2 + $0x80] sm:$0xff]  ;;  %s6046_s19 = sshll.u32 %s7600_s18, 4  ;;  %vm6038_vm7 = vcmask 523264   ;;  %s6047_s19 = int_to_ptr.vmem [resolvable:$true] %s6046_s19 }
   0x5   :  { %7221 = vmatprep.subr.bf16.mxu1 %v7220_v17  ;;  %v7224_v23 = vpack.c.bf16 %v99_v21, %v98_v20  ;;  %v6078_v24 = vld [vmem:[%s8687_s2 + $0x118] sm:$0xff]  ;;  %v6068_v27 = vld [vmem:[%s8687_s2 + $0x88] sm:$0xff]  ;;  %v6087_v28 = vld [vmem:[%s8687_s2 + $0x20] sm:$0xff]  ;;  %v7598_v20 = vmov 0.0   ;;  %p7579_p1 = scmp.lt.s32.totalorder %s6047_s19, %s6047_s19 }
   0x6   :  { %7237 = vmatprep.subr.bf16.mxu0 %v7236_v19  ;;  %7223 = vmatpush3.bf16.msra.mxu1 %v7220_v17  ;;  %v7240_v25 = vpack.c.bf16 %v6078_v24, %v6077_v22  ;;  %v7228_v29 = vpack.c.bf16 %v6068_v27, %v6067_v26  ;;  %v6088_v30 = vld [vmem:[%s8687_s2 + $0x28] sm:$0xff]  ;;  %v6062_v39 = vld [vmem:[%s8690_s5] ss:$0 sm:$0xff]  ;;  %v6063_v41 = vld [vmem:[%s8690_s5 + $0x1] ss:$0 sm:$0xff] }
   0x7   :  { %57 = vadd.xlane.f32.xlu0 %v56_v3  ;;  %7239 = vmatpush3.bf16.msra.mxu0 %v7236_v19  ;;  %v7244_v31 = vpack.c.bf16 %v6088_v30, %v6087_v28  ;;  %v6069_v46 = vld [vmem:[%s8687_s2 + $0x90] sm:$0xff]  ;;  %v6070_v48 = vld [vmem:[%s8687_s2 + $0x98] sm:$0xff]  ;;  %v6103_v54 = vld [vmem:[%s8687_s2 + $0x120] sm:$0xff] }
   0x8   :  { %7225 = vmatprep.subr.bf16.mxu1 %v7224_v23  ;;  %7241 = vmatprep.subr.bf16.mxu0 %v7240_v25  ;;  %v6089_v49 = vld [vmem:[%s8687_s2 + $0x30] sm:$0xff]  ;;  %v6090_v50 = vld [vmem:[%s8687_s2 + $0x38] sm:$0xff]  ;;  %v7232_v52 = vpack.c.bf16 %v6070_v48, %v6069_v46  ;;  %v6104_v55 = vld [vmem:[%s8687_s2 + $0x128] sm:$0xff] }
   0x9   :  { %v7248_v53 = vpack.c.bf16 %v6090_v50, %v6089_v49  ;;  %v7260_v56 = vpack.c.bf16 %v6104_v55, %v6103_v54  ;;  %v6105_v57 = vld [vmem:[%s8687_s2 + $0x130] sm:$0xff]  ;;  %v6106_v58 = vld [vmem:[%s8687_s2 + $0x138] sm:$0xff]  ;;  %v6115_v60 = vld [vmem:[%s8687_s2 + $0x40] sm:$0xff] }
   0xa   :  { %7227 = vmatpush3.bf16.msra.mxu1 %v7224_v23  ;;  %v7264_v59 = vpack.c.bf16 %v6106_v58, %v6105_v57  ;;  %v6116_v61 = vld [vmem:[%s8687_s2 + $0x48] sm:$0xff]  ;;  %v6117_v63 = vld [vmem:[%s8687_s2 + $0x50] sm:$0xff]  ;;  %v6131_v2 = vld [vmem:[%s8687_s2 + $0x140] sm:$0xff] }
   0xb   :  { %7243 = vmatpush3.bf16.msra.mxu0 %v7240_v25  ;;  %7229 = vmatprep.subr.bf16.mxu1 %v7228_v29  ;;  %v7268_v62 = vpack.c.bf16 %v6116_v61, %v6115_v60  ;;  %v6132_v3 = vld [vmem:[%s8687_s2 + $0x148] sm:$0xff]  ;;  %v6159_v14 = vld [vmem:[%s8687_s2 + $0x160] sm:$0xff]  ;;  %v6161_v17 = vld [vmem:[%s8687_s2 + $0x170] sm:$0xff] }
   0xc   :  { %7245 = vmatprep.subr.bf16.mxu0 %v7244_v31  ;;  %v6160_v15 = vld [vmem:[%s8687_s2 + $0x168] sm:$0xff]  ;;  %v6162_v18 = vld [vmem:[%s8687_s2 + $0x178] sm:$0xff]  ;;  %v6072_v27 = vld [vmem:[%s8688_s3 + $0x4] ss:$0 sm:$0xff] }
   0xd   :  { %v7308_v16 = vpack.c.bf16 %v6160_v15, %v6159_v14  ;;  %v7312_v19 = vpack.c.bf16 %v6162_v18, %v6161_v17  ;;  %v7831_v21 = vld [vmem:[%s8688_s3 + $0x8] ss:$0 sm:$0xff]  ;;  %v7935_v14 = vld [vmem:[%s8686_s1] sm:$0xff] }
   0xe   :  { %v39_v15 = vsub.f32 1.0, %v7935_v14 }
  0x90   :  { %v55_v4 = vpop.xlane.xlu0 %54 }
  0x91   :  { %v60_v5 = vmul.f32 0.03125, %v55_v4  ;;  %v7284_v4 = vpack.c.bf16 %v6132_v3, %v6131_v2  ;;  %v6092_v3 = vld [vmem:[%s8688_s3 + $0x1] ss:$0 sm:$0xff] }
  0x93   :  { %v62_v6 = vsub.f32 %v36_v0, %v60_v5  ;;  %v6118_v0 = vld [vmem:[%s8687_s2 + $0x58] sm:$0xff]  ;;  %v6133_v5 = vld [vmem:[%s8687_s2 + $0x150] sm:$0xff] }
  0x94   :  { %v58_v7 = vpop.xlane.xlu0 %57 }
  0x95   :  { %v61_v8 = vmul.f32 0.03125, %v58_v7  ;;  %v64_v9 = vmul.f32 %v62_v6, %v62_v6 }
  0x97   :  { %v63_v10 = vsub.f32 %v37_v1, %v61_v8  ;;  %v66_v11 = vsel %vm52_vm0, %v64_v9, 0.0  ;;  %v7272_v1 = vpack.c.bf16 %v6118_v0, %v6117_v63  ;;  %v6143_v8 = vld [vmem:[%s8687_s2 + $0x60] sm:$0xff]  ;;  %v6144_v9 = vld [vmem:[%s8687_s2 + $0x68] sm:$0xff] }
  0x98   :  { %67 = vadd.xlane.f32.xlu1 %v66_v11  ;;  %v6145_v11 = vld [vmem:[%s8687_s2 + $0x70] sm:$0xff]  ;;  %v6100_v0 = vld [vmem:[%s8688_s3 + $0x5] ss:$0 sm:$0xff] }
  0x99   :  { %v65_v12 = vmul.f32 %v63_v10, %v63_v10 }
  0x9b   :  { %v69_v13 = vsel %vm52_vm0, %v65_v12, 0.0  ;;  %v6146_v12 = vld [vmem:[%s8687_s2 + $0x78] sm:$0xff] }
  0x9c   :  { %70 = vadd.xlane.f32.xlu1 %v69_v13  ;;  %v7296_v13 = vpack.c.bf16 %v6146_v12, %v6145_v11  ;;  %v6126_v11 = vld [vmem:[%s8687_s2 + $0xd8] sm:$0xff] }
 0x125   :  { %v68_v32 = vpop.xlane.xlu1 %67 }
 0x126   :  { %v72_v33 = vmul.f32 0.03125, %v68_v32  ;;  %v6064_v32 = vld [vmem:[%s8688_s3] ss:$0 sm:$0xff] }
 0x128   :  { %v74_v34 = vadd.f32 1e-05, %v72_v33 }
 0x129   :  { %v71_v35 = vpop.xlane.xlu1 %70 }
 0x12a   :  { %7517 = vrsqrt.f32 %v74_v34  ;;  %v73_v36 = vmul.f32 0.03125, %v71_v35  ;;  %v6095_v34 = vld [vmem:[%s8687_s2 + $0xa0] sm:$0xff]  ;;  %v6096_v35 = vld [vmem:[%s8687_s2 + $0xa8] sm:$0xff] }
 0x12c   :  { %v75_v37 = vadd.f32 1e-05, %v73_v36 }
 0x12e   :  { %7519 = vrsqrt.f32 %v75_v37  ;;  %v7252_v37 = vpack.c.bf16 %v6096_v35, %v6095_v34  ;;  %v6128_v35 = vld [vmem:[%s8688_s3 + $0x6] ss:$0 sm:$0xff] }
 0x134   :  { %v7518_v38 = vpop.eup %7517 }
 0x135   :  { %v78_v40 = vmul.f32 %v7518_v38, %v62_v6  ;;  %v6134_v6 = vld [vmem:[%s8687_s2 + $0x158] sm:$0xff] }
 0x136   :  { %v7288_v7 = vpack.c.bf16 %v6134_v6, %v6133_v5  ;;  %v6123_v5 = vld [vmem:[%s8687_s2 + $0xc0] sm:$0xff]  ;;  %v6124_v6 = vld [vmem:[%s8687_s2 + $0xc8] sm:$0xff] }
 0x137   :  { %v86_v42 = vmul.f32 %v6062_v39, %v78_v40  ;;  %v6097_v40 = vld [vmem:[%s8687_s2 + $0xb0] sm:$0xff] }
 0x138   :  { %v7520_v43 = vpop.eup %7519 }
 0x139   :  { %v7710_v44 = vadd.f32 %v6063_v41, %v86_v42  ;;  %v79_v45 = vmul.f32 %v7520_v43, %v63_v10  ;;  %v7292_v10 = vpack.c.bf16 %v6144_v9, %v6143_v8  ;;  %v7276_v8 = vpack.c.bf16 %v6124_v6, %v6123_v5  ;;  %v6156_v5 = vld [vmem:[%s8688_s3 + $0x7] ss:$0 sm:$0xff] }
 0x13b   :  { %v87_v47 = vmul.f32 %v6062_v39, %v79_v45  ;;  %6661 = vmatprep.mubr.msk.f32.mxu1 %vm52_vm0, %v7710_v44  ;;  %6683 = vmatprep.mubr.msk.f32.mxu0 %vm52_vm0, %v7710_v44  ;;  %v6108_v39 = vld [vmem:[%s8688_s3 + $0x9] ss:$0 sm:$0xff] }
 0x13d   :  { %v7728_v51 = vadd.f32 %v6063_v41, %v87_v47  ;;  %v6098_v41 = vld [vmem:[%s8687_s2 + $0xb8] sm:$0xff] }
 0x13e   :  { %v7256_v47 = vpack.c.bf16 %v6098_v41, %v6097_v40  ;;  %v6151_v40 = vld [vmem:[%s8687_s2 + $0xe0] sm:$0xff]  ;;  %v6152_v41 = vld [vmem:[%s8687_s2 + $0xe8] sm:$0xff] }
 0x13f   :  { %6662 = vmatmul.mubr.msk.f32.vlgmr.msra.gmra.mrb[0].mxu1 %vm52_vm0, %v7728_v51  ;;  %6684 = vmatmul.mubr.msk.f32.vlgmr.msra.gmra.mrb[0].mxu0 %vm52_vm0, %v7728_v51 }
 0x140   :  { %7231 = vmatpush3.bf16.msra.mxu1 %v7228_v29  ;;  %7247 = vmatpush3.bf16.msra.mxu0 %v7244_v31 }
 0x141   :  { %6672 = vmatprep.mubr.msk.f32.mxu1 %vm52_vm0, %v7710_v44  ;;  %6704 = vmatprep.mubr.msk.f32.mxu0 %vm52_vm0, %v7710_v44 }
 0x142   :  { %7233 = vmatprep.subr.bf16.mxu1 %v7232_v52  ;;  %7249 = vmatprep.subr.bf16.mxu0 %v7248_v53 }
 0x144   :  { %7235 = vmatpush3.bf16.msra.mxu1 %v7232_v52  ;;  %7251 = vmatpush3.bf16.msra.mxu0 %v7248_v53 }
 0x145   :  { %7261 = vmatprep.subr.bf16.mxu0 %v7260_v56  ;;  %6686 = vmatprep.subr.mxu1 %v7598_v20 }
 0x147   :  { %6673 = vmatmul.mubr.msk.f32.vlgmr.msra.gmra.mrb[2].mxu1 %vm52_vm0, %v7728_v51  ;;  %6705 = vmatmul.mubr.msk.f32.vlgmr.msra.gmra.mrb[2].mxu0 %vm52_vm0, %v7728_v51 }
 0x148   :  { %7263 = vmatpush3.bf16.msra.mxu0 %v7260_v56  ;;  %6726 = vmatprep.mubr.msk.f32.mxu0 %vm52_vm0, %v7710_v44  ;;  %v7892_v56 = vld [vmem:[%s8688_s3 + $0xb] ss:$0 sm:$0xff] }
 0x149   :  { %7265 = vmatprep.subr.bf16.mxu0 %v7264_v59  ;;  %6688 = vmatprep.mubr.msk.f32.mxu1 %vm7599_vm1, %v7598_v20 }
 0x14c   :  { %7267 = vmatpush3.bf16.msra.mxu0 %v7264_v59 }
 0x14d   :  { %7269 = vmatprep.subr.bf16.mxu0 %v7268_v62 }
 0x14f   :  { %6727 = vmatmul.mubr.msk.f32.vlgmr.msra.gmra.mrb[4].mxu0 %vm52_vm0, %v7728_v51 }
 0x150   :  { %7271 = vmatpush3.bf16.msra.mxu0 %v7268_v62  ;;  %6747 = vmatprep.mubr.msk.f32.mxu0 %vm52_vm0, %v7710_v44 }
 0x151   :  { %7273 = vmatprep.subr.bf16.mxu0 %v7272_v1 }
 0x154   :  { %7275 = vmatpush3.bf16.msra.mxu0 %v7272_v1 }
 0x155   :  { %7285 = vmatprep.subr.bf16.mxu0 %v7284_v4 }
 0x157   :  { %6748 = vmatmul.mubr.msk.f32.vlgmr.msra.gmra.mrb[6].mxu0 %vm52_vm0, %v7728_v51 }
 0x158   :  { %7287 = vmatpush3.bf16.msra.mxu0 %v7284_v4  ;;  %6769 = vmatprep.mubr.msk.f32.mxu0 %vm52_vm0, %v7710_v44 }
 0x159   :  { %7289 = vmatprep.subr.bf16.mxu0 %v7288_v7 }
 0x15c   :  { %7291 = vmatpush3.bf16.msra.mxu0 %v7288_v7 }
 0x15d   :  { %7293 = vmatprep.subr.bf16.mxu0 %v7292_v10 }
 0x15f   :  { %6770 = vmatmul.mubr.msk.f32.vlgmr.msra.gmra.mrb[8].mxu0 %vm52_vm0, %v7728_v51 }
 0x160   :  { %7295 = vmatpush3.bf16.msra.mxu0 %v7292_v10  ;;  %6790 = vmatprep.mubr.msk.f32.mxu0 %vm52_vm0, %v7710_v44  ;;  %v6125_v10 = vld [vmem:[%s8687_s2 + $0xd0] sm:$0xff] }
 0x161   :  { %7297 = vmatprep.subr.bf16.mxu0 %v7296_v13 }
 0x164   :  { %7299 = vmatpush3.bf16.msra.mxu0 %v7296_v13  ;;  %v7280_v13 = vpack.c.bf16 %v6126_v11, %v6125_v10 }
 0x165   :  { %7309 = vmatprep.subr.bf16.mxu0 %v7308_v16 }
 0x167   :  { %6791 = vmatmul.mubr.msk.f32.vlgmr.msra.gmra.mrb[10].mxu0 %vm52_vm0, %v7728_v51 }
 0x168   :  { %7311 = vmatpush3.bf16.msra.mxu0 %v7308_v16  ;;  %6812 = vmatprep.mubr.msk.f32.mxu0 %vm52_vm0, %v7710_v44  ;;  %v7938_v16 = vmul.f32 100000.0, %v39_v15 }
 0x169   :  { %7313 = vmatprep.subr.bf16.mxu0 %v7312_v19 }
 0x16c   :  { %7315 = vmatpush3.bf16.msra.mxu0 %v7312_v19 }
 0x16d   :  { %6835 = vmatprep.subr.mxu0 %v7598_v20 }
 0x16f   :  { %6813 = vmatmul.mubr.msk.f32.vlgmr.msra.gmra.mrb[12].mxu0 %vm52_vm0, %v7728_v51 }
 0x170   :  { %6837 = vmatprep.mubr.msk.f32.mxu0 %vm7599_vm1, %v7598_v20 }
 0x212   :  { %v6663_v22 = vpop.f32.mrb[0].mxu1  ;;  %v6685_v23 = vpop.f32.mrb[0].mxu0 }
 0x213   :  { %v7834_v24 = vadd.f32 %v6685_v23, %v7831_v21  ;;  %v179_v25 = vpop.f32.mrb[1].mxu1  ;;  %v7836_v26 = vpop.f32.mrb[1].mxu0  ;;  %v185_v43 = vadd.f32 %v6663_v22, %v6064_v32 }
 0x214   :  { %v180_v36 = vadd.f32 %v6064_v32, %v179_v25 }
 0x21a   :  { %v6674_v28 = vpop.f32.mrb[2].mxu1  ;;  %v7841_v29 = vpop.f32.mrb[2].mxu0 }
 0x21b   :  { %v267_v30 = vpop.f32.mrb[3].mxu1  ;;  %v600_v31 = vpop.f32.mrb[3].mxu0  ;;  %v273_v38 = vadd.f32 %v6674_v28, %v6072_v27  ;;  %v606_v12 = vadd.f32 %v7841_v29, %v6092_v3 }
 0x21c   :  { %v268_v33 = vadd.f32 %v6072_v27, %v267_v30  ;;  %v601_v7 = vadd.f32 %v6092_v3, %v600_v31 }
 0x21e   :  { %6687 = vmatpush3.xpose.msk.msra.mxu1 %vm364_vm2, %v268_v33 }
 0x21f   :  { %6691 = vmatprep.subr.mxu1 %v7598_v20 }
 0x221   :  { %6689 = vmatmul.mubr.msk.f32.vlgmr.msra.gmra.mrb[4].mxu1 %vm364_vm2, %v180_v36 }
 0x222   :  { %6692 = vmatpush3.xpose.msk.msra.mxu1 %vm364_vm2, %v273_v38  ;;  %v6728_v42 = vpop.f32.mrb[4].mxu0  ;;  %6693 = vmatprep.mubr.msk.f32.mxu1 %vm7599_vm1, %v7598_v20  ;;  %v6120_v38 = vld [vmem:[%s8688_s3 + $0x2] ss:$0 sm:$0xff] }
 0x223   :  { %v7867_v45 = vadd.f32 %v6728_v42, %v6108_v39  ;;  %v776_v46 = vpop.f32.mrb[5].mxu0  ;;  %7253 = vmatprep.subr.bf16.mxu1 %v7252_v37 }
 0x224   :  { %v777_v48 = vadd.f32 %v6108_v39, %v776_v46 }
 0x225   :  { %6694 = vmatmul.mubr.msk.f32.vlgmr.msra.gmra.mrb[6].mxu1 %vm364_vm2, %v185_v43  ;;  %v7300_v43 = vpack.c.bf16 %v6152_v41, %v6151_v40 }
 0x226   :  { %7255 = vmatpush3.bf16.msra.mxu1 %v7252_v37  ;;  %6715 = vmatprep.mubr.msk.f32.mxu1 %vm52_vm0, %v7710_v44 }
 0x227   :  { %6836 = vmatpush3.msra.mxu0 %v777_v48  ;;  %7257 = vmatprep.subr.bf16.mxu1 %v7256_v47  ;;  %v6154_v48 = vld [vmem:[%s8687_s2 + $0xf8] sm:$0xff] }
 0x22a   :  { %7259 = vmatpush3.bf16.msra.mxu1 %v7256_v47  ;;  %v7872_v49 = vpop.f32.mrb[6].mxu0  ;;  %v6153_v47 = vld [vmem:[%s8687_s2 + $0xf0] sm:$0xff] }
 0x22b   :  { %v7874_v50 = vpop.f32.mrb[7].mxu0  ;;  %6729 = vmatprep.subr.mxu1 %v7598_v20 }
 0x22c   :  { %v1021_v42 = vadd.f32 %v6120_v38, %v7874_v50  ;;  %v1026_v50 = vadd.f32 %v7872_v49, %v6120_v38 }
 0x22d   :  { %6716 = vmatmul.mubr.msk.f32.vlgmr.msra.gmra.mrb[8].mxu1 %vm52_vm0, %v7728_v51 }
 0x22e   :  { %6731 = vmatprep.mubr.msk.f32.mxu1 %vm7599_vm1, %v7598_v20 }
 0x232   :  { %v7881_v52 = vpop.f32.mrb[8].mxu0 }
 0x233   :  { %v7883_v53 = vpop.f32.mrb[9].mxu0 }
 0x23a   :  { %v7885_v54 = vpop.f32.mrb[10].mxu0 }
 0x23b   :  { %v7887_v55 = vpop.f32.mrb[11].mxu0 }
 0x242   :  { %v6814_v57 = vpop.f32.mrb[12].mxu0 }
 0x243   :  { %v7895_v58 = vadd.f32 %v6814_v57, %v7892_v56  ;;  %v7897_v59 = vpop.f32.mrb[13].mxu0  ;;  %v7304_v57 = vpack.c.bf16 %v6154_v48, %v6153_v47 }
 0x2f4   :  { %v437_v60 = vpop.f32.mrb[4].mxu1 }
 0x2f5   :  { %v6690_v61 = vpop.f32.mrb[5].mxu1  ;;  %v517_v17 = vmul.f32 %v437_v60, %v7935_v14 }
 0x2f7   :  { %v7943_v23 = vadd.f32 %v517_v17, %v7938_v16 }
 0x2f8   :  { %v513_v62 = vpop.f32.mrb[6].mxu1 }
 0x2f9   :  { %v6695_v63 = vpop.f32.mrb[7].mxu1  ;;  %v518_v25 = vmul.f32 %v513_v62, %v7935_v14 }
 0x2fb   :  { %v7953_v32 = vadd.f32 %v518_v25, %v7938_v16 }
 0x300   :  { %v6717_v1 = vpop.f32.mrb[8].mxu1 }
 0x301   :  { %v688_v2 = vpop.f32.mrb[9].mxu1  ;;  %v694_v9 = vadd.f32 %v6717_v1, %v6100_v0 }
 0x302   :  { %v689_v4 = vadd.f32 %v6100_v0, %v688_v2 }
 0x304   :  { %6730 = vmatpush3.xpose.msk.msra.mxu1 %vm364_vm2, %v689_v4 }
 0x305   :  { %6734 = vmatprep.subr.mxu1 %v7598_v20 }
 0x307   :  { %6732 = vmatmul.mubr.msk.f32.vlgmr.msra.gmra.mrb[10].mxu1 %vm364_vm2, %v601_v7 }
 0x308   :  { %6735 = vmatpush3.xpose.msk.msra.mxu1 %vm364_vm2, %v694_v9  ;;  %6736 = vmatprep.mubr.msk.f32.mxu1 %vm7599_vm1, %v7598_v20 }
 0x309   :  { %7277 = vmatprep.subr.bf16.mxu1 %v7276_v8 }
 0x30b   :  { %6737 = vmatmul.mubr.msk.f32.vlgmr.msra.gmra.mrb[12].mxu1 %vm364_vm2, %v606_v12 }
 0x30c   :  { %7279 = vmatpush3.bf16.msra.mxu1 %v7276_v8  ;;  %6758 = vmatprep.mubr.msk.f32.mxu1 %vm52_vm0, %v7710_v44  ;;  %v6148_v8 = vld [vmem:[%s8688_s3 + $0x3] ss:$0 sm:$0xff] }
 0x30d   :  { %7281 = vmatprep.subr.bf16.mxu1 %v7280_v13  ;;  %v1441_v10 = vadd.f32 %v6148_v8, %v7887_v55  ;;  %v1446_v12 = vadd.f32 %v7885_v54, %v6148_v8 }
 0x310   :  { %7283 = vmatpush3.bf16.msra.mxu1 %v7280_v13  ;;  %v356_v13 = vadd.f32 %v7831_v21, %v7836_v26 }
 0x311   :  { %6772 = vmatprep.subr.mxu1 %v7598_v20 }
 0x313   :  { %6759 = vmatmul.mubr.msk.f32.vlgmr.msra.gmra.mrb[14].mxu1 %vm52_vm0, %v7728_v51 }
 0x314   :  { %6774 = vmatprep.mubr.msk.f32.mxu1 %vm7599_vm1, %v7598_v20 }
 0x3da   :  { %v857_v18 = vpop.f32.mrb[10].mxu1 }
 0x3db   :  { %v937_v19 = vmul.f32 %v857_v18, %v7935_v14  ;;  %v6733_v22 = vpop.f32.mrb[11].mxu1 }
 0x3dd   :  { %v7947_v27 = vadd.f32 %v937_v19, %v7938_v16 }
 0x3de   :  { %v933_v28 = vpop.f32.mrb[12].mxu1 }
 0x3df   :  { %v1781_v29 = vmax.f32 %v7943_v23, %v7947_v27  ;;  %v938_v30 = vmul.f32 %v933_v28, %v7935_v14  ;;  %v6738_v31 = vpop.f32.mrb[13].mxu1 }
 0x3e1   :  { %v7956_v33 = vadd.f32 %v938_v30, %v7938_v16 }
 0x3e3   :  { %v1782_v34 = vmax.f32 %v7953_v32, %v7956_v33 }
 0x3e6   :  { %v6760_v36 = vpop.f32.mrb[14].mxu1 }
 0x3e7   :  { %v1108_v37 = vpop.f32.mrb[15].mxu1  ;;  %v1114_v46 = vadd.f32 %v6760_v36, %v6128_v35 }
 0x3e8   :  { %v1109_v39 = vadd.f32 %v6128_v35, %v1108_v37 }
 0x3ea   :  { %6773 = vmatpush3.xpose.msk.msra.mxu1 %vm364_vm2, %v1109_v39 }
 0x3eb   :  { %6777 = vmatprep.subr.mxu1 %v7598_v20 }
 0x3ed   :  { %6775 = vmatmul.mubr.msk.f32.vlgmr.msra.gmra.mrb[16].mxu1 %vm364_vm2, %v1021_v42 }
 0x3ee   :  { %6778 = vmatpush3.xpose.msk.msra.mxu1 %vm364_vm2, %v1114_v46  ;;  %6779 = vmatprep.mubr.msk.f32.mxu1 %vm7599_vm1, %v7598_v20 }
 0x3ef   :  { %7301 = vmatprep.subr.bf16.mxu1 %v7300_v43 }
 0x3f1   :  { %6780 = vmatmul.mubr.msk.f32.vlgmr.msra.gmra.mrb[18].mxu1 %vm364_vm2, %v1026_v50 }
 0x3f2   :  { %7303 = vmatpush3.bf16.msra.mxu1 %v7300_v43  ;;  %6801 = vmatprep.mubr.msk.f32.mxu1 %vm52_vm0, %v7710_v44 }
 0x3f3   :  { %7305 = vmatprep.subr.bf16.mxu1 %v7304_v57 }
 0x3f6   :  { %7307 = vmatpush3.bf16.msra.mxu1 %v7304_v57 }
 0x3f7   :  { %6815 = vmatprep.subr.mxu1 %v7598_v20 }
 0x3f9   :  { %6802 = vmatmul.mubr.msk.f32.vlgmr.msra.gmra.mrb[20].mxu1 %vm52_vm0, %v7728_v51 }
 0x3fa   :  { %6817 = vmatprep.mubr.msk.f32.mxu1 %vm7599_vm1, %v7598_v20 }
 0x4c0   :  { %v1277_v60 = vpop.f32.mrb[16].mxu1 }
 0x4c1   :  { %v1357_v49 = vmul.f32 %v1277_v60, %v7935_v14  ;;  %v6776_v61 = vpop.f32.mrb[17].mxu1 }
 0x4c3   :  { %v1359_v62 = vadd.f32 %v1357_v49, %v7938_v16 }
 0x4c4   :  { %v1353_v63 = vpop.f32.mrb[18].mxu1 }
 0x4c5   :  { %v1783_v0 = vmax.f32 %v1781_v29, %v1359_v62  ;;  %v1358_v1 = vmul.f32 %v1353_v63, %v7935_v14  ;;  %v6781_v2 = vpop.f32.mrb[19].mxu1 }
 0x4c7   :  { %v1360_v3 = vadd.f32 %v1358_v1, %v7938_v16 }
 0x4c9   :  { %v1784_v4 = vmax.f32 %v1782_v34, %v1360_v3 }
 0x4cc   :  { %v6803_v6 = vpop.f32.mrb[20].mxu1 }
 0x4cd   :  { %v1528_v7 = vpop.f32.mrb[21].mxu1  ;;  %v1534_v11 = vadd.f32 %v6803_v6, %v6156_v5 }
 0x4ce   :  { %v1529_v9 = vadd.f32 %v6156_v5, %v1528_v7 }
 0x4d0   :  { %6816 = vmatpush3.xpose.msk.msra.mxu1 %vm364_vm2, %v1529_v9 }
 0x4d1   :  { %6820 = vmatprep.subr.mxu1 %v7598_v20 }
 0x4d3   :  { %6818 = vmatmul.mubr.msk.f32.vlgmr.msra.gmra.mrb[22].mxu1 %vm364_vm2, %v1441_v10 }
 0x4d4   :  { %6821 = vmatpush3.xpose.msk.msra.mxu1 %vm364_vm2, %v1534_v11  ;;  %6822 = vmatprep.mubr.msk.f32.mxu1 %vm7599_vm1, %v7598_v20  ;;  %v6136_v11 = vld [vmem:[%s8688_s3 + $0xa] ss:$0 sm:$0xff] }
 0x4d5   :  { %6825 = vmatprep.subr.mxu1 %v7598_v20 }
 0x4d7   :  { %6823 = vmatmul.mubr.msk.f32.vlgmr.msra.gmra.mrb[24].mxu1 %vm364_vm2, %v1446_v12  ;;  %v1202_v12 = vadd.f32 %v7881_v52, %v6136_v11  ;;  %v6175_v52 = vld [vmem:[%s8689_s4 + $0x8] sm:$0xff] }
 0x4d8   :  { %6826 = vmatpush3.msra.mxu1 %v356_v13  ;;  %6827 = vmatprep.mubr.msk.f32.mxu1 %vm7599_vm1, %v7598_v20 }
 0x4d9   :  { %6830 = vmatprep.subr.mxu1 %v7598_v20  ;;  %6845 = vmatprep.subr.mxu0 %v6175_v52 }
 0x5a6   :  { %v1697_v55 = vpop.f32.mrb[22].mxu1 }
 0x5a7   :  { %v1777_v15 = vmul.f32 %v1697_v55, %v7935_v14  ;;  %v6819_v17 = vpop.f32.mrb[23].mxu1 }
 0x5a9   :  { %v1779_v18 = vadd.f32 %v1777_v15, %v7938_v16 }
 0x5aa   :  { %v1773_v54 = vpop.f32.mrb[24].mxu1 }
 0x5ab   :  { %v1785_v19 = vmax.f32 %v1783_v0, %v1779_v18  ;;  %v1778_v22 = vmul.f32 %v1773_v54, %v7935_v14  ;;  %v6824_v25 = vpop.f32.mrb[25].mxu1  ;;  %v6182_v54 = vld [vmem:[%s8689_s4 + $0x10] sm:$0xff] }
 0x5ad   :  { %v1787_v21 = vsub.f32 %v7943_v23, %v1785_v19  ;;  %v1793_v26 = vsub.f32 %v7947_v27, %v1785_v19  ;;  %v1799_v28 = vsub.f32 %v1359_v62, %v1785_v19  ;;  %v1805_v29 = vsub.f32 %v1779_v18, %v1785_v19 }
 0x5ae   :  { %v1780_v30 = vadd.f32 %v1778_v22, %v7938_v16 }
 0x5af   :  { %v1789_v31 = vmul.f32 1.442695, %v1787_v21  ;;  %v1795_v34 = vmul.f32 1.442695, %v1793_v26  ;;  %v1801_v35 = vmul.f32 1.442695, %v1799_v28 }
 0x5b0   :  { %v1786_v36 = vmax.f32 %v1784_v4, %v1780_v30  ;;  %v1807_v37 = vmul.f32 1.442695, %v1805_v29 }
 0x5b1   :  { %7521 = vpow2.f32 %v1789_v31 }
 0x5b2   :  { %7523 = vpow2.f32 %v1795_v34  ;;  %v1788_v38 = vsub.f32 %v7953_v32, %v1786_v36  ;;  %v1794_v14 = vsub.f32 %v7956_v33, %v1786_v36  ;;  %v1800_v39 = vsub.f32 %v1360_v3, %v1786_v36 }
 0x5b3   :  { %v1806_v40 = vsub.f32 %v1780_v30, %v1786_v36  ;;  %7525 = vpow2.f32 %v1801_v35  ;;  %v6187_v30 = vld [vmem:[%s8689_s4 + $0x18] sm:$0xff]  ;;  %v6190_v35 = vld [vmem:[%s8690_s5 + $0x2] ss:$0 sm:$0xff] }
 0x5b4   :  { %v1791_v23 = vmul.f32 1.442695, %v1788_v38  ;;  %v1797_v27 = vmul.f32 1.442695, %v1794_v14  ;;  %7527 = vpow2.f32 %v1807_v37  ;;  %v1803_v41 = vmul.f32 1.442695, %v1800_v39 }
 0x5b5   :  { %v1809_v42 = vmul.f32 1.442695, %v1806_v40 }
 0x5b6   :  { %7529 = vpow2.f32 %v1791_v23 }
 0x5b7   :  { %7531 = vpow2.f32 %v1797_v27 }
 0x5b8   :  { %7533 = vpow2.f32 %v1803_v41 }
 0x5b9   :  { %7535 = vpow2.f32 %v1809_v42 }
 0x5bb   :  { %v7522_v43 = vpop.eup %7521 }
 0x5bc   :  { %v7524_v46 = vpop.eup %7523 }
 0x5bd   :  { %v1811_v47 = vadd.f32 %v7524_v46, %v7522_v43  ;;  %v7526_v48 = vpop.eup %7525 }
 0x5be   :  { %v7528_v50 = vpop.eup %7527 }
 0x5bf   :  { %v1813_v32 = vadd.f32 %v7526_v48, %v1811_v47 }
 0x5c0   :  { %v7530_v57 = vpop.eup %7529 }
 0x5c1   :  { %v7532_v33 = vpop.eup %7531  ;;  %v1815_v60 = vadd.f32 %v7528_v50, %v1813_v32 }
 0x5c2   :  { %v1812_v49 = vadd.f32 %v7532_v33, %v7530_v57  ;;  %v7534_v61 = vpop.eup %7533 }
 0x5c3   :  { %7537 = vrcp.f32 %v1815_v60  ;;  %v7536_v63 = vpop.eup %7535  ;;  %v2802_v60 = vld [vmem:[%s8691_s6 + $0x10] sm:$0xff] }
 0x5c4   :  { %v1814_v62 = vadd.f32 %v7534_v61, %v1812_v49  ;;  %v2803_v49 = vld [vmem:[%s8691_s6 + $0x18] sm:$0xff] }
 0x5c6   :  { %v1816_v0 = vadd.f32 %v7536_v63, %v1814_v62  ;;  %v2898_v62 = vld [vmem:[%s8693_s8] sm:$0xff] }
 0x5c8   :  { %7539 = vrcp.f32 %v1816_v0  ;;  %v2900_v0 = vld [vmem:[%s8693_s8 + $0x10] sm:$0xff] }
 0x5cd   :  { %v7538_v1 = vpop.eup %7537 }
 0x5ce   :  { %v1821_v2 = vmul.f32 %v7538_v1, %v7522_v43  ;;  %v1970_v3 = vmul.f32 %v7538_v1, %v7524_v46  ;;  %v2282_v4 = vmul.f32 %v7538_v1, %v7526_v48  ;;  %v2515_v5 = vmul.f32 %v7538_v1, %v7528_v50 }
 0x5d0   :  { %6828 = vmatmul.mubr.msk.f32.vlgmr.msra.gmra.mrb[26].mxu1 %vm364_vm2, %v1821_v2  ;;  %6838 = vmatmul.mubr.msk.f32.vlgmr.msra.gmra.mrb[14].mxu0 %vm364_vm2, %v1970_v3  ;;  %v2901_v2 = vld [vmem:[%s8693_s8 + $0x18] sm:$0xff] }
 0x5d1   :  { %6831 = vmatpush3.msra.mxu1 %v7834_v24  ;;  %6832 = vmatprep.mubr.msk.f32.mxu1 %vm7599_vm1, %v7598_v20  ;;  %v1197_v24 = vadd.f32 %v6136_v11, %v7883_v53  ;;  %v1969_v53 = vld [vmem:[%s8689_s4] sm:$0xff]  ;;  %v7328_v3 = vpack.c.bf16 %v2901_v2, %v2900_v0  ;;  %v2907_v11 = vld [vmem:[%s8693_s8 + $0x48] sm:$0xff] }
 0x5d2   :  { %v7540_v6 = vpop.eup %7539  ;;  %6840 = vmatprep.subr.mxu1 %v7598_v20  ;;  %6846 = vmatpush3.msra.mxu0 %v6175_v52  ;;  %v6205_v2 = vld [vmem:[%s8687_s2 + $0x180] sm:$0xff] }
 0x5d3   :  { %v1822_v7 = vmul.f32 %v7540_v6, %v7530_v57  ;;  %v1971_v8 = vmul.f32 %v7540_v6, %v7532_v33  ;;  %v2283_v9 = vmul.f32 %v7540_v6, %v7534_v61  ;;  %v2516_v10 = vmul.f32 %v7540_v6, %v7536_v63  ;;  %6850 = vmatprep.subr.mxu0 %v1969_v53  ;;  %v2801_v57 = vld [vmem:[%s8691_s6 + $0x8] sm:$0xff] }
 0x5d4   :  { %v7320_v61 = vpack.c.bf16 %v2803_v49, %v2802_v60  ;;  %v2899_v63 = vld [vmem:[%s8693_s8 + $0x8] sm:$0xff] }
 0x5d5   :  { %6833 = vmatmul.mubr.msk.f32.vlgmr.msra.gmra.mrb[28].mxu1 %vm364_vm2, %v1822_v7  ;;  %v7324_v1 = vpack.c.bf16 %v2899_v63, %v2898_v62  ;;  %v2904_v7 = vld [vmem:[%s8693_s8 + $0x30] sm:$0xff] }
 0x5d6   :  { %6841 = vmatpush3.msra.mxu1 %v7867_v45  ;;  %6842 = vmatprep.mubr.msk.f32.mxu1 %vm7599_vm1, %v7598_v20  ;;  %v1617_v45 = vadd.f32 %v7892_v56, %v7897_v59 }
 0x5d7   :  { %6855 = vmatprep.subr.mxu1 %v7598_v20 }
 0x5d9   :  { %6843 = vmatmul.mubr.msk.f32.vlgmr.msra.gmra.mrb[30].mxu1 %vm364_vm2, %v1971_v8  ;;  %v2905_v8 = vld [vmem:[%s8693_s8 + $0x38] sm:$0xff] }
 0x5da   :  { %6856 = vmatpush3.msra.mxu1 %v1197_v24  ;;  %6857 = vmatprep.mubr.msk.f32.mxu1 %vm7599_vm1, %v7598_v20 }
 0x5db   :  { %6860 = vmatprep.subr.mxu1 %v7598_v20 }
 0x5dd   :  { %6858 = vmatmul.mubr.msk.f32.vlgmr.msra.gmra.mrb[32].mxu1 %vm364_vm2, %v2282_v4  ;;  %v2902_v4 = vld [vmem:[%s8693_s8 + $0x20] sm:$0xff] }
 0x5de   :  { %6861 = vmatpush3.msra.mxu1 %v1202_v12  ;;  %6862 = vmatprep.mubr.msk.f32.mxu1 %vm7599_vm1, %v7598_v20  ;;  %v2908_v12 = vld [vmem:[%s8693_s8 + $0x50] sm:$0xff] }
 0x5df   :  { %6870 = vmatprep.subr.mxu1 %v7598_v20 }
 0x5e1   :  { %6863 = vmatmul.mubr.msk.f32.vlgmr.msra.gmra.mrb[34].mxu1 %vm364_vm2, %v2283_v9  ;;  %v7336_v9 = vpack.c.bf16 %v2905_v8, %v2904_v7  ;;  %v6207_v8 = vld [vmem:[%s8687_s2 + $0x190] sm:$0xff] }
 0x5e2   :  { %6871 = vmatpush3.msra.mxu1 %v1617_v45  ;;  %6872 = vmatprep.mubr.msk.f32.mxu1 %vm7599_vm1, %v7598_v20  ;;  %v2909_v45 = vld [vmem:[%s8693_s8 + $0x58] sm:$0xff] }
 0x5e3   :  { %v7344_v52 = vpack.c.bf16 %v2909_v45, %v2908_v12  ;;  %v6213_v45 = vld [vmem:[%s8687_s2 + $0x200] sm:$0xff] }
 0x5e5   :  { %6873 = vmatmul.mubr.msk.f32.vlgmr.msra.gmra.mrb[36].mxu1 %vm364_vm2, %v2515_v5  ;;  %v2903_v5 = vld [vmem:[%s8693_s8 + $0x28] sm:$0xff] }
 0x5e6   :  { %v7332_v6 = vpack.c.bf16 %v2903_v5, %v2902_v4  ;;  %v6233_v4 = vld [vmem:[%s8687_s2 + $0x1a0] sm:$0xff] }
 0x6a3   :  { %v1892_v56 = vpop.f32.mrb[26].mxu1  ;;  %v2041_v59 = vpop.f32.mrb[14].mxu0 }
 0x6a4   :  { %v6829_v13 = vpop.f32.mrb[27].mxu1  ;;  %v6839_v55 = vpop.f32.mrb[15].mxu0  ;;  %6847 = vmatprep.mubr.msk.f32.mxu0 %vm364_vm2, %v2041_v59 }
 0x6a8   :  { %v1965_v15 = vpop.f32.mrb[28].mxu1 }
 0x6a9   :  { %v6834_v17 = vpop.f32.mrb[29].mxu1 }
 0x6ac   :  { %v2114_v18 = vpop.f32.mrb[30].mxu1 }
 0x6ad   :  { %v6844_v19 = vpop.f32.mrb[31].mxu1  ;;  %6848 = vmatmul.mubr.msk.f32.vlgmr.msra.gmra.mrb[16].mxu0 %vm364_vm2, %v2114_v18  ;;  %v6191_v18 = vld [vmem:[%s8690_s5 + $0x3] ss:$0 sm:$0xff] }
 0x6ae   :  { %6851 = vmatpush3.msra.mxu0 %v1969_v53  ;;  %6852 = vmatprep.mubr.msk.f32.mxu0 %vm364_vm2, %v1892_v56 }
 0x6af   :  { %6865 = vmatprep.subr.mxu0 %v6182_v54 }
 0x6b0   :  { %v2353_v22 = vpop.f32.mrb[32].mxu1 }
 0x6b1   :  { %v6859_v25 = vpop.f32.mrb[33].mxu1 }
 0x6b2   :  { %v6192_v25 = vld [vmem:[%s8690_s5 + $0x4] ss:$0 sm:$0xff] }
 0x6b4   :  { %v2426_v21 = vpop.f32.mrb[34].mxu1 }
 0x6b5   :  { %6853 = vmatmul.mubr.msk.f32.vlgmr.msra.gmra.mrb[16].mxu0 %vm364_vm2, %v1965_v15  ;;  %v6864_v26 = vpop.f32.mrb[35].mxu1 }
 0x6b6   :  { %6866 = vmatpush3.msra.mxu0 %v6182_v54  ;;  %6867 = vmatprep.mubr.msk.f32.mxu0 %vm364_vm2, %v2353_v22 }
 0x6b7   :  { %6875 = vmatprep.subr.mxu0 %v7598_v20 }
 0x6b8   :  { %v2586_v28 = vpop.f32.mrb[36].mxu1 }
 0x6b9   :  { %v6874_v29 = vpop.f32.mrb[37].mxu1 }
 0x6bd   :  { %6868 = vmatmul.mubr.msk.f32.vlgmr.msra.gmra.mrb[16].mxu0 %vm364_vm2, %v2426_v21 }
 0x6be   :  { %6876 = vmatpush3.msra.mxu0 %v7895_v58  ;;  %6877 = vmatprep.mubr.msk.f32.mxu0 %vm7599_vm1, %v7598_v20 }
 0x6bf   :  { %6880 = vmatprep.subr.mxu0 %v6187_v30 }
 0x6c1   :  { %6878 = vmatmul.mubr.msk.f32.vlgmr.msra.gmra.mrb[18].mxu0 %vm364_vm2, %v2516_v10  ;;  %v2906_v10 = vld [vmem:[%s8693_s8 + $0x40] sm:$0xff] }
 0x6c2   :  { %6882 = vmatprep.mubr.msk.f32.mxu0 %vm364_vm2, %v2586_v28  ;;  %6881 = vmatpush3.msra.mxu0 %v6187_v30  ;;  %v7340_v24 = vpack.c.bf16 %v2907_v11, %v2906_v10  ;;  %v2910_v30 = vld [vmem:[%s8693_s8 + $0x60] sm:$0xff]  ;;  %v6235_v10 = vld [vmem:[%s8687_s2 + $0x1b0] sm:$0xff] }
 0x6c3   :  { %7325 = vmatprep.subr.bf16.mxu0 %v7324_v1 }
 0x794   :  { %v2659_v31 = vpop.f32.mrb[18].mxu0 }
 0x795   :  { %v6879_v34 = vpop.f32.mrb[19].mxu0  ;;  %6883 = vmatmul.mubr.msk.f32.vlgmr.msra.gmra.mrb[16].mxu0 %vm364_vm2, %v2659_v31  ;;  %v2911_v31 = vld [vmem:[%s8693_s8 + $0x68] sm:$0xff] }
 0x796   :  { %7327 = vmatpush3.bf16.msra.mxu0 %v7324_v1  ;;  %v7348_v34 = vpack.c.bf16 %v2911_v31, %v2910_v30 }
 0x797   :  { %7329 = vmatprep.subr.bf16.mxu0 %v7328_v3 }
 0x79a   :  { %7331 = vmatpush3.bf16.msra.mxu0 %v7328_v3  ;;  %v6206_v3 = vld [vmem:[%s8687_s2 + $0x188] sm:$0xff] }
 0x79b   :  { %7333 = vmatprep.subr.bf16.mxu0 %v7332_v6  ;;  %v7356_v5 = vpack.c.bf16 %v6206_v3, %v6205_v2  ;;  %v6292_v2 = vld [vmem:[%s8687_s2 + $0x1f8] sm:$0xff] }
 0x79e   :  { %7335 = vmatpush3.bf16.msra.mxu0 %v7332_v6  ;;  %v6234_v6 = vld [vmem:[%s8687_s2 + $0x1a8] sm:$0xff] }
 0x79f   :  { %7337 = vmatprep.subr.bf16.mxu0 %v7336_v9  ;;  %v7380_v7 = vpack.c.bf16 %v6234_v6, %v6233_v4  ;;  %v6305_v4 = vld [vmem:[%s8687_s2 + $0x2e0] sm:$0xff] }
 0x7a2   :  { %7339 = vmatpush3.bf16.msra.mxu0 %v7336_v9  ;;  %v6208_v9 = vld [vmem:[%s8687_s2 + $0x198] sm:$0xff] }
 0x7a3   :  { %7341 = vmatprep.subr.bf16.mxu0 %v7340_v24  ;;  %v7360_v11 = vpack.c.bf16 %v6208_v9, %v6207_v8  ;;  %v6308_v8 = vld [vmem:[%s8687_s2 + $0x2f8] sm:$0xff] }
 0x7a6   :  { %7343 = vmatpush3.bf16.msra.mxu0 %v7340_v24  ;;  %v6236_v24 = vld [vmem:[%s8687_s2 + $0x1b8] sm:$0xff] }
 0x7a7   :  { %7345 = vmatprep.subr.bf16.mxu0 %v7344_v52  ;;  %v7384_v12 = vpack.c.bf16 %v6236_v24, %v6235_v10 }
 0x7aa   :  { %7347 = vmatpush3.bf16.msra.mxu0 %v7344_v52  ;;  %v6214_v52 = vld [vmem:[%s8687_s2 + $0x208] sm:$0xff] }
 0x7ab   :  { %7349 = vmatprep.subr.bf16.mxu0 %v7348_v34 }
 0x7ae   :  { %7351 = vmatpush3.bf16.msra.mxu0 %v7348_v34  ;;  %v6215_v34 = vld [vmem:[%s8687_s2 + $0x210] sm:$0xff] }
 0x868   :  { %v6884_v36 = vpop.f32.mrb[16].mxu0 }
 0x869   :  { %v2755_v37 = vadd.f32 %v6884_v36, %v6190_v35  ;;  %v2737_v58 = vpop.f32.mrb[17].mxu0  ;;  %v2913_v36 = vld [vmem:[%s8693_s8 + $0x78] sm:$0xff] }
 0x86a   :  { %v2754_v38 = vadd.f32 %v6190_v35, %v2737_v58  ;;  %v2912_v35 = vld [vmem:[%s8693_s8 + $0x70] sm:$0xff]  ;;  %v6193_v58 = vld [vmem:[%s8692_s7] ss:$0 sm:$0xff] }
 0x86b   :  { %v2757_v14 = vadd.f32 %v2755_v37, %v7728_v51  ;;  %v7352_v37 = vpack.c.bf16 %v2913_v36, %v2912_v35  ;;  %v6216_v35 = vld [vmem:[%s8687_s2 + $0x218] sm:$0xff]  ;;  %v6251_v36 = vld [vmem:[%s8687_s2 + $0x2b0] sm:$0xff] }
 0x86c   :  { %v2756_v39 = vadd.f32 %v2754_v38, %v7710_v44  ;;  %v2800_v44 = vld [vmem:[%s8691_s6] sm:$0xff] }
 0x86d   :  { %v2761_v40 = vsel %vm52_vm0, %v2757_v14, 0.0  ;;  %v7316_v33 = vpack.c.bf16 %v2801_v57, %v2800_v44  ;;  %7353 = vmatprep.subr.bf16.mxu0 %v7352_v37 }
 0x86e   :  { %2762 = vadd.xlane.f32.xlu1 %v2761_v40  ;;  %v2758_v23 = vsel %vm52_vm0, %v2756_v39, 0.0  ;;  %7355 = vmatpush3.bf16.msra.mxu0 %v7352_v37  ;;  %v6252_v37 = vld [vmem:[%s8687_s2 + $0x2b8] sm:$0xff] }
 0x86f   :  { %2759 = vadd.xlane.f32.xlu0 %v2758_v23  ;;  %7317 = vmatprep.subr.bf16.mxu1 %v7316_v33 }
 0x870   :  { %7319 = vmatpush3.bf16.msra.mxu1 %v7316_v33  ;;  %7381 = vmatprep.subr.bf16.mxu0 %v7380_v7 }
 0x871   :  { %7321 = vmatprep.subr.bf16.mxu1 %v7320_v61 }
 0x874   :  { %7323 = vmatpush3.bf16.msra.mxu1 %v7320_v61 }
 0x875   :  { %7357 = vmatprep.subr.bf16.mxu1 %v7356_v5 }
 0x8fb   :  { %v2763_v27 = vpop.xlane.xlu1 %2762 }
 0x8fc   :  { %v2765_v41 = vmul.f32 0.03125, %v2763_v27  ;;  %v2760_v42 = vpop.xlane.xlu0 %2759 }
 0x8fd   :  { %v2764_v43 = vmul.f32 0.03125, %v2760_v42 }
 0x8fe   :  { %v2767_v46 = vsub.f32 %v2757_v14, %v2765_v41 }
 0x8ff   :  { %v2766_v47 = vsub.f32 %v2756_v39, %v2764_v43  ;;  %v6196_v43 = vld [vmem:[%s8690_s5 + $0x5] ss:$0 sm:$0xff] }
 0x900   :  { %v2769_v48 = vmul.f32 %v2767_v46, %v2767_v46 }
 0x901   :  { %v2768_v50 = vmul.f32 %v2766_v47, %v2766_v47 }
 0x902   :  { %v2773_v32 = vsel %vm52_vm0, %v2769_v48, 0.0 }
 0x903   :  { %2774 = vadd.xlane.f32.xlu1 %v2773_v32  ;;  %v2770_v51 = vsel %vm52_vm0, %v2768_v50, 0.0 }
 0x904   :  { %2771 = vadd.xlane.f32.xlu0 %v2770_v51 }
 0x990   :  { %v2775_v53 = vpop.xlane.xlu1 %2774 }
 0x991   :  { %v2777_v56 = vmul.f32 0.03125, %v2775_v53  ;;  %v2772_v59 = vpop.xlane.xlu0 %2771  ;;  %v6249_v53 = vld [vmem:[%s8687_s2 + $0x2a0] sm:$0xff] }
 0x992   :  { %v2776_v13 = vmul.f32 0.03125, %v2772_v59  ;;  %v6250_v59 = vld [vmem:[%s8687_s2 + $0x2a8] sm:$0xff] }
 0x993   :  { %v2779_v55 = vadd.f32 1e-05, %v2777_v56  ;;  %v7364_v56 = vpack.c.bf16 %v6214_v52, %v6213_v45  ;;  %v6218_v45 = vld [vmem:[%s8688_s3 + $0x10] ss:$0 sm:$0xff] }
 0x994   :  { %v2778_v15 = vadd.f32 1e-05, %v2776_v13  ;;  %v7396_v13 = vpack.c.bf16 %v6250_v59, %v6249_v53 }
 0x995   :  { %7541 = vrsqrt.f32 %v2779_v55 }
 0x996   :  { %7543 = vrsqrt.f32 %v2778_v15 }
 0x99f   :  { %v7542_v17 = vpop.eup %7541 }
 0x9a0   :  { %v7544_v54 = vpop.eup %7543  ;;  %v2783_v19 = vmul.f32 %v7542_v17, %v2767_v46 }
 0x9a1   :  { %v2782_v22 = vmul.f32 %v7544_v54, %v2766_v47 }
 0x9a2   :  { %v2791_v21 = vmul.f32 %v6191_v18, %v2783_v19 }
 0x9a3   :  { %v2790_v26 = vmul.f32 %v6191_v18, %v2782_v22 }
 0x9a4   :  { %v2799_v29 = vadd.f32 %v6192_v25, %v2791_v21 }
 0x9a5   :  { %v2798_v28 = vadd.f32 %v6192_v25, %v2790_v26  ;;  %v6203_v25 = vld [vmem:[%s8690_s5 + $0x6] ss:$0 sm:$0xff] }
 0x9a7   :  { %6893 = vmatprep.mubr.msk.f32.mxu1 %vm52_vm0, %v2798_v28 }
 0x9a8   :  { %6894 = vmatmul.mubr.msk.f32.vlgmr.msra.gmra.mrb[38].mxu1 %vm52_vm0, %v2799_v29  ;;  %v6204_v29 = vld [vmem:[%s8690_s5 + $0x7] ss:$0 sm:$0xff] }
 0x9a9   :  { %7359 = vmatpush3.bf16.msra.mxu1 %v7356_v5  ;;  %v6306_v5 = vld [vmem:[%s8687_s2 + $0x2e8] sm:$0xff] }
 0x9aa   :  { %7361 = vmatprep.subr.bf16.mxu1 %v7360_v11  ;;  %v7444_v6 = vpack.c.bf16 %v6306_v5, %v6305_v4 }
 0x9ad   :  { %7363 = vmatpush3.bf16.msra.mxu1 %v7360_v11 }
 0x9ae   :  { %7365 = vmatprep.subr.bf16.mxu1 %v7364_v56 }
 0xa7b   :  { %v6895_v38 = vpop.f32.mrb[38].mxu1 }
 0xa7c   :  { %v2889_v14 = vadd.f32 %v6895_v38, %v6193_v58  ;;  %v2883_v39 = vpop.f32.mrb[39].mxu1 }
 0xa7d   :  { %v2884_v40 = vadd.f32 %v6193_v58, %v2883_v39  ;;  %v7368_v39 = vpack.c.bf16 %v6216_v35, %v6215_v34 }
 0xa7e   :  { %v2895_v23 = vmul.f32 0.01, %v2889_v14  ;;  %vm2893_vm3 = vcmp.ge.f32.partialorder %v2889_v14, 0.0 }
 0xa7f   :  { %v2894_v27 = vmul.f32 0.01, %v2884_v40  ;;  %vm2892_vm4 = vcmp.ge.f32.partialorder %v2884_v40, 0.0 }
 0xa80   :  { %v2897_v42 = vsel %vm2893_vm3, %v2889_v14, %v2895_v23  ;;  %v6221_v14 = vld [vmem:[%s8687_s2 + $0x280] sm:$0xff]  ;;  %v6222_v23 = vld [vmem:[%s8687_s2 + $0x288] sm:$0xff] }
 0xa81   :  { %v2896_v41 = vsel %vm2892_vm4, %v2884_v40, %v2894_v27  ;;  %v7400_v40 = vpack.c.bf16 %v6252_v37, %v6251_v36  ;;  %v6261_v27 = vld [vmem:[%s8687_s2 + $0x1c0] sm:$0xff] }
 0xa82   :  { %6928 = vmatprep.mubr.f32.mxu0 %v2896_v41  ;;  %v6262_v41 = vld [vmem:[%s8687_s2 + $0x1c8] sm:$0xff] }
 0xa83   :  { %6929 = vmatmul.mubr.f32.vlgmr.msra.gmra.mrb[20].mxu0 %v2897_v42  ;;  %v7372_v42 = vpack.c.bf16 %v6222_v23, %v6221_v14  ;;  %v8388_v23 = vld [vmem:[%s8688_s3 + $0x17] ss:$0 sm:$0xff] }
 0xa84   :  { %7383 = vmatpush3.bf16.msra.mxu0 %v7380_v7  ;;  %v6307_v7 = vld [vmem:[%s8687_s2 + $0x2f0] sm:$0xff] }
 0xa85   :  { %7385 = vmatprep.subr.bf16.mxu0 %v7384_v12  ;;  %v7448_v9 = vpack.c.bf16 %v6308_v8, %v6307_v7 }
 0xa88   :  { %7387 = vmatpush3.bf16.msra.mxu0 %v7384_v12 }
 0xa89   :  { %7397 = vmatprep.subr.bf16.mxu0 %v7396_v13 }
 0xb56   :  { %v6930_v46 = vpop.f32.mrb[20].mxu0 }
 0xb57   :  { %v2992_v47 = vadd.f32 %v6930_v46, %v6196_v43  ;;  %v2986_v48 = vpop.f32.mrb[21].mxu0  ;;  %v6223_v46 = vld [vmem:[%s8687_s2 + $0x290] sm:$0xff] }
 0xb58   :  { %v2987_v50 = vadd.f32 %v6196_v43, %v2986_v48  ;;  %v7404_v43 = vpack.c.bf16 %v6262_v41, %v6261_v27  ;;  %v6263_v48 = vld [vmem:[%s8687_s2 + $0x1d0] sm:$0xff] }
 0xb59   :  { %v3010_v32 = vsel %vm52_vm0, %v2992_v47, 0.0 }
 0xb5a   :  { %3011 = vadd.xlane.f32.xlu1 %v3010_v32  ;;  %v3007_v51 = vsel %vm52_vm0, %v2987_v50, 0.0 }
 0xb5b   :  { %3008 = vadd.xlane.f32.xlu0 %v3007_v51 }
 0xbe7   :  { %v3012_v44 = vpop.xlane.xlu1 %3011 }
 0xbe8   :  { %v3014_v57 = vmul.f32 0.03125, %v3012_v44  ;;  %v3009_v33 = vpop.xlane.xlu0 %3008  ;;  %v6277_v44 = vld [vmem:[%s8687_s2 + $0x2c0] sm:$0xff] }
 0xbe9   :  { %v3013_v60 = vmul.f32 0.03125, %v3009_v33 }
 0xbea   :  { %v3016_v49 = vsub.f32 %v2992_v47, %v3014_v57  ;;  %v6224_v47 = vld [vmem:[%s8687_s2 + $0x298] sm:$0xff]  ;;  %v6278_v57 = vld [vmem:[%s8687_s2 + $0x2c8] sm:$0xff] }
 0xbeb   :  { %v3015_v61 = vsub.f32 %v2987_v50, %v3013_v60  ;;  %v6264_v50 = vld [vmem:[%s8687_s2 + $0x1d8] sm:$0xff]  ;;  %v7376_v32 = vpack.c.bf16 %v6224_v47, %v6223_v46  ;;  %v7420_v33 = vpack.c.bf16 %v6278_v57, %v6277_v44  ;;  %v6279_v60 = vld [vmem:[%s8687_s2 + $0x2d0] sm:$0xff]  ;;  %v6238_v44 = vld [vmem:[%s8688_s3 + $0xd] ss:$0 sm:$0xff] }
 0xbec   :  { %v3018_v62 = vmul.f32 %v3016_v49, %v3016_v49  ;;  %v7408_v51 = vpack.c.bf16 %v6264_v50, %v6263_v48  ;;  %v6246_v50 = vld [vmem:[%s8688_s3 + $0x11] ss:$0 sm:$0xff] }
 0xbed   :  { %v3017_v63 = vmul.f32 %v3015_v61, %v3015_v61 }
 0xbee   :  { %v3022_v0 = vsel %vm52_vm0, %v3018_v62, 0.0  ;;  %v6289_v62 = vld [vmem:[%s8687_s2 + $0x1e0] sm:$0xff] }
 0xbef   :  { %3023 = vadd.xlane.f32.xlu1 %v3022_v0  ;;  %v3019_v1 = vsel %vm52_vm0, %v3017_v63, 0.0  ;;  %v6290_v63 = vld [vmem:[%s8687_s2 + $0x1e8] sm:$0xff] }
 0xbf0   :  { %3020 = vadd.xlane.f32.xlu0 %v3019_v1  ;;  %v7428_v0 = vpack.c.bf16 %v6290_v63, %v6289_v62  ;;  %v6291_v1 = vld [vmem:[%s8687_s2 + $0x1f0] sm:$0xff] }
 0xbf1   :  { %v7432_v3 = vpack.c.bf16 %v6292_v2, %v6291_v1  ;;  %v6271_v63 = vld [vmem:[%s8687_s2 + $0x250] sm:$0xff] }
 0xc7c   :  { %v3024_v55 = vpop.xlane.xlu1 %3023 }
 0xc7d   :  { %v3026_v15 = vmul.f32 0.03125, %v3024_v55  ;;  %v3021_v17 = vpop.xlane.xlu0 %3020 }
 0xc7e   :  { %v3025_v18 = vmul.f32 0.03125, %v3021_v17  ;;  %v6242_v17 = vld [vmem:[%s8687_s2 + $0x228] sm:$0xff] }
 0xc7f   :  { %v3028_v54 = vadd.f32 1e-05, %v3026_v15  ;;  %v6241_v15 = vld [vmem:[%s8687_s2 + $0x220] sm:$0xff] }
 0xc80   :  { %v3027_v19 = vadd.f32 1e-05, %v3025_v18 }
 0xc81   :  { %7545 = vrsqrt.f32 %v3028_v54  ;;  %v7388_v54 = vpack.c.bf16 %v6242_v17, %v6241_v15 }
 0xc82   :  { %7547 = vrsqrt.f32 %v3027_v19 }
 0xc8b   :  { %v7546_v22 = vpop.eup %7545 }
 0xc8c   :  { %v7548_v21 = vpop.eup %7547  ;;  %v3032_v26 = vmul.f32 %v7546_v22, %v3016_v49  ;;  %v6280_v49 = vld [vmem:[%s8687_s2 + $0x2d8] sm:$0xff]  ;;  %v6226_v22 = vld [vmem:[%s8688_s3 + $0x14] ss:$0 sm:$0xff] }
 0xc8d   :  { %v3031_v28 = vmul.f32 %v7548_v21, %v3015_v61  ;;  %v7424_v61 = vpack.c.bf16 %v6280_v49, %v6279_v60  ;;  %v6244_v21 = vld [vmem:[%s8687_s2 + $0x238] sm:$0xff]  ;;  %v6270_v60 = vld [vmem:[%s8687_s2 + $0x248] sm:$0xff] }
 0xc8e   :  { %v3040_v30 = vmul.f32 %v6203_v25, %v3032_v26 }
 0xc8f   :  { %v3039_v31 = vmul.f32 %v6203_v25, %v3031_v28  ;;  %v6243_v25 = vld [vmem:[%s8687_s2 + $0x230] sm:$0xff] }
 0xc90   :  { %v8225_v38 = vadd.f32 %v6204_v29, %v3040_v30  ;;  %v7392_v34 = vpack.c.bf16 %v6244_v21, %v6243_v25 }
 0xc91   :  { %v8223_v58 = vadd.f32 %v6204_v29, %v3039_v31 }
 0xc93   :  { %6939 = vmatprep.mubr.msk.f32.mxu1 %vm52_vm0, %v8223_v58  ;;  %6982 = vmatprep.mubr.msk.f32.mxu0 %vm52_vm0, %v8223_v58 }
 0xc94   :  { %6940 = vmatmul.mubr.msk.f32.vlgmr.msra.gmra.mrb[40].mxu1 %vm52_vm0, %v8225_v38  ;;  %6983 = vmatmul.mubr.msk.f32.vlgmr.msra.gmra.mrb[22].mxu0 %vm52_vm0, %v8225_v38 }
 0xc95   :  { %7367 = vmatpush3.bf16.msra.mxu1 %v7364_v56  ;;  %7399 = vmatpush3.bf16.msra.mxu0 %v7396_v13  ;;  %v6210_v13 = vld [vmem:[%s8688_s3 + $0xc] ss:$0 sm:$0xff] }
 0xc96   :  { %6950 = vmatprep.mubr.msk.f32.mxu1 %vm52_vm0, %v8223_v58  ;;  %7004 = vmatprep.mubr.msk.f32.mxu0 %vm52_vm0, %v8223_v58 }
 0xc97   :  { %7369 = vmatprep.subr.bf16.mxu1 %v7368_v39  ;;  %7401 = vmatprep.subr.bf16.mxu0 %v7400_v40 }
 0xc99   :  { %7371 = vmatpush3.bf16.msra.mxu1 %v7368_v39  ;;  %7403 = vmatpush3.bf16.msra.mxu0 %v7400_v40 }
 0xc9a   :  { %7373 = vmatprep.subr.bf16.mxu1 %v7372_v42  ;;  %7405 = vmatprep.subr.bf16.mxu0 %v7404_v43 }
 0xc9c   :  { %6951 = vmatmul.mubr.msk.f32.vlgmr.msra.gmra.mrb[42].mxu1 %vm52_vm0, %v8225_v38  ;;  %7005 = vmatmul.mubr.msk.f32.vlgmr.msra.gmra.mrb[24].mxu0 %vm52_vm0, %v8225_v38 }
 0xc9d   :  { %7375 = vmatpush3.bf16.msra.mxu1 %v7372_v42  ;;  %6961 = vmatprep.mubr.msk.f32.mxu1 %vm52_vm0, %v8223_v58 }
 0xc9e   :  { %7407 = vmatpush3.bf16.msra.mxu0 %v7404_v43  ;;  %7025 = vmatprep.mubr.msk.f32.mxu0 %vm52_vm0, %v8223_v58 }
 0xc9f   :  { %7377 = vmatprep.subr.bf16.mxu1 %v7376_v32  ;;  %7409 = vmatprep.subr.bf16.mxu0 %v7408_v51 }
 0xca1   :  { %7379 = vmatpush3.bf16.msra.mxu1 %v7376_v32 }
 0xca2   :  { %7411 = vmatpush3.bf16.msra.mxu0 %v7408_v51  ;;  %6964 = vmatprep.subr.mxu1 %v7598_v20 }
 0xca3   :  { %7421 = vmatprep.subr.bf16.mxu0 %v7420_v33 }
 0xca4   :  { %6962 = vmatmul.mubr.msk.f32.vlgmr.msra.gmra.mrb[44].mxu1 %vm52_vm0, %v8225_v38 }
 0xca5   :  { %7026 = vmatmul.mubr.msk.f32.vlgmr.msra.gmra.mrb[26].mxu0 %vm52_vm0, %v8225_v38  ;;  %6966 = vmatprep.mubr.msk.f32.mxu1 %vm7599_vm1, %v7598_v20 }
 0xca6   :  { %7423 = vmatpush3.bf16.msra.mxu0 %v7420_v33  ;;  %7047 = vmatprep.mubr.msk.f32.mxu0 %vm52_vm0, %v8223_v58  ;;  %v6269_v33 = vld [vmem:[%s8687_s2 + $0x240] sm:$0xff] }
 0xca7   :  { %7425 = vmatprep.subr.bf16.mxu0 %v7424_v61 }
 0xcaa   :  { %7427 = vmatpush3.bf16.msra.mxu0 %v7424_v61  ;;  %v7412_v61 = vpack.c.bf16 %v6270_v60, %v6269_v33  ;;  %v6294_v60 = vld [vmem:[%s8688_s3 + $0xf] ss:$0 sm:$0xff] }
 0xcab   :  { %7429 = vmatprep.subr.bf16.mxu0 %v7428_v0 }
 0xcad   :  { %7048 = vmatmul.mubr.msk.f32.vlgmr.msra.gmra.mrb[28].mxu0 %vm52_vm0, %v8225_v38 }
 0xcae   :  { %7431 = vmatpush3.bf16.msra.mxu0 %v7428_v0  ;;  %7068 = vmatprep.mubr.msk.f32.mxu0 %vm52_vm0, %v8223_v58  ;;  %v6272_v0 = vld [vmem:[%s8687_s2 + $0x258] sm:$0xff] }
 0xcaf   :  { %7433 = vmatprep.subr.bf16.mxu0 %v7432_v3  ;;  %v7416_v2 = vpack.c.bf16 %v6272_v0, %v6271_v63 }
 0xcb2   :  { %7435 = vmatpush3.bf16.msra.mxu0 %v7432_v3  ;;  %v8431_v3 = vld [vmem:[%s8686_s1] sm:$0xff] }
 0xcb3   :  { %7445 = vmatprep.subr.bf16.mxu0 %v7444_v6 }
 0xcb5   :  { %7069 = vmatmul.mubr.msk.f32.vlgmr.msra.gmra.mrb[30].mxu0 %vm52_vm0, %v8225_v38 }
 0xcb6   :  { %7447 = vmatpush3.bf16.msra.mxu0 %v7444_v6  ;;  %7090 = vmatprep.mubr.msk.f32.mxu0 %vm52_vm0, %v8223_v58 }
 0xcb7   :  { %7449 = vmatprep.subr.bf16.mxu0 %v7448_v9 }
 0xcba   :  { %7451 = vmatpush3.bf16.msra.mxu0 %v7448_v9 }
 0xcbb   :  { %7103 = vmatprep.subr.mxu0 %v7598_v20 }
 0xcbd   :  { %7091 = vmatmul.mubr.msk.f32.vlgmr.msra.gmra.mrb[32].mxu0 %vm52_vm0, %v8225_v38 }
 0xcbe   :  { %7105 = vmatprep.mubr.msk.f32.mxu0 %vm7599_vm1, %v7598_v20 }
 0xd67   :  { %v6941_v10 = vpop.f32.mrb[40].mxu1  ;;  %v8329_v11 = vpop.f32.mrb[22].mxu0 }
 0xd68   :  { %v3134_v24 = vpop.f32.mrb[41].mxu1  ;;  %v3554_v12 = vpop.f32.mrb[23].mxu0  ;;  %v3140_v28 = vadd.f32 %v6941_v10, %v6210_v13  ;;  %v3560_v1 = vadd.f32 %v8329_v11, %v6238_v44 }
 0xd69   :  { %v3135_v18 = vadd.f32 %v6210_v13, %v3134_v24  ;;  %v3555_v49 = vadd.f32 %v6238_v44, %v3554_v12  ;;  %v6302_v44 = vld [vmem:[%s8688_s3 + $0x13] ss:$0 sm:$0xff] }
 0xd6f   :  { %v6952_v52 = vpop.f32.mrb[42].mxu1  ;;  %v8334_v53 = vpop.f32.mrb[24].mxu0 }
 0xd70   :  { %v3222_v56 = vpop.f32.mrb[43].mxu1  ;;  %v8336_v59 = vpop.f32.mrb[25].mxu0  ;;  %v3228_v19 = vadd.f32 %v6952_v52, %v6218_v45 }
 0xd71   :  { %v3223_v55 = vadd.f32 %v6218_v45, %v3222_v56 }
 0xd73   :  { %6965 = vmatpush3.xpose.msk.msra.mxu1 %vm364_vm2, %v3223_v55  ;;  %v6274_v55 = vld [vmem:[%s8688_s3 + $0x12] ss:$0 sm:$0xff] }
 0xd74   :  { %6969 = vmatprep.subr.mxu1 %v7598_v20 }
 0xd76   :  { %6967 = vmatmul.mubr.msk.f32.vlgmr.msra.gmra.mrb[46].mxu1 %vm364_vm2, %v3135_v18  ;;  %v6266_v18 = vld [vmem:[%s8688_s3 + $0xe] ss:$0 sm:$0xff] }
 0xd77   :  { %v6963_v26 = vpop.f32.mrb[44].mxu1  ;;  %6970 = vmatpush3.xpose.msk.msra.mxu1 %vm364_vm2, %v3228_v19  ;;  %6971 = vmatprep.mubr.msk.f32.mxu1 %vm7599_vm1, %v7598_v20  ;;  %v6297_v19 = vld [vmem:[%s8687_s2 + $0x260] sm:$0xff] }
 0xd78   :  { %v8362_v29 = vadd.f32 %v6963_v26, %v6226_v22  ;;  %v8364_v30 = vpop.f32.mrb[26].mxu0  ;;  %v3310_v31 = vpop.f32.mrb[45].mxu1  ;;  %7389 = vmatprep.subr.bf16.mxu1 %v7388_v54 }
 0xd79   :  { %v3311_v35 = vadd.f32 %v6226_v22, %v3310_v31  ;;  %v8366_v36 = vpop.f32.mrb[27].mxu0  ;;  %v6298_v22 = vld [vmem:[%s8687_s2 + $0x268] sm:$0xff]  ;;  %v6300_v31 = vld [vmem:[%s8687_s2 + $0x278] sm:$0xff] }
 0xd7a   :  { %6972 = vmatmul.mubr.msk.f32.vlgmr.msra.gmra.mrb[48].mxu1 %vm364_vm2, %v3140_v28  ;;  %v3975_v25 = vadd.f32 %v6266_v18, %v8366_v36  ;;  %v7436_v21 = vpack.c.bf16 %v6298_v22, %v6297_v19  ;;  %v6299_v28 = vld [vmem:[%s8687_s2 + $0x270] sm:$0xff] }
 0xd7b   :  { %7391 = vmatpush3.bf16.msra.mxu1 %v7388_v54  ;;  %6993 = vmatprep.mubr.msk.f32.mxu1 %vm52_vm0, %v8223_v58 }
 0xd7c   :  { %7104 = vmatpush3.msra.mxu0 %v3311_v35  ;;  %7393 = vmatprep.subr.bf16.mxu1 %v7392_v34  ;;  %v7440_v35 = vpack.c.bf16 %v6300_v31, %v6299_v28 }
 0xd7d   :  { %7113 = vmatprep.subr.mxu0 %v7598_v20 }
 0xd7f   :  { %7395 = vmatpush3.bf16.msra.mxu1 %v7392_v34  ;;  %v3980_v34 = vadd.f32 %v8364_v30, %v6266_v18 }
 0xd80   :  { %v8372_v37 = vpop.f32.mrb[28].mxu0  ;;  %7007 = vmatprep.subr.mxu1 %v7598_v20 }
 0xd81   :  { %v8375_v14 = vpop.f32.mrb[29].mxu0 }
 0xd82   :  { %6994 = vmatmul.mubr.msk.f32.vlgmr.msra.gmra.mrb[50].mxu1 %vm52_vm0, %v8225_v38 }
 0xd83   :  { %7009 = vmatprep.mubr.msk.f32.mxu1 %vm7599_vm1, %v7598_v20 }
 0xd88   :  { %v8381_v39 = vpop.f32.mrb[30].mxu0 }
 0xd89   :  { %v8383_v40 = vpop.f32.mrb[31].mxu0  ;;  %v4400_v63 = vadd.f32 %v8381_v39, %v6294_v60 }
 0xd90   :  { %v7092_v27 = vpop.f32.mrb[32].mxu0 }
 0xd91   :  { %v8391_v41 = vadd.f32 %v7092_v27, %v8388_v23  ;;  %v8393_v42 = vpop.f32.mrb[33].mxu0 }
 0xe49   :  { %v3391_v43 = vpop.f32.mrb[46].mxu1 }
 0xe4a   :  { %v6968_v46 = vpop.f32.mrb[47].mxu1  ;;  %v3471_v4 = vmul.f32 %v8431_v3, %v3391_v43 }
 0xe4c   :  { %v8436_v8 = vadd.f32 %v3471_v4, %v7938_v16 }
 0xe4d   :  { %v3467_v47 = vpop.f32.mrb[48].mxu1 }
 0xe4e   :  { %v6973_v48 = vpop.f32.mrb[49].mxu1  ;;  %v3472_v9 = vmul.f32 %v8431_v3, %v3467_v47 }
 0xe50   :  { %v8446_v52 = vadd.f32 %v3472_v9, %v7938_v16 }
 0xe55   :  { %v6995_v32 = vpop.f32.mrb[50].mxu1 }
 0xe56   :  { %v3642_v51 = vpop.f32.mrb[51].mxu1  ;;  %v3648_v62 = vadd.f32 %v6995_v32, %v6246_v50 }
 0xe57   :  { %v3643_v57 = vadd.f32 %v6246_v50, %v3642_v51 }
 0xe59   :  { %7008 = vmatpush3.xpose.msk.msra.mxu1 %vm364_vm2, %v3643_v57 }
 0xe5a   :  { %7012 = vmatprep.subr.mxu1 %v7598_v20 }
 0xe5c   :  { %7010 = vmatmul.mubr.msk.f32.vlgmr.msra.gmra.mrb[52].mxu1 %vm364_vm2, %v3555_v49 }
 0xe5d   :  { %7013 = vmatpush3.xpose.msk.msra.mxu1 %vm364_vm2, %v3648_v62  ;;  %7014 = vmatprep.mubr.msk.f32.mxu1 %vm7599_vm1, %v7598_v20 }
 0xe5e   :  { %7413 = vmatprep.subr.bf16.mxu1 %v7412_v61 }
 0xe60   :  { %7015 = vmatmul.mubr.msk.f32.vlgmr.msra.gmra.mrb[54].mxu1 %vm364_vm2, %v3560_v1 }
 0xe61   :  { %7415 = vmatpush3.bf16.msra.mxu1 %v7412_v61  ;;  %7036 = vmatprep.mubr.msk.f32.mxu1 %vm52_vm0, %v8223_v58  ;;  %v4395_v61 = vadd.f32 %v6294_v60, %v8383_v40 }
 0xe62   :  { %7417 = vmatprep.subr.bf16.mxu1 %v7416_v2 }
 0xe65   :  { %7419 = vmatpush3.bf16.msra.mxu1 %v7416_v2 }
 0xe66   :  { %7050 = vmatprep.subr.mxu1 %v7598_v20 }
 0xe68   :  { %7037 = vmatmul.mubr.msk.f32.vlgmr.msra.gmra.mrb[56].mxu1 %vm52_vm0, %v8225_v38 }
 0xe69   :  { %7052 = vmatprep.mubr.msk.f32.mxu1 %vm7599_vm1, %v7598_v20 }
 0xf2f   :  { %v3811_v5 = vpop.f32.mrb[52].mxu1 }
 0xf30   :  { %v3891_v6 = vmul.f32 %v8431_v3, %v3811_v5  ;;  %v7011_v7 = vpop.f32.mrb[53].mxu1 }
 0xf32   :  { %v8440_v10 = vadd.f32 %v3891_v6, %v7938_v16 }
 0xf33   :  { %v3887_v11 = vpop.f32.mrb[54].mxu1 }
 0xf34   :  { %v4735_v24 = vmax.f32 %v8436_v8, %v8440_v10  ;;  %v3892_v12 = vmul.f32 %v8431_v3, %v3887_v11  ;;  %v7016_v45 = vpop.f32.mrb[55].mxu1 }
 0xf36   :  { %v8449_v56 = vadd.f32 %v3892_v12, %v7938_v16 }
 0xf38   :  { %v4736_v13 = vmax.f32 %v8446_v52, %v8449_v56 }
 0xf3b   :  { %v7038_v15 = vpop.f32.mrb[56].mxu1 }
 0xf3c   :  { %v4062_v17 = vpop.f32.mrb[57].mxu1  ;;  %v4068_v26 = vadd.f32 %v7038_v15, %v6274_v55 }
 0xf3d   :  { %v4063_v54 = vadd.f32 %v6274_v55, %v4062_v17 }
 0xf3f   :  { %7051 = vmatpush3.xpose.msk.msra.mxu1 %vm364_vm2, %v4063_v54 }
 0xf40   :  { %7055 = vmatprep.subr.mxu1 %v7598_v20 }
 0xf42   :  { %7053 = vmatmul.mubr.msk.f32.vlgmr.msra.gmra.mrb[58].mxu1 %vm364_vm2, %v3975_v25 }
 0xf43   :  { %7056 = vmatpush3.xpose.msk.msra.mxu1 %vm364_vm2, %v4068_v26  ;;  %7057 = vmatprep.mubr.msk.f32.mxu1 %vm7599_vm1, %v7598_v20 }
 0xf44   :  { %7437 = vmatprep.subr.bf16.mxu1 %v7436_v21 }
 0xf46   :  { %7058 = vmatmul.mubr.msk.f32.vlgmr.msra.gmra.mrb[60].mxu1 %vm364_vm2, %v3980_v34 }
 0xf47   :  { %7439 = vmatpush3.bf16.msra.mxu1 %v7436_v21  ;;  %7079 = vmatprep.mubr.msk.f32.mxu1 %vm52_vm0, %v8223_v58 }
 0xf48   :  { %7441 = vmatprep.subr.bf16.mxu1 %v7440_v35 }
 0xf4b   :  { %7443 = vmatpush3.bf16.msra.mxu1 %v7440_v35 }
 0xf4c   :  { %7093 = vmatprep.subr.mxu1 %v7598_v20 }
 0xf4e   :  { %7080 = vmatmul.mubr.msk.f32.vlgmr.msra.gmra.mrb[62].mxu1 %vm52_vm0, %v8225_v38 }
 0xf4f   :  { %7095 = vmatprep.mubr.msk.f32.mxu1 %vm7599_vm1, %v7598_v20 }
0x1015   :  { %v4231_v36 = vpop.f32.mrb[58].mxu1 }
0x1016   :  { %v4311_v30 = vmul.f32 %v8431_v3, %v4231_v36  ;;  %v7054_v27 = vpop.f32.mrb[59].mxu1 }
0x1018   :  { %v4313_v43 = vadd.f32 %v4311_v30, %v7938_v16 }
0x1019   :  { %v4307_v46 = vpop.f32.mrb[60].mxu1 }
0x101a   :  { %v4737_v47 = vmax.f32 %v4735_v24, %v4313_v43  ;;  %v4312_v48 = vmul.f32 %v8431_v3, %v4307_v46  ;;  %v7059_v50 = vpop.f32.mrb[61].mxu1  ;;  %v6254_v46 = vld [vmem:[%s8688_s3 + $0x15] ss:$0 sm:$0xff] }
0x101c   :  { %v4314_v32 = vadd.f32 %v4312_v48, %v7938_v16 }
0x101e   :  { %v4738_v51 = vmax.f32 %v4736_v13, %v4314_v32 }
0x1021   :  { %v7081_v57 = vpop.f32.mrb[62].mxu1 }
0x1022   :  { %v4482_v33 = vpop.f32.mrb[63].mxu1  ;;  %v4488_v62 = vadd.f32 %v7081_v57, %v6302_v44 }
0x1023   :  { %v4483_v49 = vadd.f32 %v6302_v44, %v4482_v33  ;;  %v3731_v44 = vadd.f32 %v6254_v46, %v8336_v59 }
0x1025   :  { %7094 = vmatpush3.xpose.msk.msra.mxu1 %vm364_vm2, %v4483_v49 }
0x1026   :  { %7098 = vmatprep.subr.mxu1 %v7598_v20 }
0x1028   :  { %7096 = vmatmul.mubr.msk.f32.vlgmr.msra.gmra.mrb[64].mxu1 %vm364_vm2, %v4395_v61 }
0x1029   :  { %7099 = vmatpush3.xpose.msk.msra.mxu1 %vm364_vm2, %v4488_v62  ;;  %7100 = vmatprep.mubr.msk.f32.mxu1 %vm7599_vm1, %v7598_v20  ;;  %v3736_v62 = vadd.f32 %v8334_v53, %v6254_v46  ;;  %v6350_v46 = vld [vmem:[%s8693_s8 + $0x90] sm:$0xff] }
0x102a   :  { %7108 = vmatprep.subr.mxu1 %v7598_v20 }
0x102c   :  { %7101 = vmatmul.mubr.msk.f32.vlgmr.msra.gmra.mrb[66].mxu1 %vm364_vm2, %v4400_v63  ;;  %v6282_v63 = vld [vmem:[%s8688_s3 + $0x16] ss:$0 sm:$0xff] }
0x102d   :  { %7109 = vmatpush3.msra.mxu1 %v8362_v29  ;;  %7110 = vmatprep.mubr.msk.f32.mxu1 %vm7599_vm1, %v7598_v20  ;;  %v4151_v59 = vadd.f32 %v6282_v63, %v8375_v14  ;;  %v4156_v53 = vadd.f32 %v8372_v37, %v6282_v63  ;;  %v4571_v14 = vadd.f32 %v8388_v23, %v8393_v42  ;;  %v6322_v37 = vld [vmem:[%s8689_s4 + $0x28] sm:$0xff]  ;;  %v6358_v63 = vld [vmem:[%s8693_s8 + $0xd0] sm:$0xff] }
0x102e   :  { %7118 = vmatprep.subr.mxu1 %v7598_v20 }
0x10fb   :  { %v4651_v40 = vpop.f32.mrb[64].mxu1 }
0x10fc   :  { %v4731_v0 = vmul.f32 %v8431_v3, %v4651_v40  ;;  %v7097_v1 = vpop.f32.mrb[65].mxu1  ;;  %v6319_v40 = vld [vmem:[%s8689_s4 + $0x20] sm:$0xff] }
0x10fe   :  { %v4733_v2 = vadd.f32 %v4731_v0, %v7938_v16 }
0x10ff   :  { %v4727_v4 = vpop.f32.mrb[66].mxu1 }
0x1100   :  { %v4739_v5 = vmax.f32 %v4737_v47, %v4733_v2  ;;  %v4732_v39 = vmul.f32 %v8431_v3, %v4727_v4  ;;  %v7102_v6 = vpop.f32.mrb[67].mxu1 }
0x1102   :  { %v4741_v7 = vsub.f32 %v8436_v8, %v4739_v5  ;;  %v4747_v29 = vsub.f32 %v8440_v10, %v4739_v5  ;;  %v4753_v9 = vsub.f32 %v4313_v43, %v4739_v5  ;;  %v4759_v11 = vsub.f32 %v4733_v2, %v4739_v5 }
0x1103   :  { %v4734_v24 = vadd.f32 %v4732_v39, %v7938_v16  ;;  %v6329_v39 = vld [vmem:[%s8689_s4 + $0x30] sm:$0xff] }
0x1104   :  { %v4743_v12 = vmul.f32 1.442695, %v4741_v7  ;;  %v4749_v45 = vmul.f32 1.442695, %v4747_v29  ;;  %v4755_v13 = vmul.f32 1.442695, %v4753_v9 }
0x1105   :  { %v4740_v55 = vmax.f32 %v4738_v51, %v4734_v24  ;;  %v4761_v15 = vmul.f32 1.442695, %v4759_v11 }
0x1106   :  { %7549 = vpow2.f32 %v4743_v12 }
0x1107   :  { %7551 = vpow2.f32 %v4749_v45  ;;  %v4742_v17 = vsub.f32 %v8446_v52, %v4740_v55  ;;  %v4748_v3 = vsub.f32 %v8449_v56, %v4740_v55  ;;  %v4754_v18 = vsub.f32 %v4314_v32, %v4740_v55  ;;  %v6334_v45 = vld [vmem:[%s8689_s4 + $0x38] sm:$0xff] }
0x1108   :  { %v4760_v54 = vsub.f32 %v4734_v24, %v4740_v55  ;;  %7553 = vpow2.f32 %v4755_v13 }
0x1109   :  { %v4745_v8 = vmul.f32 1.442695, %v4742_v17  ;;  %v4751_v10 = vmul.f32 1.442695, %v4748_v3  ;;  %7555 = vpow2.f32 %v4761_v15  ;;  %v4757_v19 = vmul.f32 1.442695, %v4754_v18 }
0x110a   :  { %v4763_v16 = vmul.f32 1.442695, %v4760_v54  ;;  %v6337_v15 = vld [vmem:[%s8690_s5 + $0x8] ss:$0 sm:$0xff] }
0x110b   :  { %7557 = vpow2.f32 %v4745_v8 }
0x110c   :  { %7559 = vpow2.f32 %v4751_v10 }
0x110d   :  { %7561 = vpow2.f32 %v4757_v19 }
0x110e   :  { %7563 = vpow2.f32 %v4763_v16 }
0x1110   :  { %v7550_v22 = vpop.eup %7549 }
0x1111   :  { %v7552_v25 = vpop.eup %7551 }
0x1112   :  { %v4765_v21 = vadd.f32 %v7552_v25, %v7550_v22  ;;  %v7554_v26 = vpop.eup %7553 }
0x1113   :  { %v7556_v28 = vpop.eup %7555 }
0x1114   :  { %v4767_v52 = vadd.f32 %v7554_v26, %v4765_v21 }
0x1115   :  { %v7558_v31 = vpop.eup %7557 }
0x1116   :  { %v7560_v56 = vpop.eup %7559  ;;  %v4769_v34 = vadd.f32 %v7556_v28, %v4767_v52 }
0x1117   :  { %v4766_v35 = vadd.f32 %v7560_v56, %v7558_v31  ;;  %v7562_v36 = vpop.eup %7561 }
0x1118   :  { %7565 = vrcp.f32 %v4769_v34  ;;  %v7564_v27 = vpop.eup %7563 }
0x1119   :  { %v4768_v30 = vadd.f32 %v7562_v36, %v4766_v35  ;;  %v6342_v35 = vld [vmem:[%s8691_s6 + $0x30] sm:$0xff] }
0x111b   :  { %v4770_v43 = vadd.f32 %v7564_v27, %v4768_v30 }
0x111d   :  { %7567 = vrcp.f32 %v4770_v43  ;;  %v6349_v43 = vld [vmem:[%s8693_s8 + $0x88] sm:$0xff] }
0x1122   :  { %v7566_v47 = vpop.eup %7565 }
0x1123   :  { %v4775_v48 = vmul.f32 %v7566_v47, %v7550_v22  ;;  %v4925_v50 = vmul.f32 %v7566_v47, %v7552_v25  ;;  %v5237_v32 = vmul.f32 %v7566_v47, %v7554_v26  ;;  %v5470_v51 = vmul.f32 %v7566_v47, %v7556_v28 }
0x1125   :  { %7106 = vmatmul.mubr.msk.f32.vlgmr.msra.gmra.mrb[34].mxu0 %vm364_vm2, %v4775_v48  ;;  %v6351_v48 = vld [vmem:[%s8693_s8 + $0x98] sm:$0xff] }
0x1126   :  { %7114 = vmatpush3.msra.mxu0 %v3731_v44  ;;  %7115 = vmatprep.mubr.msk.f32.mxu0 %vm7599_vm1, %v7598_v20 }
0x1127   :  { %v7568_v57 = vpop.eup %7567  ;;  %7123 = vmatprep.subr.mxu0 %v6322_v37 }
0x1128   :  { %v4776_v33 = vmul.f32 %v7568_v57, %v7558_v31  ;;  %v4926_v60 = vmul.f32 %v7568_v57, %v7560_v56  ;;  %v5238_v49 = vmul.f32 %v7568_v57, %v7562_v36  ;;  %v5471_v61 = vmul.f32 %v7568_v57, %v7564_v27  ;;  %v6341_v56 = vld [vmem:[%s8691_s6 + $0x28] sm:$0xff]  ;;  %v6343_v36 = vld [vmem:[%s8691_s6 + $0x38] sm:$0xff]  ;;  %v6348_v27 = vld [vmem:[%s8693_s8 + $0x80] sm:$0xff] }
0x1129   :  { %7116 = vmatmul.mubr.msk.f32.vlgmr.msra.gmra.mrb[36].mxu0 %vm364_vm2, %v4925_v50  ;;  %v7456_v30 = vpack.c.bf16 %v6343_v36, %v6342_v35  ;;  %v7460_v47 = vpack.c.bf16 %v6349_v43, %v6348_v27  ;;  %v7464_v50 = vpack.c.bf16 %v6351_v48, %v6350_v46  ;;  %v6354_v57 = vld [vmem:[%s8693_s8 + $0xb0] sm:$0xff] }
0x112a   :  { %7111 = vmatmul.mubr.msk.f32.vlgmr.msra.gmra.mrb[68].mxu1 %vm364_vm2, %v4776_v33  ;;  %7124 = vmatpush3.msra.mxu0 %v6322_v37  ;;  %v6355_v33 = vld [vmem:[%s8693_s8 + $0xb8] sm:$0xff] }
0x112b   :  { %7119 = vmatpush3.msra.mxu1 %v3736_v62  ;;  %7120 = vmatprep.mubr.msk.f32.mxu1 %vm7599_vm1, %v7598_v20 }
0x112c   :  { %7133 = vmatprep.subr.mxu1 %v7598_v20  ;;  %7128 = vmatprep.subr.mxu0 %v6319_v40 }
0x112e   :  { %7121 = vmatmul.mubr.msk.f32.vlgmr.msra.gmra.mrb[70].mxu1 %vm364_vm2, %v4926_v60  ;;  %v7472_v60 = vpack.c.bf16 %v6355_v33, %v6354_v57 }
0x112f   :  { %7134 = vmatpush3.msra.mxu1 %v4151_v59  ;;  %7135 = vmatprep.mubr.msk.f32.mxu1 %vm7599_vm1, %v7598_v20  ;;  %v6359_v59 = vld [vmem:[%s8693_s8 + $0xd8] sm:$0xff] }
0x1130   :  { %7138 = vmatprep.subr.mxu1 %v7598_v20 }
0x1132   :  { %7136 = vmatmul.mubr.msk.f32.vlgmr.msra.gmra.mrb[72].mxu1 %vm364_vm2, %v5237_v32  ;;  %v6352_v32 = vld [vmem:[%s8693_s8 + $0xa0] sm:$0xff] }
0x1133   :  { %7139 = vmatpush3.msra.mxu1 %v4156_v53  ;;  %7140 = vmatprep.mubr.msk.f32.mxu1 %vm7599_vm1, %v7598_v20  ;;  %v7480_v53 = vpack.c.bf16 %v6359_v59, %v6358_v63 }
0x1134   :  { %7148 = vmatprep.subr.mxu1 %v7598_v20 }
0x1136   :  { %7141 = vmatmul.mubr.msk.f32.vlgmr.msra.gmra.mrb[74].mxu1 %vm364_vm2, %v5238_v49  ;;  %v6356_v49 = vld [vmem:[%s8693_s8 + $0xc0] sm:$0xff] }
0x1137   :  { %7149 = vmatpush3.msra.mxu1 %v4571_v14  ;;  %7150 = vmatprep.mubr.msk.f32.mxu1 %vm7599_vm1, %v7598_v20 }
0x113a   :  { %7151 = vmatmul.mubr.msk.f32.vlgmr.msra.gmra.mrb[76].mxu1 %vm364_vm2, %v5470_v51  ;;  %v6353_v51 = vld [vmem:[%s8693_s8 + $0xa8] sm:$0xff] }
0x113b   :  { %v7468_v44 = vpack.c.bf16 %v6353_v51, %v6352_v32 }
0x11f8   :  { %v4846_v23 = vpop.f32.mrb[34].mxu0 }
0x11f9   :  { %v7107_v42 = vpop.f32.mrb[35].mxu0 }
0x11fc   :  { %v4996_v0 = vpop.f32.mrb[36].mxu0 }
0x11fd   :  { %v4919_v1 = vpop.f32.mrb[68].mxu1  ;;  %v7117_v2 = vpop.f32.mrb[37].mxu0  ;;  %7125 = vmatprep.mubr.msk.f32.mxu0 %vm364_vm2, %v4996_v0 }
0x11fe   :  { %v7112_v4 = vpop.f32.mrb[69].mxu1  ;;  %v6338_v2 = vld [vmem:[%s8690_s5 + $0x9] ss:$0 sm:$0xff] }
0x1201   :  { %v5069_v5 = vpop.f32.mrb[70].mxu1 }
0x1202   :  { %v7122_v6 = vpop.f32.mrb[71].mxu1  ;;  %7126 = vmatmul.mubr.msk.f32.vlgmr.msra.gmra.mrb[38].mxu0 %vm364_vm2, %v5069_v5 }
0x1203   :  { %7129 = vmatpush3.msra.mxu0 %v6319_v40  ;;  %7130 = vmatprep.mubr.msk.f32.mxu0 %vm364_vm2, %v4846_v23  ;;  %v6339_v6 = vld [vmem:[%s8690_s5 + $0xa] ss:$0 sm:$0xff] }
0x1204   :  { %7143 = vmatprep.subr.mxu0 %v6329_v39 }
0x1205   :  { %v5308_v7 = vpop.f32.mrb[72].mxu1 }
0x1206   :  { %v7137_v29 = vpop.f32.mrb[73].mxu1 }
0x1209   :  { %v5381_v9 = vpop.f32.mrb[74].mxu1 }
0x120a   :  { %7131 = vmatmul.mubr.msk.f32.vlgmr.msra.gmra.mrb[38].mxu0 %vm364_vm2, %v4919_v1  ;;  %v7142_v11 = vpop.f32.mrb[75].mxu1 }
0x120b   :  { %7144 = vmatpush3.msra.mxu0 %v6329_v39  ;;  %7145 = vmatprep.mubr.msk.f32.mxu0 %vm364_vm2, %v5308_v7 }
0x120c   :  { %7153 = vmatprep.subr.mxu0 %v7598_v20 }
0x120d   :  { %v5541_v24 = vpop.f32.mrb[76].mxu1 }
0x120e   :  { %v7152_v12 = vpop.f32.mrb[77].mxu1 }
0x120f   :  { %v6361_v12 = vld [vmem:[%s8693_s8 + $0xe8] sm:$0xff] }
0x1212   :  { %7146 = vmatmul.mubr.msk.f32.vlgmr.msra.gmra.mrb[38].mxu0 %vm364_vm2, %v5381_v9 }
0x1213   :  { %7154 = vmatpush3.msra.mxu0 %v8391_v41  ;;  %7155 = vmatprep.mubr.msk.f32.mxu0 %vm7599_vm1, %v7598_v20 }
0x1214   :  { %7158 = vmatprep.subr.mxu0 %v6334_v45 }
0x1216   :  { %7156 = vmatmul.mubr.msk.f32.vlgmr.msra.gmra.mrb[40].mxu0 %vm364_vm2, %v5471_v61  ;;  %v6357_v61 = vld [vmem:[%s8693_s8 + $0xc8] sm:$0xff] }
0x1217   :  { %7160 = vmatprep.mubr.msk.f32.mxu0 %vm364_vm2, %v5541_v24  ;;  %7159 = vmatpush3.msra.mxu0 %v6334_v45  ;;  %v7476_v62 = vpack.c.bf16 %v6357_v61, %v6356_v49  ;;  %v6360_v24 = vld [vmem:[%s8693_s8 + $0xe0] sm:$0xff] }
0x1218   :  { %7461 = vmatprep.subr.bf16.mxu0 %v7460_v47  ;;  %v7484_v45 = vpack.c.bf16 %v6361_v12, %v6360_v24 }
0x12e9   :  { %v5614_v13 = vpop.f32.mrb[40].mxu0 }
0x12ea   :  { %v7157_v55 = vpop.f32.mrb[41].mxu0  ;;  %7161 = vmatmul.mubr.msk.f32.vlgmr.msra.gmra.mrb[38].mxu0 %vm364_vm2, %v5614_v13  ;;  %v6362_v13 = vld [vmem:[%s8693_s8 + $0xf0] sm:$0xff] }
0x12eb   :  { %7463 = vmatpush3.bf16.msra.mxu0 %v7460_v47  ;;  %v6363_v55 = vld [vmem:[%s8693_s8 + $0xf8] sm:$0xff] }
0x12ec   :  { %7465 = vmatprep.subr.bf16.mxu0 %v7464_v50 }
0x12ef   :  { %7467 = vmatpush3.bf16.msra.mxu0 %v7464_v50 }
0x12f0   :  { %7469 = vmatprep.subr.bf16.mxu0 %v7468_v44 }
0x12f3   :  { %7471 = vmatpush3.bf16.msra.mxu0 %v7468_v44 }
0x12f4   :  { %7473 = vmatprep.subr.bf16.mxu0 %v7472_v60 }
0x12f7   :  { %7475 = vmatpush3.bf16.msra.mxu0 %v7472_v60 }
0x12f8   :  { %7477 = vmatprep.subr.bf16.mxu0 %v7476_v62 }
0x12fb   :  { %7479 = vmatpush3.bf16.msra.mxu0 %v7476_v62 }
0x12fc   :  { %7481 = vmatprep.subr.bf16.mxu0 %v7480_v53 }
0x12ff   :  { %7483 = vmatpush3.bf16.msra.mxu0 %v7480_v53 }
0x1300   :  { %7485 = vmatprep.subr.bf16.mxu0 %v7484_v45 }
0x1303   :  { %7487 = vmatpush3.bf16.msra.mxu0 %v7484_v45 }
0x13bd   :  { %v7162_v17 = vpop.f32.mrb[38].mxu0 }
0x13be   :  { %v5710_v3 = vadd.f32 %v7162_v17, %v6337_v15  ;;  %v5692_v41 = vpop.f32.mrb[39].mxu0  ;;  %v5953_v17 = vld [vmem:[%s8694_s9] sm:$0xff] }
0x13bf   :  { %v5709_v18 = vadd.f32 %v6337_v15, %v5692_v41  ;;  %v7488_v15 = vpack.c.bf16 %v6363_v55, %v6362_v13 }
0x13c0   :  { %v5712_v20 = vadd.f32 %v5710_v3, %v8225_v38  ;;  %v5954_v3 = vld [vmem:[%s8694_s9 + $0x8] sm:$0xff] }
0x13c1   :  { %v5711_v54 = vadd.f32 %v5709_v18, %v8223_v58  ;;  %v6340_v58 = vld [vmem:[%s8691_s6 + $0x20] sm:$0xff]  ;;  %7489 = vmatprep.subr.bf16.mxu0 %v7488_v15  ;;  %v7492_v41 = vpack.c.bf16 %v5954_v3, %v5953_v17 }
0x13c2   :  { %v5716_v8 = vsel %vm52_vm0, %v5712_v20, 0.0  ;;  %v7452_v34 = vpack.c.bf16 %v6341_v56, %v6340_v58  ;;  %7491 = vmatpush3.bf16.msra.mxu0 %v7488_v15  ;;  %v6345_v18 = vld [vmem:[%s8692_s7 + $0x1] ss:$0 sm:$0xff] }
0x13c3   :  { %5717 = vadd.xlane.f32.xlu1 %v5716_v8  ;;  %v5713_v10 = vsel %vm52_vm0, %v5711_v54, 0.0 }
0x13c4   :  { %5714 = vadd.xlane.f32.xlu0 %v5713_v10  ;;  %7453 = vmatprep.subr.bf16.mxu1 %v7452_v34 }
0x13c5   :  { %7455 = vmatpush3.bf16.msra.mxu1 %v7452_v34 }
0x13c6   :  { %7457 = vmatprep.subr.bf16.mxu1 %v7456_v30 }
0x13c9   :  { %7459 = vmatpush3.bf16.msra.mxu1 %v7456_v30 }
0x13ca   :  { %7493 = vmatprep.subr.bf16.mxu1 %v7492_v41 }
0x1450   :  { %v5718_v19 = vpop.xlane.xlu1 %5717 }
0x1451   :  { %v5720_v16 = vmul.f32 0.03125, %v5718_v19  ;;  %v5715_v22 = vpop.xlane.xlu0 %5714 }
0x1452   :  { %v5719_v25 = vmul.f32 0.03125, %v5715_v22 }
0x1453   :  { %v5722_v21 = vsub.f32 %v5712_v20, %v5720_v16 }
0x1454   :  { %v5721_v26 = vsub.f32 %v5711_v54, %v5719_v25 }
0x1455   :  { %v5724_v28 = vmul.f32 %v5722_v21, %v5722_v21 }
0x1456   :  { %v5723_v52 = vmul.f32 %v5721_v26, %v5721_v26 }
0x1457   :  { %v5728_v31 = vsel %vm52_vm0, %v5724_v28, 0.0 }
0x1458   :  { %5729 = vadd.xlane.f32.xlu1 %v5728_v31  ;;  %v5725_v38 = vsel %vm52_vm0, %v5723_v52, 0.0  ;;  %v6364_v52 = vld [vmem:[%s8690_s5 + $0xb] ss:$0 sm:$0xff] }
0x1459   :  { %5726 = vadd.xlane.f32.xlu0 %v5725_v38 }
0x14e5   :  { %v5730_v14 = vpop.xlane.xlu1 %5729 }
0x14e6   :  { %v5732_v37 = vmul.f32 0.03125, %v5730_v14  ;;  %v5727_v40 = vpop.xlane.xlu0 %5726 }
0x14e7   :  { %v5731_v23 = vmul.f32 0.03125, %v5727_v40 }
0x14e8   :  { %v5734_v42 = vadd.f32 1e-05, %v5732_v37 }
0x14e9   :  { %v5733_v0 = vadd.f32 1e-05, %v5731_v23 }
0x14ea   :  { %7569 = vrsqrt.f32 %v5734_v42 }
0x14eb   :  { %7571 = vrsqrt.f32 %v5733_v0 }
0x14f4   :  { %v7570_v1 = vpop.eup %7569 }
0x14f5   :  { %v7572_v4 = vpop.eup %7571  ;;  %v5738_v5 = vmul.f32 %v7570_v1, %v5722_v21  ;;  %v5955_v21 = vld [vmem:[%s8694_s9 + $0x10] sm:$0xff] }
0x14f6   :  { %v5737_v39 = vmul.f32 %v7572_v4, %v5721_v26  ;;  %v5956_v26 = vld [vmem:[%s8694_s9 + $0x18] sm:$0xff]  ;;  %s7574_s9 = scalar_lea.vmem %s6047_s19, 256 }
0x14f7   :  { %v5746_v7 = vmul.f32 %v6338_v2, %v5738_v5  ;;  %v7496_v28 = vpack.c.bf16 %v5956_v26, %v5955_v21  ;;  %p7575_p0 = scmp.ne.s32.totalorder %s6047_s19, %s7574_s9  ;;  %p7580_p2 = scmp.lt.s32.totalorder %s7574_s9, %s7574_s9 }
0x14f8   :  { %v5745_v29 = vmul.f32 %v6338_v2, %v5737_v39 }
0x14f9   :  { %v5754_v11 = vadd.f32 %v6339_v6, %v5746_v7  ;;  %p7581_p3 = por %p7580_p2, %p7579_p1 }
0x14fa   :  { %v5753_v9 = vadd.f32 %v6339_v6, %v5745_v29 }
0x14fb   :  { %p7582_p4 = pnand %p7581_p3, %p7575_p0 }
0x14fc   :  { %7171 = vmatprep.mubr.msk.f32.mxu1 %vm52_vm0, %v5753_v9 }
0x14fd   :  { %7172 = vmatmul.mubr.msk.f32.vlgmr.msra.gmra.mrb[78].mxu1 %vm52_vm0, %v5754_v11 }
0x14fe   :  { %7495 = vmatpush3.bf16.msra.mxu1 %v7492_v41 }
0x14ff   :  { %7497 = vmatprep.subr.bf16.mxu1 %v7496_v28 }
0x1502   :  { %7499 = vmatpush3.bf16.msra.mxu1 %v7496_v28 }
0x15d0   :  { %v7173_v20 = vpop.f32.mrb[78].mxu1 }
0x15d1   :  { %v5846_v54 = vadd.f32 %v7173_v20, %v6345_v18  ;;  %v5840_v8 = vpop.f32.mrb[79].mxu1 }
0x15d2   :  { %v5841_v10 = vadd.f32 %v6345_v18, %v5840_v8 }
0x15d3   :  { %v5852_v19 = vmul.f32 0.01, %v5846_v54  ;;  %vm5850_vm5 = vcmp.ge.f32.partialorder %v5846_v54, 0.0 }
0x15d4   :  { %v5851_v16 = vmul.f32 0.01, %v5841_v10  ;;  %vm5849_vm6 = vcmp.ge.f32.partialorder %v5841_v10, 0.0 }
0x15d5   :  { %v5854_v25 = vsel %vm5850_vm5, %v5846_v54, %v5852_v19 }
0x15d6   :  { %v5853_v22 = vsel %vm5849_vm6, %v5841_v10, %v5851_v16 }
0x15d7   :  { %7206 = vmatprep.mubr.f32.mxu0 %v5853_v22 }
0x15d8   :  { %7207 = vmatmul.mubr.f32.vlgmr.msra.gmra.mrb[42].mxu0 %v5854_v25 }
0x16ab   :  { %v7208_v31 = vpop.f32.mrb[42].mxu0 }
0x16ac   :  { %v5944_v38 = vpop.f32.mrb[43].mxu0  ;;  %v5950_v56 = vadd.f32 %v7208_v31, %v6364_v52 }
0x16ad   :  { %v5945_v58 = vadd.f32 %v6364_v52, %v5944_v38 }
0x16af   :  { %7217 = vmatprep.mubr.msk.f32.mxu1 %vm52_vm0, %v5945_v58 }
0x16b0   :  { %7218 = vmatmul.mubr.msk.f32.vlgmr.msra.gmra.mrb[80].mxu1 %vm52_vm0, %v5950_v56 }
0x1783   :  { %v7219_v34 = vpop.f32.mrb[80].mxu1 }
0x1784   :  { %6040 = vst.msk [vmem:[#allocation2 + $0x8] sm:$0xff] %vm6038_vm7, %v7219_v34  ;;  %v6029_v35 = vpop.f32.mrb[81].mxu1 }
0x1785   :  { %6039 = vst.msk [vmem:[#allocation2] sm:$0xff] %vm6038_vm7, %v6029_v35 }
0x1786   :  { %7585 = shalt.err (!%p7582_p4)
}
0x1787   :  { %s7586_s21 = scalar_lea.hbm %s8695_s10, 256 }
0x1788   :  { %p7587_p5 = scmp.ne.s32.totalorder %s8695_s10, %s7586_s21  ;;  %p7590_p6 = scmp.lt.u32.totalorder %s7586_s21, %s8695_s10 }
0x178a   :  { %p7592_p7 = pnand %p7590_p6, %p7587_p5 }
0x178c   :  { %7595 = shalt.err (!%p7592_p7)
}
0x178d   :  { %s7601_s25 = smov 128   ;;  %s7602_s26 = smov 8  }
0x178e   :  { %6052 = dma.vmem_to_hbm [thread:$0]  %s6047_s19, 256, %s8695_s10, [#allocation3], %s7601_s25, %s7601_s25, %s7602_s26  }
0x178f   :  { %7596 = dma.done.wait [#allocation3], 256  }
0x1790   :  { %7597 = vsyncadd [#allocation3], 4294967040 }
0x1791   :  { %6056 = vsyncpa [#allocation3], 1 }

</bundles_post_ra>
